<compile_context>
chip_gen: v7x
topology: tpu7x:2x2x1
jax: 0.10.0
libtpu: 0.0.40
codegen_flags: <defaults>
</compile_context>

<pallas_src>
import functools

import jax
import jax.numpy as jnp
from jax.experimental import pallas as pl
from jax.experimental.pallas import tpu as pltpu

NEG_BIG = -1e30
LEAKY_SLOPE = 0.2
HIDDEN = 100          # hard-coded in the PyTorch module (nn.Embedding(..., 100))
HIDDEN_PAD = 128      # lane-dense padded hidden size
NUM_BASES = 4


# ----------------------------------------------------------------------------
# Pallas kernel: one RGAT convolution layer, tiled over destination rows.
# All heavy grid-invariant matmuls are precomputed in the wrapper; the kernel
# only does the per-(dst-tile) score chain, exact two-pass softmax, and the
# attention-weighted aggregation matmuls.
# ----------------------------------------------------------------------------
def _rgat_conv_kernel(h_all_ref, dst_ref, srcT_ref, maskb_ref, bias_ref, o_ref,
                      *, num_relations, dp, apply_relu):
    dst = dst_ref[...]            # (T, R) f32 : k_r . h_r[i] for this tile's dst nodes
    srcT = srcT_ref[...]          # (R, N) f32 : q_r . h_r[j] for all source nodes
    t = dst.shape[0]

    # --- Score chain, computed ONCE per relation and cached for both passes. ---
    # NOTE: on v6e/v7x this chain could run in bf16 for ~2x VALU throughput;
    # kept in f32 here for generation-independent correctness.
    scores = []
    m = jnp.zeros((t, 1), jnp.float32)     # row-max clamped at 0 -> isolated rows give p=0
    for r in range(num_relations):         # R small & static -> unrolled
        s = dst[:, r:r + 1] + srcT[r:r + 1, :]          # (T, N) broadcast add
        s = jnp.maximum(s, LEAKY_SLOPE * s)             # LeakyReLU(0.2), 2-op form
        s = s + maskb_ref[r]                            # additive mask (0 / -1e30)
        scores.append(s)
        m = jnp.maximum(m, jnp.max(s, axis=-1, keepdims=True))

    # --- Pass 2: exp / normalizer / aggregation (exact softmax, no rescaling). ---
    l = jnp.zeros((t, 1), jnp.float32)
    acc = jnp.zeros((t, dp), jnp.float32)
    for r in range(num_relations):
        p = jnp.exp(scores[r] - m)                      # masked entries underflow to 0
        l = l + jnp.sum(p, axis=-1, keepdims=True)
        acc = acc + jnp.dot(p.astype(jnp.bfloat16),
                            h_all_ref[:, r * dp:(r + 1) * dp],
                            preferred_element_type=jnp.float32)

    l_safe = jnp.where(l > 0.0, l, 1.0)                 # isolated nodes -> bias only
    out = acc * pl.reciprocal(l_safe, approx=True) + bias_ref[...]
    if apply_relu:                                      # fuse the inter-layer ReLU
        out = jnp.maximum(out, 0.0)
    o_ref[...] = out.astype(o_ref.dtype)


# ----------------------------------------------------------------------------
# Wrapper: padding, weight folding, hoisted matmuls, BlockSpecs / grid.
# ----------------------------------------------------------------------------
def _pad_last(a, dp):
    pad = dp - a.shape[-1]
    if pad == 0:
        return a
    cfg = [(0, 0)] * (a.ndim - 1) + [(0, pad)]
    return jnp.pad(a, cfg)


def _pad_w(w, dp):
    _, di, do = w.shape
    return jnp.pad(w, ((0, 0), (0, dp - di), (0, dp - do)))


def _vmem_limit_bytes():
    cap = 128 * 1024 * 1024
    try:
        info = pltpu.get_tpu_info()
        cap = int(getattr(info, "vmem_capacity_bytes", cap)) or cap
    except Exception:
        pass
    # v5e/v6e (128 MiB physical) -> 64 MiB; v7x (64 MiB physical) -> 48 MiB.
    return int(min(64 * 1024 * 1024, cap * 3 // 4))


def rgat_conv(x, w, att_q, att_k, mask_bias, bias, *, apply_relu=False,
              out_dtype=jnp.float32, tile_n=None):
    """One RGATConv layer.

    x:(N, D or Dp) f32/bf16, w:(R, D, D) f32, att_q/att_k:(R, D) f32,
    mask_bias:(R, N, N) f32 additive mask (0 valid / -1e30 invalid),
    bias:(D,) f32.  Returns (N, Dp) out_dtype (zero-padded beyond column D).
    """
    n = x.shape[0]
    r = w.shape[0]
    dp = HIDDEN_PAD

    x_bf = _pad_last(x, dp).astype(jnp.bfloat16)              # (N, Dp)
    w_p = _pad_w(w, dp)                                       # (R, Dp, Dp) f32
    q_p = _pad_last(att_q, dp)                                # (R, Dp)
    k_p = _pad_last(att_k, dp)                                # (R, Dp)
    b_p = _pad_last(bias.reshape(1, -1), dp)                  # (1, Dp) f32

    # ---- Grid-invariant matmuls hoisted out of the kernel (plain XLA, once). ----
    # W_cat[d, r*Dp + o] = W[r, d, o]; H_all[:, r*Dp:(r+1)*Dp] = x @ W_r
    wcat = jnp.transpose(w_p, (1, 0, 2)).reshape(dp, r * dp).astype(jnp.bfloat16)
    h_all = jnp.dot(x_bf, wcat,
                    preferred_element_type=jnp.float32).astype(jnp.bfloat16)   # (N, R*Dp)
    # Attention projections folded into W:  dst[i,r] = k_r . h_r[i],  src[j,r] = q_r . h_r[j]
    kproj = jnp.einsum("rdo,ro->dr", w_p, k_p).astype(jnp.bfloat16)            # (Dp, R)
    qproj = jnp.einsum("rdo,ro->dr", w_p, q_p).astype(jnp.bfloat16)            # (Dp, R)
    dst_all = jnp.dot(x_bf, kproj, preferred_element_type=jnp.float32)         # (N, R)
    srcT = jnp.transpose(jnp.dot(x_bf, qproj,
                                 preferred_element_type=jnp.float32))          # (R, N)

    # ---- Destination-row tiling: prefer >= 2 tiles (megacore / pipelining). ----
    if tile_n is None:
        tile_n = n
        for cand in (256, 128, 64, 32, 16, 8):
            if cand * 2 <= n and n % cand == 0:
                tile_n = cand
                break
    tile_n = min(tile_n, n)
    assert n % tile_n == 0, "tile_n must divide N for this simple tiling"
    grid = (n // tile_n,)

    kernel = functools.partial(_rgat_conv_kernel, num_relations=r, dp=dp,
                               apply_relu=apply_relu)

    return pl.pallas_call(
        kernel,
        out_shape=jax.ShapeDtypeStruct((n, dp), out_dtype),
        grid=grid,
        in_specs=[
            pl.BlockSpec((n, r * dp), lambda i: (0, 0)),        # H_all (grid-invariant)
            pl.BlockSpec((tile_n, r), lambda i: (i, 0)),        # dst scores (tiled)
            pl.BlockSpec((r, n), lambda i: (0, 0)),             # src scores^T
            pl.BlockSpec((r, tile_n, n), lambda i: (0, i, 0)),  # additive mask bias (tiled)
            pl.BlockSpec((1, dp), lambda i: (0, 0)),            # bias
        ],
        out_specs=pl.BlockSpec((tile_n, dp), lambda i: (i, 0)),
        compiler_params=pltpu.CompilerParams(
            dimension_semantics=("parallel",),
            vmem_limit_bytes=_vmem_limit_bytes()),
    )(h_all, dst_all, srcT, mask_bias, b_p)


# ----------------------------------------------------------------------------
# Parameter init (deterministic, mirrors the module's __init__ shapes).
# ----------------------------------------------------------------------------
def init_params(key, num_entities, num_relations):
    r = num_relations * 2
    glorot = jax.nn.initializers.glorot_uniform()
    ks = jax.random.split(key, 12)

    def conv_params(kb, kc, kq, kk):
        return {
            "basis": glorot(kb, (NUM_BASES, HIDDEN, HIDDEN), jnp.float32),
            "comp": glorot(kc, (r, NUM_BASES), jnp.float32),
            "att_q": glorot(kq, (r, HIDDEN), jnp.float32),
            "att_k": glorot(kk, (r, HIDDEN), jnp.float32),
            "bias": jnp.zeros((HIDDEN,), jnp.float32),
        }

    return {
        "embedding": jax.random.normal(ks[0], (num_entities, HIDDEN), jnp.float32),
        "conv1": conv_params(ks[1], ks[2], ks[3], ks[4]),
        "conv2": conv_params(ks[5], ks[6], ks[7], ks[8]),
        # relation_embedding is unused in forward(); kept for shape parity
        "relation_embedding": glorot(ks[9], (num_relations, HIDDEN), jnp.float32),
    }


def _dense_mask_bias(edge_index, edge_type, num_rel, num_nodes):
    # Edges are generated unique, so the dense additive mask is equivalent to the
    # edge list: 0 where edge (src -> dst, rel) exists, -1e30 elsewhere.
    src, dst = edge_index[0], edge_index[1]
    bias = jnp.full((num_rel, num_nodes, num_nodes), NEG_BIG, jnp.float32)
    return bias.at[edge_type, dst, src].set(0.0)


def rgat_forward(params, entity, edge_index, edge_type, edge_norm, num_relations):
    del edge_norm  # unused in the reference forward as well
    r = num_relations * 2
    x = params["embedding"][entity]                    # nn.Embedding lookup (glue gather)
    n = x.shape[0]
    mask_bias = _dense_mask_bias(edge_index, edge_type, r, n)   # (R, N, N) f32, shared

    c1 = params["conv1"]
    w1 = jnp.einsum("rb,bio->rio", c1["comp"], c1["basis"])
    x = rgat_conv(x, w1, c1["att_q"], c1["att_k"], mask_bias, c1["bias"],
                  apply_relu=True, out_dtype=jnp.bfloat16)      # layer-1 output in bf16

    # F.dropout(p=0.2, training=False) -> identity (inference mode)
    # TODO(synk): training-mode dropout (would use pltpu.prng_random_bits) not implemented.

    c2 = params["conv2"]
    w2 = jnp.einsum("rb,bio->rio", c2["comp"], c2["basis"])
    x = rgat_conv(x, w2, c2["att_q"], c2["att_k"], mask_bias, c2["bias"],
                  apply_relu=False, out_dtype=jnp.float32)
    return x[:, :HIDDEN]                               # drop lane padding at the end


# ----------------------------------------------------------------------------
if __name__ == "__main__":
    num_entities = 32
    num_relations = 4          # conv relations = 2 * num_relations = 8
    num_edges = 64

    key = jax.random.PRNGKey(0)
    k_param, k_pair, k_rel = jax.random.split(key, 3)

    params = init_params(k_param, num_entities, num_relations)

    # unique (src, dst) pairs -> dense-mask formulation matches the edge list exactly
    pair_idx = jax.random.permutation(k_pair, num_entities * num_entities)[:num_edges]
    src = (pair_idx // num_entities).astype(jnp.int32)
    dst = (pair_idx % num_entities).astype(jnp.int32)
    edge_index = jnp.stack([src, dst], axis=0)                               # (2, E)
    edge_type = jax.random.randint(k_rel, (num_edges,), 0, 2 * num_relations,
                                   dtype=jnp.int32)                          # (E,)
    edge_norm = jnp.ones((num_edges,), jnp.float32)                          # (E,) unused
    entity = jnp.arange(num_entities, dtype=jnp.int32)                       # (N,)

    fwd = jax.jit(rgat_forward, static_argnames=("num_relations",))
    out = fwd(params, entity, edge_index, edge_type, edge_norm,
              num_relations=num_relations)
    out = jax.block_until_ready(out)
    assert out.shape == (num_entities, HIDDEN)
    assert bool(jnp.all(jnp.isfinite(out)))
    print("KERNEL_OK")
</pallas_src>

<mosaic_0001>
module attributes {stable_mosaic.version = 11 : i64} {
  func.func @_rgat_conv_kernel(%arg0: i32, %arg1: memref<32x1024xbf16, #tpu.memory_space<vmem>>, %arg2: memref<16x8xf32, #tpu.memory_space<vmem>>, %arg3: memref<8x32xf32, #tpu.memory_space<vmem>>, %arg4: memref<8x16x32xf32, #tpu.memory_space<vmem>>, %arg5: memref<1x128xf32, #tpu.memory_space<vmem>>, %arg6: memref<16x128xbf16, #tpu.memory_space<vmem>>) attributes {dimension_semantics = [#tpu.dimension_semantics<parallel>], iteration_bounds = array<i64: 2>, scalar_prefetch = 0 : i64, scratch_operands = 0 : i64, tpu.core_type = #tpu.core_type<tc>, window_params = [{pipeline_mode = #tpu.pipeline_mode<synchronous>, transform_indices = @transform_0, window_bounds = array<i64: 32, 1024>}, {transform_indices = @transform_1, window_bounds = array<i64: 16, 8>}, {pipeline_mode = #tpu.pipeline_mode<synchronous>, transform_indices = @transform_2, window_bounds = array<i64: 8, 32>}, {transform_indices = @transform_3, window_bounds = array<i64: 8, 16, 32>}, {pipeline_mode = #tpu.pipeline_mode<synchronous>, transform_indices = @transform_4, window_bounds = array<i64: 1, 128>}, {transform_indices = @transform_5, window_bounds = array<i64: 16, 128>}]} {
    %c0 = arith.constant 0 : index
    %c0_0 = arith.constant 0 : index
    %0 = vector.load %arg2[%c0, %c0_0] : memref<16x8xf32, #tpu.memory_space<vmem>>, vector<16x8xf32>
    %c0_1 = arith.constant 0 : index
    %c0_2 = arith.constant 0 : index
    %1 = vector.load %arg3[%c0_1, %c0_2] : memref<8x32xf32, #tpu.memory_space<vmem>>, vector<8x32xf32>
    %cst = arith.constant 0.000000e+00 : f32
    %2 = vector.broadcast %cst : f32 to vector<16x1xf32>
    %3 = vector.extract_strided_slice %0 {offsets = [0, 0], sizes = [16, 1], strides = [1, 1]} : vector<16x8xf32> to vector<16x1xf32>
    %4 = vector.extract_strided_slice %1 {offsets = [0, 0], sizes = [1, 32], strides = [1, 1]} : vector<8x32xf32> to vector<1x32xf32>
    %5 = vector.broadcast %3 : vector<16x1xf32> to vector<16x32xf32>
    %6 = vector.broadcast %4 : vector<1x32xf32> to vector<16x32xf32>
    %7 = arith.addf %5, %6 : vector<16x32xf32>
    %cst_3 = arith.constant 2.000000e-01 : f32
    %8 = vector.broadcast %cst_3 : f32 to vector<16x32xf32>
    %9 = arith.mulf %8, %7 : vector<16x32xf32>
    %10 = arith.maximumf %7, %9 : vector<16x32xf32>
    %c0_4 = arith.constant 0 : index
    %c0_5 = arith.constant 0 : index
    %c0_6 = arith.constant 0 : index
    %11 = vector.load %arg4[%c0_4, %c0_5, %c0_6] : memref<8x16x32xf32, #tpu.memory_space<vmem>>, vector<1x16x32xf32>
    %12 = vector.shape_cast %11 : vector<1x16x32xf32> to vector<16x32xf32>
    %13 = arith.addf %10, %12 : vector<16x32xf32>
    %cst_7 = arith.constant dense<0xFF800000> : vector<16xf32>
    %14 = vector.multi_reduction <maximumf>, %13, %cst_7 [1] : vector<16x32xf32> to vector<16xf32>
    %15 = vector.shape_cast %14 : vector<16xf32> to vector<16x1xf32>
    %16 = arith.maximumf %2, %15 : vector<16x1xf32>
    %17 = vector.extract_strided_slice %0 {offsets = [0, 1], sizes = [16, 1], strides = [1, 1]} : vector<16x8xf32> to vector<16x1xf32>
    %18 = vector.extract_strided_slice %1 {offsets = [1, 0], sizes = [1, 32], strides = [1, 1]} : vector<8x32xf32> to vector<1x32xf32>
    %19 = vector.broadcast %17 : vector<16x1xf32> to vector<16x32xf32>
    %20 = vector.broadcast %18 : vector<1x32xf32> to vector<16x32xf32>
    %21 = arith.addf %19, %20 : vector<16x32xf32>
    %cst_8 = arith.constant 2.000000e-01 : f32
    %22 = vector.broadcast %cst_8 : f32 to vector<16x32xf32>
    %23 = arith.mulf %22, %21 : vector<16x32xf32>
    %24 = arith.maximumf %21, %23 : vector<16x32xf32>
    %c1 = arith.constant 1 : index
    %c0_9 = arith.constant 0 : index
    %c0_10 = arith.constant 0 : index
    %25 = vector.load %arg4[%c1, %c0_9, %c0_10] : memref<8x16x32xf32, #tpu.memory_space<vmem>>, vector<1x16x32xf32>
    %26 = vector.shape_cast %25 : vector<1x16x32xf32> to vector<16x32xf32>
    %27 = arith.addf %24, %26 : vector<16x32xf32>
    %cst_11 = arith.constant dense<0xFF800000> : vector<16xf32>
    %28 = vector.multi_reduction <maximumf>, %27, %cst_11 [1] : vector<16x32xf32> to vector<16xf32>
    %29 = vector.shape_cast %28 : vector<16xf32> to vector<16x1xf32>
    %30 = arith.maximumf %16, %29 : vector<16x1xf32>
    %31 = vector.extract_strided_slice %0 {offsets = [0, 2], sizes = [16, 1], strides = [1, 1]} : vector<16x8xf32> to vector<16x1xf32>
    %32 = vector.extract_strided_slice %1 {offsets = [2, 0], sizes = [1, 32], strides = [1, 1]} : vector<8x32xf32> to vector<1x32xf32>
    %33 = vector.broadcast %31 : vector<16x1xf32> to vector<16x32xf32>
    %34 = vector.broadcast %32 : vector<1x32xf32> to vector<16x32xf32>
    %35 = arith.addf %33, %34 : vector<16x32xf32>
    %cst_12 = arith.constant 2.000000e-01 : f32
    %36 = vector.broadcast %cst_12 : f32 to vector<16x32xf32>
    %37 = arith.mulf %36, %35 : vector<16x32xf32>
    %38 = arith.maximumf %35, %37 : vector<16x32xf32>
    %c2 = arith.constant 2 : index
    %c0_13 = arith.constant 0 : index
    %c0_14 = arith.constant 0 : index
    %39 = vector.load %arg4[%c2, %c0_13, %c0_14] : memref<8x16x32xf32, #tpu.memory_space<vmem>>, vector<1x16x32xf32>
    %40 = vector.shape_cast %39 : vector<1x16x32xf32> to vector<16x32xf32>
    %41 = arith.addf %38, %40 : vector<16x32xf32>
    %cst_15 = arith.constant dense<0xFF800000> : vector<16xf32>
    %42 = vector.multi_reduction <maximumf>, %41, %cst_15 [1] : vector<16x32xf32> to vector<16xf32>
    %43 = vector.shape_cast %42 : vector<16xf32> to vector<16x1xf32>
    %44 = arith.maximumf %30, %43 : vector<16x1xf32>
    %45 = vector.extract_strided_slice %0 {offsets = [0, 3], sizes = [16, 1], strides = [1, 1]} : vector<16x8xf32> to vector<16x1xf32>
    %46 = vector.extract_strided_slice %1 {offsets = [3, 0], sizes = [1, 32], strides = [1, 1]} : vector<8x32xf32> to vector<1x32xf32>
    %47 = vector.broadcast %45 : vector<16x1xf32> to vector<16x32xf32>
    %48 = vector.broadcast %46 : vector<1x32xf32> to vector<16x32xf32>
    %49 = arith.addf %47, %48 : vector<16x32xf32>
    %cst_16 = arith.constant 2.000000e-01 : f32
    %50 = vector.broadcast %cst_16 : f32 to vector<16x32xf32>
    %51 = arith.mulf %50, %49 : vector<16x32xf32>
    %52 = arith.maximumf %49, %51 : vector<16x32xf32>
    %c3 = arith.constant 3 : index
    %c0_17 = arith.constant 0 : index
    %c0_18 = arith.constant 0 : index
    %53 = vector.load %arg4[%c3, %c0_17, %c0_18] : memref<8x16x32xf32, #tpu.memory_space<vmem>>, vector<1x16x32xf32>
    %54 = vector.shape_cast %53 : vector<1x16x32xf32> to vector<16x32xf32>
    %55 = arith.addf %52, %54 : vector<16x32xf32>
    %cst_19 = arith.constant dense<0xFF800000> : vector<16xf32>
    %56 = vector.multi_reduction <maximumf>, %55, %cst_19 [1] : vector<16x32xf32> to vector<16xf32>
    %57 = vector.shape_cast %56 : vector<16xf32> to vector<16x1xf32>
    %58 = arith.maximumf %44, %57 : vector<16x1xf32>
    %59 = vector.extract_strided_slice %0 {offsets = [0, 4], sizes = [16, 1], strides = [1, 1]} : vector<16x8xf32> to vector<16x1xf32>
    %60 = vector.extract_strided_slice %1 {offsets = [4, 0], sizes = [1, 32], strides = [1, 1]} : vector<8x32xf32> to vector<1x32xf32>
    %61 = vector.broadcast %59 : vector<16x1xf32> to vector<16x32xf32>
    %62 = vector.broadcast %60 : vector<1x32xf32> to vector<16x32xf32>
    %63 = arith.addf %61, %62 : vector<16x32xf32>
    %cst_20 = arith.constant 2.000000e-01 : f32
    %64 = vector.broadcast %cst_20 : f32 to vector<16x32xf32>
    %65 = arith.mulf %64, %63 : vector<16x32xf32>
    %66 = arith.maximumf %63, %65 : vector<16x32xf32>
    %c4 = arith.constant 4 : index
    %c0_21 = arith.constant 0 : index
    %c0_22 = arith.constant 0 : index
    %67 = vector.load %arg4[%c4, %c0_21, %c0_22] : memref<8x16x32xf32, #tpu.memory_space<vmem>>, vector<1x16x32xf32>
    %68 = vector.shape_cast %67 : vector<1x16x32xf32> to vector<16x32xf32>
    %69 = arith.addf %66, %68 : vector<16x32xf32>
    %cst_23 = arith.constant dense<0xFF800000> : vector<16xf32>
    %70 = vector.multi_reduction <maximumf>, %69, %cst_23 [1] : vector<16x32xf32> to vector<16xf32>
    %71 = vector.shape_cast %70 : vector<16xf32> to vector<16x1xf32>
    %72 = arith.maximumf %58, %71 : vector<16x1xf32>
    %73 = vector.extract_strided_slice %0 {offsets = [0, 5], sizes = [16, 1], strides = [1, 1]} : vector<16x8xf32> to vector<16x1xf32>
    %74 = vector.extract_strided_slice %1 {offsets = [5, 0], sizes = [1, 32], strides = [1, 1]} : vector<8x32xf32> to vector<1x32xf32>
    %75 = vector.broadcast %73 : vector<16x1xf32> to vector<16x32xf32>
    %76 = vector.broadcast %74 : vector<1x32xf32> to vector<16x32xf32>
    %77 = arith.addf %75, %76 : vector<16x32xf32>
    %cst_24 = arith.constant 2.000000e-01 : f32
    %78 = vector.broadcast %cst_24 : f32 to vector<16x32xf32>
    %79 = arith.mulf %78, %77 : vector<16x32xf32>
    %80 = arith.maximumf %77, %79 : vector<16x32xf32>
    %c5 = arith.constant 5 : index
    %c0_25 = arith.constant 0 : index
    %c0_26 = arith.constant 0 : index
    %81 = vector.load %arg4[%c5, %c0_25, %c0_26] : memref<8x16x32xf32, #tpu.memory_space<vmem>>, vector<1x16x32xf32>
    %82 = vector.shape_cast %81 : vector<1x16x32xf32> to vector<16x32xf32>
    %83 = arith.addf %80, %82 : vector<16x32xf32>
    %cst_27 = arith.constant dense<0xFF800000> : vector<16xf32>
    %84 = vector.multi_reduction <maximumf>, %83, %cst_27 [1] : vector<16x32xf32> to vector<16xf32>
    %85 = vector.shape_cast %84 : vector<16xf32> to vector<16x1xf32>
    %86 = arith.maximumf %72, %85 : vector<16x1xf32>
    %87 = vector.extract_strided_slice %0 {offsets = [0, 6], sizes = [16, 1], strides = [1, 1]} : vector<16x8xf32> to vector<16x1xf32>
    %88 = vector.extract_strided_slice %1 {offsets = [6, 0], sizes = [1, 32], strides = [1, 1]} : vector<8x32xf32> to vector<1x32xf32>
    %89 = vector.broadcast %87 : vector<16x1xf32> to vector<16x32xf32>
    %90 = vector.broadcast %88 : vector<1x32xf32> to vector<16x32xf32>
    %91 = arith.addf %89, %90 : vector<16x32xf32>
    %cst_28 = arith.constant 2.000000e-01 : f32
    %92 = vector.broadcast %cst_28 : f32 to vector<16x32xf32>
    %93 = arith.mulf %92, %91 : vector<16x32xf32>
    %94 = arith.maximumf %91, %93 : vector<16x32xf32>
    %c6 = arith.constant 6 : index
    %c0_29 = arith.constant 0 : index
    %c0_30 = arith.constant 0 : index
    %95 = vector.load %arg4[%c6, %c0_29, %c0_30] : memref<8x16x32xf32, #tpu.memory_space<vmem>>, vector<1x16x32xf32>
    %96 = vector.shape_cast %95 : vector<1x16x32xf32> to vector<16x32xf32>
    %97 = arith.addf %94, %96 : vector<16x32xf32>
    %cst_31 = arith.constant dense<0xFF800000> : vector<16xf32>
    %98 = vector.multi_reduction <maximumf>, %97, %cst_31 [1] : vector<16x32xf32> to vector<16xf32>
    %99 = vector.shape_cast %98 : vector<16xf32> to vector<16x1xf32>
    %100 = arith.maximumf %86, %99 : vector<16x1xf32>
    %101 = vector.extract_strided_slice %0 {offsets = [0, 7], sizes = [16, 1], strides = [1, 1]} : vector<16x8xf32> to vector<16x1xf32>
    %102 = vector.extract_strided_slice %1 {offsets = [7, 0], sizes = [1, 32], strides = [1, 1]} : vector<8x32xf32> to vector<1x32xf32>
    %103 = vector.broadcast %101 : vector<16x1xf32> to vector<16x32xf32>
    %104 = vector.broadcast %102 : vector<1x32xf32> to vector<16x32xf32>
    %105 = arith.addf %103, %104 : vector<16x32xf32>
    %cst_32 = arith.constant 2.000000e-01 : f32
    %106 = vector.broadcast %cst_32 : f32 to vector<16x32xf32>
    %107 = arith.mulf %106, %105 : vector<16x32xf32>
    %108 = arith.maximumf %105, %107 : vector<16x32xf32>
    %c7 = arith.constant 7 : index
    %c0_33 = arith.constant 0 : index
    %c0_34 = arith.constant 0 : index
    %109 = vector.load %arg4[%c7, %c0_33, %c0_34] : memref<8x16x32xf32, #tpu.memory_space<vmem>>, vector<1x16x32xf32>
    %110 = vector.shape_cast %109 : vector<1x16x32xf32> to vector<16x32xf32>
    %111 = arith.addf %108, %110 : vector<16x32xf32>
    %cst_35 = arith.constant dense<0xFF800000> : vector<16xf32>
    %112 = vector.multi_reduction <maximumf>, %111, %cst_35 [1] : vector<16x32xf32> to vector<16xf32>
    %113 = vector.shape_cast %112 : vector<16xf32> to vector<16x1xf32>
    %114 = arith.maximumf %100, %113 : vector<16x1xf32>
    %cst_36 = arith.constant 0.000000e+00 : f32
    %115 = vector.broadcast %cst_36 : f32 to vector<16x1xf32>
    %cst_37 = arith.constant 0.000000e+00 : f32
    %116 = vector.broadcast %cst_37 : f32 to vector<16x128xf32>
    %117 = vector.broadcast %114 : vector<16x1xf32> to vector<16x32xf32>
    %118 = arith.subf %13, %117 : vector<16x32xf32>
    %119 = math.exp %118 : vector<16x32xf32>
    %cst_38 = arith.constant dense<0.000000e+00> : vector<16xf32>
    %120 = vector.multi_reduction <add>, %119, %cst_38 [1] : vector<16x32xf32> to vector<16xf32>
    %121 = vector.shape_cast %120 : vector<16xf32> to vector<16x1xf32>
    %122 = arith.addf %115, %121 : vector<16x1xf32>
    %123 = arith.truncf %119 : vector<16x32xf32> to vector<16x32xbf16>
    %c0_39 = arith.constant 0 : index
    %c0_40 = arith.constant 0 : index
    %124 = vector.load %arg1[%c0_39, %c0_40] : memref<32x1024xbf16, #tpu.memory_space<vmem>>, vector<32x128xbf16>
    %cst_41 = arith.constant dense<0.000000e+00> : vector<16x128xf32>
    %125 = tpu.matmul %123, %124, %cst_41 {dimension_numbers = #tpu.dot_dimension_numbers<[1], [0], [0], [1], [0, 0, 1, 1], [], []>} : vector<16x32xbf16>, vector<32x128xbf16>, vector<16x128xf32> -> vector<16x128xf32>
    %126 = arith.addf %116, %125 : vector<16x128xf32>
    %127 = vector.broadcast %114 : vector<16x1xf32> to vector<16x32xf32>
    %128 = arith.subf %27, %127 : vector<16x32xf32>
    %129 = math.exp %128 : vector<16x32xf32>
    %cst_42 = arith.constant dense<0.000000e+00> : vector<16xf32>
    %130 = vector.multi_reduction <add>, %129, %cst_42 [1] : vector<16x32xf32> to vector<16xf32>
    %131 = vector.shape_cast %130 : vector<16xf32> to vector<16x1xf32>
    %132 = arith.addf %122, %131 : vector<16x1xf32>
    %133 = arith.truncf %129 : vector<16x32xf32> to vector<16x32xbf16>
    %c0_43 = arith.constant 0 : index
    %c128 = arith.constant 128 : index
    %134 = vector.load %arg1[%c0_43, %c128] : memref<32x1024xbf16, #tpu.memory_space<vmem>>, vector<32x128xbf16>
    %cst_44 = arith.constant dense<0.000000e+00> : vector<16x128xf32>
    %135 = tpu.matmul %133, %134, %cst_44 {dimension_numbers = #tpu.dot_dimension_numbers<[1], [0], [0], [1], [0, 0, 1, 1], [], []>} : vector<16x32xbf16>, vector<32x128xbf16>, vector<16x128xf32> -> vector<16x128xf32>
    %136 = arith.addf %126, %135 : vector<16x128xf32>
    %137 = vector.broadcast %114 : vector<16x1xf32> to vector<16x32xf32>
    %138 = arith.subf %41, %137 : vector<16x32xf32>
    %139 = math.exp %138 : vector<16x32xf32>
    %cst_45 = arith.constant dense<0.000000e+00> : vector<16xf32>
    %140 = vector.multi_reduction <add>, %139, %cst_45 [1] : vector<16x32xf32> to vector<16xf32>
    %141 = vector.shape_cast %140 : vector<16xf32> to vector<16x1xf32>
    %142 = arith.addf %132, %141 : vector<16x1xf32>
    %143 = arith.truncf %139 : vector<16x32xf32> to vector<16x32xbf16>
    %c0_46 = arith.constant 0 : index
    %c256 = arith.constant 256 : index
    %144 = vector.load %arg1[%c0_46, %c256] : memref<32x1024xbf16, #tpu.memory_space<vmem>>, vector<32x128xbf16>
    %cst_47 = arith.constant dense<0.000000e+00> : vector<16x128xf32>
    %145 = tpu.matmul %143, %144, %cst_47 {dimension_numbers = #tpu.dot_dimension_numbers<[1], [0], [0], [1], [0, 0, 1, 1], [], []>} : vector<16x32xbf16>, vector<32x128xbf16>, vector<16x128xf32> -> vector<16x128xf32>
    %146 = arith.addf %136, %145 : vector<16x128xf32>
    %147 = vector.broadcast %114 : vector<16x1xf32> to vector<16x32xf32>
    %148 = arith.subf %55, %147 : vector<16x32xf32>
    %149 = math.exp %148 : vector<16x32xf32>
    %cst_48 = arith.constant dense<0.000000e+00> : vector<16xf32>
    %150 = vector.multi_reduction <add>, %149, %cst_48 [1] : vector<16x32xf32> to vector<16xf32>
    %151 = vector.shape_cast %150 : vector<16xf32> to vector<16x1xf32>
    %152 = arith.addf %142, %151 : vector<16x1xf32>
    %153 = arith.truncf %149 : vector<16x32xf32> to vector<16x32xbf16>
    %c0_49 = arith.constant 0 : index
    %c384 = arith.constant 384 : index
    %154 = vector.load %arg1[%c0_49, %c384] : memref<32x1024xbf16, #tpu.memory_space<vmem>>, vector<32x128xbf16>
    %cst_50 = arith.constant dense<0.000000e+00> : vector<16x128xf32>
    %155 = tpu.matmul %153, %154, %cst_50 {dimension_numbers = #tpu.dot_dimension_numbers<[1], [0], [0], [1], [0, 0, 1, 1], [], []>} : vector<16x32xbf16>, vector<32x128xbf16>, vector<16x128xf32> -> vector<16x128xf32>
    %156 = arith.addf %146, %155 : vector<16x128xf32>
    %157 = vector.broadcast %114 : vector<16x1xf32> to vector<16x32xf32>
    %158 = arith.subf %69, %157 : vector<16x32xf32>
    %159 = math.exp %158 : vector<16x32xf32>
    %cst_51 = arith.constant dense<0.000000e+00> : vector<16xf32>
    %160 = vector.multi_reduction <add>, %159, %cst_51 [1] : vector<16x32xf32> to vector<16xf32>
    %161 = vector.shape_cast %160 : vector<16xf32> to vector<16x1xf32>
    %162 = arith.addf %152, %161 : vector<16x1xf32>
    %163 = arith.truncf %159 : vector<16x32xf32> to vector<16x32xbf16>
    %c0_52 = arith.constant 0 : index
    %c512 = arith.constant 512 : index
    %164 = vector.load %arg1[%c0_52, %c512] : memref<32x1024xbf16, #tpu.memory_space<vmem>>, vector<32x128xbf16>
    %cst_53 = arith.constant dense<0.000000e+00> : vector<16x128xf32>
    %165 = tpu.matmul %163, %164, %cst_53 {dimension_numbers = #tpu.dot_dimension_numbers<[1], [0], [0], [1], [0, 0, 1, 1], [], []>} : vector<16x32xbf16>, vector<32x128xbf16>, vector<16x128xf32> -> vector<16x128xf32>
    %166 = arith.addf %156, %165 : vector<16x128xf32>
    %167 = vector.broadcast %114 : vector<16x1xf32> to vector<16x32xf32>
    %168 = arith.subf %83, %167 : vector<16x32xf32>
    %169 = math.exp %168 : vector<16x32xf32>
    %cst_54 = arith.constant dense<0.000000e+00> : vector<16xf32>
    %170 = vector.multi_reduction <add>, %169, %cst_54 [1] : vector<16x32xf32> to vector<16xf32>
    %171 = vector.shape_cast %170 : vector<16xf32> to vector<16x1xf32>
    %172 = arith.addf %162, %171 : vector<16x1xf32>
    %173 = arith.truncf %169 : vector<16x32xf32> to vector<16x32xbf16>
    %c0_55 = arith.constant 0 : index
    %c640 = arith.constant 640 : index
    %174 = vector.load %arg1[%c0_55, %c640] : memref<32x1024xbf16, #tpu.memory_space<vmem>>, vector<32x128xbf16>
    %cst_56 = arith.constant dense<0.000000e+00> : vector<16x128xf32>
    %175 = tpu.matmul %173, %174, %cst_56 {dimension_numbers = #tpu.dot_dimension_numbers<[1], [0], [0], [1], [0, 0, 1, 1], [], []>} : vector<16x32xbf16>, vector<32x128xbf16>, vector<16x128xf32> -> vector<16x128xf32>
    %176 = arith.addf %166, %175 : vector<16x128xf32>
    %177 = vector.broadcast %114 : vector<16x1xf32> to vector<16x32xf32>
    %178 = arith.subf %97, %177 : vector<16x32xf32>
    %179 = math.exp %178 : vector<16x32xf32>
    %cst_57 = arith.constant dense<0.000000e+00> : vector<16xf32>
    %180 = vector.multi_reduction <add>, %179, %cst_57 [1] : vector<16x32xf32> to vector<16xf32>
    %181 = vector.shape_cast %180 : vector<16xf32> to vector<16x1xf32>
    %182 = arith.addf %172, %181 : vector<16x1xf32>
    %183 = arith.truncf %179 : vector<16x32xf32> to vector<16x32xbf16>
    %c0_58 = arith.constant 0 : index
    %c768 = arith.constant 768 : index
    %184 = vector.load %arg1[%c0_58, %c768] : memref<32x1024xbf16, #tpu.memory_space<vmem>>, vector<32x128xbf16>
    %cst_59 = arith.constant dense<0.000000e+00> : vector<16x128xf32>
    %185 = tpu.matmul %183, %184, %cst_59 {dimension_numbers = #tpu.dot_dimension_numbers<[1], [0], [0], [1], [0, 0, 1, 1], [], []>} : vector<16x32xbf16>, vector<32x128xbf16>, vector<16x128xf32> -> vector<16x128xf32>
    %186 = arith.addf %176, %185 : vector<16x128xf32>
    %187 = vector.broadcast %114 : vector<16x1xf32> to vector<16x32xf32>
    %188 = arith.subf %111, %187 : vector<16x32xf32>
    %189 = math.exp %188 : vector<16x32xf32>
    %cst_60 = arith.constant dense<0.000000e+00> : vector<16xf32>
    %190 = vector.multi_reduction <add>, %189, %cst_60 [1] : vector<16x32xf32> to vector<16xf32>
    %191 = vector.shape_cast %190 : vector<16xf32> to vector<16x1xf32>
    %192 = arith.addf %182, %191 : vector<16x1xf32>
    %193 = arith.truncf %189 : vector<16x32xf32> to vector<16x32xbf16>
    %c0_61 = arith.constant 0 : index
    %c896 = arith.constant 896 : index
    %194 = vector.load %arg1[%c0_61, %c896] : memref<32x1024xbf16, #tpu.memory_space<vmem>>, vector<32x128xbf16>
    %cst_62 = arith.constant dense<0.000000e+00> : vector<16x128xf32>
    %195 = tpu.matmul %193, %194, %cst_62 {dimension_numbers = #tpu.dot_dimension_numbers<[1], [0], [0], [1], [0, 0, 1, 1], [], []>} : vector<16x32xbf16>, vector<32x128xbf16>, vector<16x128xf32> -> vector<16x128xf32>
    %196 = arith.addf %186, %195 : vector<16x128xf32>
    %cst_63 = arith.constant 0.000000e+00 : f32
    %197 = vector.broadcast %cst_63 : f32 to vector<16x1xf32>
    %198 = arith.cmpf ogt, %192, %197 : vector<16x1xf32>
    %cst_64 = arith.constant 1.000000e+00 : f32
    %199 = vector.broadcast %cst_64 : f32 to vector<16x1xf32>
    %200 = arith.select %198, %192, %199 : vector<16x1xi1>, vector<16x1xf32>
    %201 = tpu.reciprocal %200 {approx = true} : vector<16x1xf32> -> vector<16x1xf32>
    %202 = vector.broadcast %201 : vector<16x1xf32> to vector<16x128xf32>
    %203 = arith.mulf %196, %202 : vector<16x128xf32>
    %c0_65 = arith.constant 0 : index
    %c0_66 = arith.constant 0 : index
    %204 = vector.load %arg5[%c0_65, %c0_66] : memref<1x128xf32, #tpu.memory_space<vmem>>, vector<1x128xf32>
    %205 = vector.broadcast %204 : vector<1x128xf32> to vector<16x128xf32>
    %206 = arith.addf %203, %205 : vector<16x128xf32>
    %cst_67 = arith.constant 0.000000e+00 : f32
    %207 = vector.broadcast %cst_67 : f32 to vector<16x128xf32>
    %208 = arith.maximumf %206, %207 : vector<16x128xf32>
    %209 = arith.truncf %208 : vector<16x128xf32> to vector<16x128xbf16>
    %c0_68 = arith.constant 0 : index
    %c0_69 = arith.constant 0 : index
    %210 = vector.load %arg6[%c0_68, %c0_69] : memref<16x128xbf16, #tpu.memory_space<vmem>>, vector<16x128xbf16>
    tpu.vector_store %arg6[%c0_68, %c0_69], %209 {strides = array<i32>} : memref<16x128xbf16, #tpu.memory_space<vmem>>, vector<16x128xbf16>,
    return
  }
  func.func @transform_0(%arg0: i32) -> (i32, i32) {
    %c0_i32 = arith.constant 0 : i32
    %c0_i32_0 = arith.constant 0 : i32
    %c0_i32_1 = arith.constant 0 : i32
    return %c0_i32, %c0_i32_0 : i32, i32
  }
  func.func @transform_1(%arg0: i32) -> (i32, i32) {
    %c0_i32 = arith.constant 0 : i32
    %c0_i32_0 = arith.constant 0 : i32
    return %arg0, %c0_i32 : i32, i32
  }
  func.func @transform_2(%arg0: i32) -> (i32, i32) {
    %c0_i32 = arith.constant 0 : i32
    %c0_i32_0 = arith.constant 0 : i32
    %c0_i32_1 = arith.constant 0 : i32
    return %c0_i32, %c0_i32_0 : i32, i32
  }
  func.func @transform_3(%arg0: i32) -> (i32, i32, i32) {
    %c0_i32 = arith.constant 0 : i32
    %c0_i32_0 = arith.constant 0 : i32
    %c0_i32_1 = arith.constant 0 : i32
    return %c0_i32, %arg0, %c0_i32_0 : i32, i32, i32
  }
  func.func @transform_4(%arg0: i32) -> (i32, i32) {
    %c0_i32 = arith.constant 0 : i32
    %c0_i32_0 = arith.constant 0 : i32
    %c0_i32_1 = arith.constant 0 : i32
    return %c0_i32, %c0_i32_0 : i32, i32
  }
  func.func @transform_5(%arg0: i32) -> (i32, i32) {
    %c0_i32 = arith.constant 0 : i32
    %c0_i32_0 = arith.constant 0 : i32
    return %arg0, %c0_i32 : i32, i32
  }
}

module attributes {stable_mosaic.version = 11 : i64} {
  func.func @_rgat_conv_kernel(%arg0: i32, %arg1: memref<32x1024xbf16, #tpu.memory_space<vmem>>, %arg2: memref<16x8xf32, #tpu.memory_space<vmem>>, %arg3: memref<8x32xf32, #tpu.memory_space<vmem>>, %arg4: memref<8x16x32xf32, #tpu.memory_space<vmem>>, %arg5: memref<1x128xf32, #tpu.memory_space<vmem>>, %arg6: memref<16x128xf32, #tpu.memory_space<vmem>>) attributes {dimension_semantics = [#tpu.dimension_semantics<parallel>], iteration_bounds = array<i64: 2>, scalar_prefetch = 0 : i64, scratch_operands = 0 : i64, tpu.core_type = #tpu.core_type<tc>, window_params = [{pipeline_mode = #tpu.pipeline_mode<synchronous>, transform_indices = @transform_0, window_bounds = array<i64: 32, 1024>}, {transform_indices = @transform_1, window_bounds = array<i64: 16, 8>}, {pipeline_mode = #tpu.pipeline_mode<synchronous>, transform_indices = @transform_2, window_bounds = array<i64: 8, 32>}, {transform_indices = @transform_3, window_bounds = array<i64: 8, 16, 32>}, {pipeline_mode = #tpu.pipeline_mode<synchronous>, transform_indices = @transform_4, window_bounds = array<i64: 1, 128>}, {transform_indices = @transform_5, window_bounds = array<i64: 16, 128>}]} {
    %c0 = arith.constant 0 : index
    %c0_0 = arith.constant 0 : index
    %0 = vector.load %arg2[%c0, %c0_0] : memref<16x8xf32, #tpu.memory_space<vmem>>, vector<16x8xf32>
    %c0_1 = arith.constant 0 : index
    %c0_2 = arith.constant 0 : index
    %1 = vector.load %arg3[%c0_1, %c0_2] : memref<8x32xf32, #tpu.memory_space<vmem>>, vector<8x32xf32>
    %cst = arith.constant 0.000000e+00 : f32
    %2 = vector.broadcast %cst : f32 to vector<16x1xf32>
    %3 = vector.extract_strided_slice %0 {offsets = [0, 0], sizes = [16, 1], strides = [1, 1]} : vector<16x8xf32> to vector<16x1xf32>
    %4 = vector.extract_strided_slice %1 {offsets = [0, 0], sizes = [1, 32], strides = [1, 1]} : vector<8x32xf32> to vector<1x32xf32>
    %5 = vector.broadcast %3 : vector<16x1xf32> to vector<16x32xf32>
    %6 = vector.broadcast %4 : vector<1x32xf32> to vector<16x32xf32>
    %7 = arith.addf %5, %6 : vector<16x32xf32>
    %cst_3 = arith.constant 2.000000e-01 : f32
    %8 = vector.broadcast %cst_3 : f32 to vector<16x32xf32>
    %9 = arith.mulf %8, %7 : vector<16x32xf32>
    %10 = arith.maximumf %7, %9 : vector<16x32xf32>
    %c0_4 = arith.constant 0 : index
    %c0_5 = arith.constant 0 : index
    %c0_6 = arith.constant 0 : index
    %11 = vector.load %arg4[%c0_4, %c0_5, %c0_6] : memref<8x16x32xf32, #tpu.memory_space<vmem>>, vector<1x16x32xf32>
    %12 = vector.shape_cast %11 : vector<1x16x32xf32> to vector<16x32xf32>
    %13 = arith.addf %10, %12 : vector<16x32xf32>
    %cst_7 = arith.constant dense<0xFF800000> : vector<16xf32>
    %14 = vector.multi_reduction <maximumf>, %13, %cst_7 [1] : vector<16x32xf32> to vector<16xf32>
    %15 = vector.shape_cast %14 : vector<16xf32> to vector<16x1xf32>
    %16 = arith.maximumf %2, %15 : vector<16x1xf32>
    %17 = vector.extract_strided_slice %0 {offsets = [0, 1], sizes = [16, 1], strides = [1, 1]} : vector<16x8xf32> to vector<16x1xf32>
    %18 = vector.extract_strided_slice %1 {offsets = [1, 0], sizes = [1, 32], strides = [1, 1]} : vector<8x32xf32> to vector<1x32xf32>
    %19 = vector.broadcast %17 : vector<16x1xf32> to vector<16x32xf32>
    %20 = vector.broadcast %18 : vector<1x32xf32> to vector<16x32xf32>
    %21 = arith.addf %19, %20 : vector<16x32xf32>
    %cst_8 = arith.constant 2.000000e-01 : f32
    %22 = vector.broadcast %cst_8 : f32 to vector<16x32xf32>
    %23 = arith.mulf %22, %21 : vector<16x32xf32>
    %24 = arith.maximumf %21, %23 : vector<16x32xf32>
    %c1 = arith.constant 1 : index
    %c0_9 = arith.constant 0 : index
    %c0_10 = arith.constant 0 : index
    %25 = vector.load %arg4[%c1, %c0_9, %c0_10] : memref<8x16x32xf32, #tpu.memory_space<vmem>>, vector<1x16x32xf32>
    %26 = vector.shape_cast %25 : vector<1x16x32xf32> to vector<16x32xf32>
    %27 = arith.addf %24, %26 : vector<16x32xf32>
    %cst_11 = arith.constant dense<0xFF800000> : vector<16xf32>
    %28 = vector.multi_reduction <maximumf>, %27, %cst_11 [1] : vector<16x32xf32> to vector<16xf32>
    %29 = vector.shape_cast %28 : vector<16xf32> to vector<16x1xf32>
    %30 = arith.maximumf %16, %29 : vector<16x1xf32>
    %31 = vector.extract_strided_slice %0 {offsets = [0, 2], sizes = [16, 1], strides = [1, 1]} : vector<16x8xf32> to vector<16x1xf32>
    %32 = vector.extract_strided_slice %1 {offsets = [2, 0], sizes = [1, 32], strides = [1, 1]} : vector<8x32xf32> to vector<1x32xf32>
    %33 = vector.broadcast %31 : vector<16x1xf32> to vector<16x32xf32>
    %34 = vector.broadcast %32 : vector<1x32xf32> to vector<16x32xf32>
    %35 = arith.addf %33, %34 : vector<16x32xf32>
    %cst_12 = arith.constant 2.000000e-01 : f32
    %36 = vector.broadcast %cst_12 : f32 to vector<16x32xf32>
    %37 = arith.mulf %36, %35 : vector<16x32xf32>
    %38 = arith.maximumf %35, %37 : vector<16x32xf32>
    %c2 = arith.constant 2 : index
    %c0_13 = arith.constant 0 : index
    %c0_14 = arith.constant 0 : index
    %39 = vector.load %arg4[%c2, %c0_13, %c0_14] : memref<8x16x32xf32, #tpu.memory_space<vmem>>, vector<1x16x32xf32>
    %40 = vector.shape_cast %39 : vector<1x16x32xf32> to vector<16x32xf32>
    %41 = arith.addf %38, %40 : vector<16x32xf32>
    %cst_15 = arith.constant dense<0xFF800000> : vector<16xf32>
    %42 = vector.multi_reduction <maximumf>, %41, %cst_15 [1] : vector<16x32xf32> to vector<16xf32>
    %43 = vector.shape_cast %42 : vector<16xf32> to vector<16x1xf32>
    %44 = arith.maximumf %30, %43 : vector<16x1xf32>
    %45 = vector.extract_strided_slice %0 {offsets = [0, 3], sizes = [16, 1], strides = [1, 1]} : vector<16x8xf32> to vector<16x1xf32>
    %46 = vector.extract_strided_slice %1 {offsets = [3, 0], sizes = [1, 32], strides = [1, 1]} : vector<8x32xf32> to vector<1x32xf32>
    %47 = vector.broadcast %45 : vector<16x1xf32> to vector<16x32xf32>
    %48 = vector.broadcast %46 : vector<1x32xf32> to vector<16x32xf32>
    %49 = arith.addf %47, %48 : vector<16x32xf32>
    %cst_16 = arith.constant 2.000000e-01 : f32
    %50 = vector.broadcast %cst_16 : f32 to vector<16x32xf32>
    %51 = arith.mulf %50, %49 : vector<16x32xf32>
    %52 = arith.maximumf %49, %51 : vector<16x32xf32>
    %c3 = arith.constant 3 : index
    %c0_17 = arith.constant 0 : index
    %c0_18 = arith.constant 0 : index
    %53 = vector.load %arg4[%c3, %c0_17, %c0_18] : memref<8x16x32xf32, #tpu.memory_space<vmem>>, vector<1x16x32xf32>
    %54 = vector.shape_cast %53 : vector<1x16x32xf32> to vector<16x32xf32>
    %55 = arith.addf %52, %54 : vector<16x32xf32>
    %cst_19 = arith.constant dense<0xFF800000> : vector<16xf32>
    %56 = vector.multi_reduction <maximumf>, %55, %cst_19 [1] : vector<16x32xf32> to vector<16xf32>
    %57 = vector.shape_cast %56 : vector<16xf32> to vector<16x1xf32>
    %58 = arith.maximumf %44, %57 : vector<16x1xf32>
    %59 = vector.extract_strided_slice %0 {offsets = [0, 4], sizes = [16, 1], strides = [1, 1]} : vector<16x8xf32> to vector<16x1xf32>
    %60 = vector.extract_strided_slice %1 {offsets = [4, 0], sizes = [1, 32], strides = [1, 1]} : vector<8x32xf32> to vector<1x32xf32>
    %61 = vector.broadcast %59 : vector<16x1xf32> to vector<16x32xf32>
    %62 = vector.broadcast %60 : vector<1x32xf32> to vector<16x32xf32>
    %63 = arith.addf %61, %62 : vector<16x32xf32>
    %cst_20 = arith.constant 2.000000e-01 : f32
    %64 = vector.broadcast %cst_20 : f32 to vector<16x32xf32>
    %65 = arith.mulf %64, %63 : vector<16x32xf32>
    %66 = arith.maximumf %63, %65 : vector<16x32xf32>
    %c4 = arith.constant 4 : index
    %c0_21 = arith.constant 0 : index
    %c0_22 = arith.constant 0 : index
    %67 = vector.load %arg4[%c4, %c0_21, %c0_22] : memref<8x16x32xf32, #tpu.memory_space<vmem>>, vector<1x16x32xf32>
    %68 = vector.shape_cast %67 : vector<1x16x32xf32> to vector<16x32xf32>
    %69 = arith.addf %66, %68 : vector<16x32xf32>
    %cst_23 = arith.constant dense<0xFF800000> : vector<16xf32>
    %70 = vector.multi_reduction <maximumf>, %69, %cst_23 [1] : vector<16x32xf32> to vector<16xf32>
    %71 = vector.shape_cast %70 : vector<16xf32> to vector<16x1xf32>
    %72 = arith.maximumf %58, %71 : vector<16x1xf32>
    %73 = vector.extract_strided_slice %0 {offsets = [0, 5], sizes = [16, 1], strides = [1, 1]} : vector<16x8xf32> to vector<16x1xf32>
    %74 = vector.extract_strided_slice %1 {offsets = [5, 0], sizes = [1, 32], strides = [1, 1]} : vector<8x32xf32> to vector<1x32xf32>
    %75 = vector.broadcast %73 : vector<16x1xf32> to vector<16x32xf32>
    %76 = vector.broadcast %74 : vector<1x32xf32> to vector<16x32xf32>
    %77 = arith.addf %75, %76 : vector<16x32xf32>
    %cst_24 = arith.constant 2.000000e-01 : f32
    %78 = vector.broadcast %cst_24 : f32 to vector<16x32xf32>
    %79 = arith.mulf %78, %77 : vector<16x32xf32>
    %80 = arith.maximumf %77, %79 : vector<16x32xf32>
    %c5 = arith.constant 5 : index
    %c0_25 = arith.constant 0 : index
    %c0_26 = arith.constant 0 : index
    %81 = vector.load %arg4[%c5, %c0_25, %c0_26] : memref<8x16x32xf32, #tpu.memory_space<vmem>>, vector<1x16x32xf32>
    %82 = vector.shape_cast %81 : vector<1x16x32xf32> to vector<16x32xf32>
    %83 = arith.addf %80, %82 : vector<16x32xf32>
    %cst_27 = arith.constant dense<0xFF800000> : vector<16xf32>
    %84 = vector.multi_reduction <maximumf>, %83, %cst_27 [1] : vector<16x32xf32> to vector<16xf32>
    %85 = vector.shape_cast %84 : vector<16xf32> to vector<16x1xf32>
    %86 = arith.maximumf %72, %85 : vector<16x1xf32>
    %87 = vector.extract_strided_slice %0 {offsets = [0, 6], sizes = [16, 1], strides = [1, 1]} : vector<16x8xf32> to vector<16x1xf32>
    %88 = vector.extract_strided_slice %1 {offsets = [6, 0], sizes = [1, 32], strides = [1, 1]} : vector<8x32xf32> to vector<1x32xf32>
    %89 = vector.broadcast %87 : vector<16x1xf32> to vector<16x32xf32>
    %90 = vector.broadcast %88 : vector<1x32xf32> to vector<16x32xf32>
    %91 = arith.addf %89, %90 : vector<16x32xf32>
    %cst_28 = arith.constant 2.000000e-01 : f32
    %92 = vector.broadcast %cst_28 : f32 to vector<16x32xf32>
    %93 = arith.mulf %92, %91 : vector<16x32xf32>
    %94 = arith.maximumf %91, %93 : vector<16x32xf32>
    %c6 = arith.constant 6 : index
    %c0_29 = arith.constant 0 : index
    %c0_30 = arith.constant 0 : index
    %95 = vector.load %arg4[%c6, %c0_29, %c0_30] : memref<8x16x32xf32, #tpu.memory_space<vmem>>, vector<1x16x32xf32>
    %96 = vector.shape_cast %95 : vector<1x16x32xf32> to vector<16x32xf32>
    %97 = arith.addf %94, %96 : vector<16x32xf32>
    %cst_31 = arith.constant dense<0xFF800000> : vector<16xf32>
    %98 = vector.multi_reduction <maximumf>, %97, %cst_31 [1] : vector<16x32xf32> to vector<16xf32>
    %99 = vector.shape_cast %98 : vector<16xf32> to vector<16x1xf32>
    %100 = arith.maximumf %86, %99 : vector<16x1xf32>
    %101 = vector.extract_strided_slice %0 {offsets = [0, 7], sizes = [16, 1], strides = [1, 1]} : vector<16x8xf32> to vector<16x1xf32>
    %102 = vector.extract_strided_slice %1 {offsets = [7, 0], sizes = [1, 32], strides = [1, 1]} : vector<8x32xf32> to vector<1x32xf32>
    %103 = vector.broadcast %101 : vector<16x1xf32> to vector<16x32xf32>
    %104 = vector.broadcast %102 : vector<1x32xf32> to vector<16x32xf32>
    %105 = arith.addf %103, %104 : vector<16x32xf32>
    %cst_32 = arith.constant 2.000000e-01 : f32
    %106 = vector.broadcast %cst_32 : f32 to vector<16x32xf32>
    %107 = arith.mulf %106, %105 : vector<16x32xf32>
    %108 = arith.maximumf %105, %107 : vector<16x32xf32>
    %c7 = arith.constant 7 : index
    %c0_33 = arith.constant 0 : index
    %c0_34 = arith.constant 0 : index
    %109 = vector.load %arg4[%c7, %c0_33, %c0_34] : memref<8x16x32xf32, #tpu.memory_space<vmem>>, vector<1x16x32xf32>
    %110 = vector.shape_cast %109 : vector<1x16x32xf32> to vector<16x32xf32>
    %111 = arith.addf %108, %110 : vector<16x32xf32>
    %cst_35 = arith.constant dense<0xFF800000> : vector<16xf32>
    %112 = vector.multi_reduction <maximumf>, %111, %cst_35 [1] : vector<16x32xf32> to vector<16xf32>
    %113 = vector.shape_cast %112 : vector<16xf32> to vector<16x1xf32>
    %114 = arith.maximumf %100, %113 : vector<16x1xf32>
    %cst_36 = arith.constant 0.000000e+00 : f32
    %115 = vector.broadcast %cst_36 : f32 to vector<16x1xf32>
    %cst_37 = arith.constant 0.000000e+00 : f32
    %116 = vector.broadcast %cst_37 : f32 to vector<16x128xf32>
    %117 = vector.broadcast %114 : vector<16x1xf32> to vector<16x32xf32>
    %118 = arith.subf %13, %117 : vector<16x32xf32>
    %119 = math.exp %118 : vector<16x32xf32>
    %cst_38 = arith.constant dense<0.000000e+00> : vector<16xf32>
    %120 = vector.multi_reduction <add>, %119, %cst_38 [1] : vector<16x32xf32> to vector<16xf32>
    %121 = vector.shape_cast %120 : vector<16xf32> to vector<16x1xf32>
    %122 = arith.addf %115, %121 : vector<16x1xf32>
    %123 = arith.truncf %119 : vector<16x32xf32> to vector<16x32xbf16>
    %c0_39 = arith.constant 0 : index
    %c0_40 = arith.constant 0 : index
    %124 = vector.load %arg1[%c0_39, %c0_40] : memref<32x1024xbf16, #tpu.memory_space<vmem>>, vector<32x128xbf16>
    %cst_41 = arith.constant dense<0.000000e+00> : vector<16x128xf32>
    %125 = tpu.matmul %123, %124, %cst_41 {dimension_numbers = #tpu.dot_dimension_numbers<[1], [0], [0], [1], [0, 0, 1, 1], [], []>} : vector<16x32xbf16>, vector<32x128xbf16>, vector<16x128xf32> -> vector<16x128xf32>
    %126 = arith.addf %116, %125 : vector<16x128xf32>
    %127 = vector.broadcast %114 : vector<16x1xf32> to vector<16x32xf32>
    %128 = arith.subf %27, %127 : vector<16x32xf32>
    %129 = math.exp %128 : vector<16x32xf32>
    %cst_42 = arith.constant dense<0.000000e+00> : vector<16xf32>
    %130 = vector.multi_reduction <add>, %129, %cst_42 [1] : vector<16x32xf32> to vector<16xf32>
    %131 = vector.shape_cast %130 : vector<16xf32> to vector<16x1xf32>
    %132 = arith.addf %122, %131 : vector<16x1xf32>
    %133 = arith.truncf %129 : vector<16x32xf32> to vector<16x32xbf16>
    %c0_43 = arith.constant 0 : index
    %c128 = arith.constant 128 : index
    %134 = vector.load %arg1[%c0_43, %c128] : memref<32x1024xbf16, #tpu.memory_space<vmem>>, vector<32x128xbf16>
    %cst_44 = arith.constant dense<0.000000e+00> : vector<16x128xf32>
    %135 = tpu.matmul %133, %134, %cst_44 {dimension_numbers = #tpu.dot_dimension_numbers<[1], [0], [0], [1], [0, 0, 1, 1], [], []>} : vector<16x32xbf16>, vector<32x128xbf16>, vector<16x128xf32> -> vector<16x128xf32>
    %136 = arith.addf %126, %135 : vector<16x128xf32>
    %137 = vector.broadcast %114 : vector<16x1xf32> to vector<16x32xf32>
    %138 = arith.subf %41, %137 : vector<16x32xf32>
    %139 = math.exp %138 : vector<16x32xf32>
    %cst_45 = arith.constant dense<0.000000e+00> : vector<16xf32>
    %140 = vector.multi_reduction <add>, %139, %cst_45 [1] : vector<16x32xf32> to vector<16xf32>
    %141 = vector.shape_cast %140 : vector<16xf32> to vector<16x1xf32>
    %142 = arith.addf %132, %141 : vector<16x1xf32>
    %143 = arith.truncf %139 : vector<16x32xf32> to vector<16x32xbf16>
    %c0_46 = arith.constant 0 : index
    %c256 = arith.constant 256 : index
    %144 = vector.load %arg1[%c0_46, %c256] : memref<32x1024xbf16, #tpu.memory_space<vmem>>, vector<32x128xbf16>
    %cst_47 = arith.constant dense<0.000000e+00> : vector<16x128xf32>
    %145 = tpu.matmul %143, %144, %cst_47 {dimension_numbers = #tpu.dot_dimension_numbers<[1], [0], [0], [1], [0, 0, 1, 1], [], []>} : vector<16x32xbf16>, vector<32x128xbf16>, vector<16x128xf32> -> vector<16x128xf32>
    %146 = arith.addf %136, %145 : vector<16x128xf32>
    %147 = vector.broadcast %114 : vector<16x1xf32> to vector<16x32xf32>
    %148 = arith.subf %55, %147 : vector<16x32xf32>
    %149 = math.exp %148 : vector<16x32xf32>
    %cst_48 = arith.constant dense<0.000000e+00> : vector<16xf32>
    %150 = vector.multi_reduction <add>, %149, %cst_48 [1] : vector<16x32xf32> to vector<16xf32>
    %151 = vector.shape_cast %150 : vector<16xf32> to vector<16x1xf32>
    %152 = arith.addf %142, %151 : vector<16x1xf32>
    %153 = arith.truncf %149 : vector<16x32xf32> to vector<16x32xbf16>
    %c0_49 = arith.constant 0 : index
    %c384 = arith.constant 384 : index
    %154 = vector.load %arg1[%c0_49, %c384] : memref<32x1024xbf16, #tpu.memory_space<vmem>>, vector<32x128xbf16>
    %cst_50 = arith.constant dense<0.000000e+00> : vector<16x128xf32>
    %155 = tpu.matmul %153, %154, %cst_50 {dimension_numbers = #tpu.dot_dimension_numbers<[1], [0], [0], [1], [0, 0, 1, 1], [], []>} : vector<16x32xbf16>, vector<32x128xbf16>, vector<16x128xf32> -> vector<16x128xf32>
    %156 = arith.addf %146, %155 : vector<16x128xf32>
    %157 = vector.broadcast %114 : vector<16x1xf32> to vector<16x32xf32>
    %158 = arith.subf %69, %157 : vector<16x32xf32>
    %159 = math.exp %158 : vector<16x32xf32>
    %cst_51 = arith.constant dense<0.000000e+00> : vector<16xf32>
    %160 = vector.multi_reduction <add>, %159, %cst_51 [1] : vector<16x32xf32> to vector<16xf32>
    %161 = vector.shape_cast %160 : vector<16xf32> to vector<16x1xf32>
    %162 = arith.addf %152, %161 : vector<16x1xf32>
    %163 = arith.truncf %159 : vector<16x32xf32> to vector<16x32xbf16>
    %c0_52 = arith.constant 0 : index
    %c512 = arith.constant 512 : index
    %164 = vector.load %arg1[%c0_52, %c512] : memref<32x1024xbf16, #tpu.memory_space<vmem>>, vector<32x128xbf16>
    %cst_53 = arith.constant dense<0.000000e+00> : vector<16x128xf32>
    %165 = tpu.matmul %163, %164, %cst_53 {dimension_numbers = #tpu.dot_dimension_numbers<[1], [0], [0], [1], [0, 0, 1, 1], [], []>} : vector<16x32xbf16>, vector<32x128xbf16>, vector<16x128xf32> -> vector<16x128xf32>
    %166 = arith.addf %156, %165 : vector<16x128xf32>
    %167 = vector.broadcast %114 : vector<16x1xf32> to vector<16x32xf32>
    %168 = arith.subf %83, %167 : vector<16x32xf32>
    %169 = math.exp %168 : vector<16x32xf32>
    %cst_54 = arith.constant dense<0.000000e+00> : vector<16xf32>
    %170 = vector.multi_reduction <add>, %169, %cst_54 [1] : vector<16x32xf32> to vector<16xf32>
    %171 = vector.shape_cast %170 : vector<16xf32> to vector<16x1xf32>
    %172 = arith.addf %162, %171 : vector<16x1xf32>
    %173 = arith.truncf %169 : vector<16x32xf32> to vector<16x32xbf16>
    %c0_55 = arith.constant 0 : index
    %c640 = arith.constant 640 : index
    %174 = vector.load %arg1[%c0_55, %c640] : memref<32x1024xbf16, #tpu.memory_space<vmem>>, vector<32x128xbf16>
    %cst_56 = arith.constant dense<0.000000e+00> : vector<16x128xf32>
    %175 = tpu.matmul %173, %174, %cst_56 {dimension_numbers = #tpu.dot_dimension_numbers<[1], [0], [0], [1], [0, 0, 1, 1], [], []>} : vector<16x32xbf16>, vector<32x128xbf16>, vector<16x128xf32> -> vector<16x128xf32>
    %176 = arith.addf %166, %175 : vector<16x128xf32>
    %177 = vector.broadcast %114 : vector<16x1xf32> to vector<16x32xf32>
    %178 = arith.subf %97, %177 : vector<16x32xf32>
    %179 = math.exp %178 : vector<16x32xf32>
    %cst_57 = arith.constant dense<0.000000e+00> : vector<16xf32>
    %180 = vector.multi_reduction <add>, %179, %cst_57 [1] : vector<16x32xf32> to vector<16xf32>
    %181 = vector.shape_cast %180 : vector<16xf32> to vector<16x1xf32>
    %182 = arith.addf %172, %181 : vector<16x1xf32>
    %183 = arith.truncf %179 : vector<16x32xf32> to vector<16x32xbf16>
    %c0_58 = arith.constant 0 : index
    %c768 = arith.constant 768 : index
    %184 = vector.load %arg1[%c0_58, %c768] : memref<32x1024xbf16, #tpu.memory_space<vmem>>, vector<32x128xbf16>
    %cst_59 = arith.constant dense<0.000000e+00> : vector<16x128xf32>
    %185 = tpu.matmul %183, %184, %cst_59 {dimension_numbers = #tpu.dot_dimension_numbers<[1], [0], [0], [1], [0, 0, 1, 1], [], []>} : vector<16x32xbf16>, vector<32x128xbf16>, vector<16x128xf32> -> vector<16x128xf32>
    %186 = arith.addf %176, %185 : vector<16x128xf32>
    %187 = vector.broadcast %114 : vector<16x1xf32> to vector<16x32xf32>
    %188 = arith.subf %111, %187 : vector<16x32xf32>
    %189 = math.exp %188 : vector<16x32xf32>
    %cst_60 = arith.constant dense<0.000000e+00> : vector<16xf32>
    %190 = vector.multi_reduction <add>, %189, %cst_60 [1] : vector<16x32xf32> to vector<16xf32>
    %191 = vector.shape_cast %190 : vector<16xf32> to vector<16x1xf32>
    %192 = arith.addf %182, %191 : vector<16x1xf32>
    %193 = arith.truncf %189 : vector<16x32xf32> to vector<16x32xbf16>
    %c0_61 = arith.constant 0 : index
    %c896 = arith.constant 896 : index
    %194 = vector.load %arg1[%c0_61, %c896] : memref<32x1024xbf16, #tpu.memory_space<vmem>>, vector<32x128xbf16>
    %cst_62 = arith.constant dense<0.000000e+00> : vector<16x128xf32>
    %195 = tpu.matmul %193, %194, %cst_62 {dimension_numbers = #tpu.dot_dimension_numbers<[1], [0], [0], [1], [0, 0, 1, 1], [], []>} : vector<16x32xbf16>, vector<32x128xbf16>, vector<16x128xf32> -> vector<16x128xf32>
    %196 = arith.addf %186, %195 : vector<16x128xf32>
    %cst_63 = arith.constant 0.000000e+00 : f32
    %197 = vector.broadcast %cst_63 : f32 to vector<16x1xf32>
    %198 = arith.cmpf ogt, %192, %197 : vector<16x1xf32>
    %cst_64 = arith.constant 1.000000e+00 : f32
    %199 = vector.broadcast %cst_64 : f32 to vector<16x1xf32>
    %200 = arith.select %198, %192, %199 : vector<16x1xi1>, vector<16x1xf32>
    %201 = tpu.reciprocal %200 {approx = true} : vector<16x1xf32> -> vector<16x1xf32>
    %202 = vector.broadcast %201 : vector<16x1xf32> to vector<16x128xf32>
    %203 = arith.mulf %196, %202 : vector<16x128xf32>
    %c0_65 = arith.constant 0 : index
    %c0_66 = arith.constant 0 : index
    %204 = vector.load %arg5[%c0_65, %c0_66] : memref<1x128xf32, #tpu.memory_space<vmem>>, vector<1x128xf32>
    %205 = vector.broadcast %204 : vector<1x128xf32> to vector<16x128xf32>
    %206 = arith.addf %203, %205 : vector<16x128xf32>
    %c0_67 = arith.constant 0 : index
    %c0_68 = arith.constant 0 : index
    %207 = vector.load %arg6[%c0_67, %c0_68] : memref<16x128xf32, #tpu.memory_space<vmem>>, vector<16x128xf32>
    tpu.vector_store %arg6[%c0_67, %c0_68], %206 {strides = array<i32>} : memref<16x128xf32, #tpu.memory_space<vmem>>, vector<16x128xf32>,
    return
  }
  func.func @transform_0(%arg0: i32) -> (i32, i32) {
    %c0_i32 = arith.constant 0 : i32
    %c0_i32_0 = arith.constant 0 : i32
    %c0_i32_1 = arith.constant 0 : i32
    return %c0_i32, %c0_i32_0 : i32, i32
  }
  func.func @transform_1(%arg0: i32) -> (i32, i32) {
    %c0_i32 = arith.constant 0 : i32
    %c0_i32_0 = arith.constant 0 : i32
    return %arg0, %c0_i32 : i32, i32
  }
  func.func @transform_2(%arg0: i32) -> (i32, i32) {
    %c0_i32 = arith.constant 0 : i32
    %c0_i32_0 = arith.constant 0 : i32
    %c0_i32_1 = arith.constant 0 : i32
    return %c0_i32, %c0_i32_0 : i32, i32
  }
  func.func @transform_3(%arg0: i32) -> (i32, i32, i32) {
    %c0_i32 = arith.constant 0 : i32
    %c0_i32_0 = arith.constant 0 : i32
    %c0_i32_1 = arith.constant 0 : i32
    return %c0_i32, %arg0, %c0_i32_0 : i32, i32, i32
  }
  func.func @transform_4(%arg0: i32) -> (i32, i32) {
    %c0_i32 = arith.constant 0 : i32
    %c0_i32_0 = arith.constant 0 : i32
    %c0_i32_1 = arith.constant 0 : i32
    return %c0_i32, %c0_i32_0 : i32, i32
  }
  func.func @transform_5(%arg0: i32) -> (i32, i32) {
    %c0_i32 = arith.constant 0 : i32
    %c0_i32_0 = arith.constant 0 : i32
    return %arg0, %c0_i32 : i32, i32
  }
}

</mosaic_0001>

<bundles_post_ra>
// kernel: rgat_forward.2
= control target key start
LH: loop header
LB: loop body
LE: loop exit
PB: predicated region body
PF: predicated region fallthrough
CT: control target
= control target key end

     0   :  { %10 = vsyncpa [#allocation3], 0  ;;  %s2464_s0 = inlined_call_operand.hbm [shape: bf16[32,1024], index: 0, kind: input, shape index: {}]   ;;  %s2465_s1 = inlined_call_operand.hbm [shape: f32[32,8], index: 1, kind: input, shape index: {}]   ;;  %s2466_s2 = inlined_call_operand.hbm [shape: f32[8,32], index: 2, kind: input, shape index: {}]   ;;  %s2467_s3 = inlined_call_operand.hbm [shape: f32[8,32,32], index: 3, kind: input, shape index: {}]   ;;  %s2468_s4 = inlined_call_operand.hbm [shape: f32[1,128], index: 4, kind: input, shape index: {}]   ;;  %s2469_s5 = inlined_call_operand.hbm [shape: bf16[32,128], index: 5, kind: output, shape index: {}]  }
   0x1   :  { %11 = vsyncpa [#allocation6], 0 }
   0x2   :  { %13 = vsyncpa [#allocation6 + $0x1], 0 }
   0x3   :  { %14 = vsyncpa [#allocation9], 0 }
   0x4   :  { %16 = vsyncpa [#allocation9 + $0x1], 0 }
   0x5   :  { %17 = vsyncpa [#allocation4], 0 }
   0x6   :  { %19 = vsyncpa [#allocation4 + $0x1], 0  ;;  %s1954_s18 = smov 0   ;;  %s1956_s19 = smov 0  }
   0x7   :  { %s1958_s20 = smov 0   ;;  %s1960_s21 = smov 0  }
   0x8 LB: > { %s1975_s22 = sadd.s32 4294967295, %s1897_s21   ;;  %s1373_s23 = sadd.s32 4294967294, %s1897_s21   ;;  %s1897_s21 = sphi %s1960_s21, %s2497_s21   ;;  %s1893_s20 = sphi %s1958_s20, %s2501_s20   ;;  %s1889_s19 = sphi %s1956_s19, %s2500_s19   ;;  %s1885_s18 = sphi %s1954_s18, %s2499_s18  }
   0x9   : > { %s1979_s24 = sadd.s32 1, %s1897_s21   ;;  %s53_s25 = sadd.s32 1, %s1893_s20 }
   0xa   : > { %2477 = sst [smem:[#allocation21_spill]] %s1979_s24  ;;  %s50_s26 = ssub.s32 %s1897_s21, %s1979_s24 }
   0xb   : > { %p60_p0 = scmp.ne.s32.totalorder %s1893_s20, %s1889_s19  ;;  %p51_p1 = scmp.eq.s32.totalorder %s50_s26, 0 }
   0xc   : > { %p61_p2 = scmp.eq.s32.totalorder %s1897_s21, 0  ;;  %p66_p3 = scmp.ne.s32.totalorder %s1889_s19, %s1885_s18 }
   0xd   : > { %p2470_p4 = scmp.eq.s32.totalorder %s1975_s22, 0  ;;  %p158_p7 = scmp.eq.s32.totalorder %s1975_s22, 1 }
   0xe   : > { %s1991_s27 = scalar_select %p51_p1, %s1893_s20, %s53_s25  }
   0xf   : > { %p1993_p5 = por %p61_p2, %p60_p0  ;;  %p1999_p6 = por %p2470_p4, %p66_p3 }
  0x10   : > { %2478 = sst [smem:[#allocation22_spill]] %s1991_s27  ;;  %p164_p8 = scmp.eq.s32.totalorder %s1373_s23, 1 }
  0x11   : > { %s2479_s28 = scalar_select %p1993_p5, 1, 0 }
  0x12   : > { %s2480_s29 = scalar_select %p1999_p6, 1, 0 }
  0x13   : > { %p1374_p9 = scmp.ge.s32.totalorder %s1897_s21, 1  ;;  %p171_p10 = scmp.lt.s32.totalorder %s1897_s21, 3 }
  0x14   : > { %p2006_p11 = por %p158_p7, %p60_p0  ;;  %p2010_p12 = por %p164_p8, %p66_p3 }
  0x15   : > { %p2014_p13 = pnand %p1374_p9, %p171_p10  ;;  %s1899_s8 = smov [#allocation2]  }
  0x16   : > { %s2481_s30 = scalar_select %p2006_p11, 1, 0 }
  0x17   : > { %s2482_s6 = scalar_select %p2010_p12, 1, 0 }
  0x18   : > { %s2483_s7 = scalar_select %p2014_p13, 1, 0 }
  0x19   : > { %p1578_p1 = pneg %p2014_p13  ;;  %s183_s9 = sshll.u32 %s1899_s8, 4  ;;  %s184_s9 = int_to_ptr.vmem [resolvable:$true] %s183_s9 }
  0x1a   : > { %s1900_s11 = smov [#allocation7]   ;;  %s1703_s15 = scalar_lea.hbm %s2464_s0, 2048 }
  0x1b   : > { %p2022_p2 = pnand %p1578_p1, %p2470_p4  ;;  %s197_s12 = sshll.u32 %s1900_s11, 4  ;;  %s2026_s12 = int_to_ptr.vmem [resolvable:$true] %s197_s12 }
  0x1c   : > { %p1704_p0 = scmp.ne.s32.totalorder %s2464_s0, %s1703_s15  ;;  %p1710_p9 = scmp.lt.u32.totalorder %s1703_s15, %s2464_s0 }
  0x1d   : > { %p2036_p3 = pneg %p2022_p2 }
  0x1f   : > { %p1706_p7 = pnand %p2036_p3, %p1704_p0 }
  0x21   : > { %p1707_p8 = pneg %p1706_p7 }
  0x23   : > { %p1712_p10 = pnand %p1710_p9, %p1707_p8 }
  0x25   : > { %1715 = shalt.err (!%p1712_p10)
}
  0x26   : > { %s1716_s8 = scalar_lea.vmem %s184_s9, 2048  ;;  %p1724_p11 = scmp.lt.s32.totalorder %s184_s9, %s184_s9 }
  0x27   : > { %p1717_p1 = scmp.ne.s32.totalorder %s184_s9, %s1716_s8  ;;  %p1725_p6 = scmp.lt.s32.totalorder %s1716_s8, %s1716_s8 }
  0x29   : > { %p1719_p4 = pnand %p1717_p1, %p2036_p3  ;;  %p1726_p13 = por %p1725_p6, %p1724_p11 }
  0x2b   : > { %p1720_p12 = pneg %p1719_p4 }
  0x2d   : > { %p1727_p5 = pnand %p1726_p13, %p1720_p12 }
  0x2f   : > { %1730 = shalt.err (!%p1727_p5)
}
  0x30   : > { %s1901_s11 = smov 512   ;;  %s1902_s13 = smov 32  }
  0x31   : > { %1581 = dma.hbm_to_vmem [thread:$0]  (!%p2022_p2), %s2464_s0, 2048, %s184_s9, [#allocation3], %s1901_s11, %s1901_s11, %s1902_s13  }
  0x32   : > { %s1731_s25 = scalar_lea.hbm %s2466_s2, 128 }
  0x33   : > { %p1732_p4 = scmp.ne.s32.totalorder %s2466_s2, %s1731_s25  ;;  %p1738_p11 = scmp.lt.u32.totalorder %s1731_s25, %s2466_s2 }
  0x35   : > { %p1734_p6 = pnand %p1732_p4, %p2036_p3 }
  0x37   : > { %p1735_p5 = pneg %p1734_p6 }
  0x39   : > { %p1740_p12 = pnand %p1738_p11, %p1735_p5 }
  0x3b   : > { %1743 = shalt.err (!%p1740_p12)
}
  0x3c   : > { %s1744_s9 = scalar_lea.vmem %s2026_s12, 128  ;;  %p1752_p8 = scmp.lt.s32.totalorder %s2026_s12, %s2026_s12 }
  0x3d   : > { %p1745_p13 = scmp.ne.s32.totalorder %s2026_s12, %s1744_s9  ;;  %p1753_p9 = scmp.lt.s32.totalorder %s1744_s9, %s1744_s9 }
  0x3f   : > { %p1747_p0 = pnand %p1745_p13, %p2036_p3  ;;  %p1754_p10 = por %p1753_p9, %p1752_p8 }
  0x41   : > { %p1748_p7 = pneg %p1747_p0 }
  0x43   : > { %p1755_p1 = pnand %p1754_p10, %p1748_p7 }
  0x45   : > { %1758 = shalt.err (!%p1755_p1)
}
  0x46   : > { %1584 = dma.hbm_to_vmem [thread:$0]  (!%p2022_p2), %s2466_s2, 128, %s2026_s12, [#allocation6]  }
  0x47   : > { %s1903_s11 = smov [#allocation10]   ;;  %s1759_s16 = scalar_lea.hbm %s2468_s4, 16 }
  0x48   : > { %s208_s13 = sshll.u32 %s1903_s11, 4  ;;  %p1760_p4 = scmp.ne.s32.totalorder %s2468_s4, %s1759_s16  ;;  %s209_s13 = int_to_ptr.vmem [resolvable:$true] %s208_s13 }
  0x49   : > { %p1766_p11 = scmp.lt.u32.totalorder %s1759_s16, %s2468_s4 }
  0x4a   : > { %p1762_p6 = pnand %p1760_p4, %p2036_p3 }
  0x4c   : > { %p1763_p5 = pneg %p1762_p6 }
  0x4e   : > { %p1768_p12 = pnand %p1766_p11, %p1763_p5 }
  0x50   : > { %1771 = shalt.err (!%p1768_p12)
}
  0x51   : > { %s1772_s12 = scalar_lea.vmem %s209_s13, 16  ;;  %s1779_s9 = scalar_lea.vmem %s209_s13, 32 }
  0x52   : > { %p1773_p13 = scmp.ne.s32.totalorder %s209_s13, %s1772_s12  ;;  %p1780_p8 = scmp.lt.s32.totalorder %s209_s13, %s209_s13 }
  0x53   : > { %p1781_p9 = scmp.lt.s32.totalorder %s1779_s9, %s1772_s12 }
  0x54   : > { %p1775_p0 = pnand %p1773_p13, %p2036_p3 }
  0x55   : > { %p1782_p10 = por %p1781_p9, %p1780_p8 }
  0x56   : > { %p1776_p7 = pneg %p1775_p0 }
  0x58   : > { %p1783_p1 = pnand %p1782_p10, %p1776_p7 }
  0x5a   : > { %1786 = shalt.err (!%p1783_p1)
}
  0x5b   : > { %1587 = dma.hbm_to_vmem [thread:$0]  (!%p2022_p2), %s2468_s4, 16, %s209_s13, [#allocation9]  }
  0x5c   : > { %p1378_p4 = scmp.ge.s32.totalorder %s1897_s21, 2 }
  0x5d   : > { %s219_s23 = sand.u32 (!%p1378_p4), 1, %s1897_s21   ;;  %s221_s11 = sand.u32 (!%p1378_p4), 1, %s1893_s20  }
  0x5e   : > { %215 = sbr.rel (%p1378_p4) target bundleno = 133 (0x85), region = 28  ;;  %s1379_s10 = sshll.u32 (!%p1378_p4), %s221_s11, 4 }
  0x5f   : > { %s1437_s14 = sshll.u32 (!%p1378_p4), %s1897_s21, 8  ;;  %s223_s17 = scalar_lea.vmem (!%p1378_p4), [#allocation5], %s1379_s10 }
  0x60   : > { %s2106_s16 = scalar_lea.hbm (!%p1378_p4), %s2465_s1, %s1437_s14  ;;  %s230_s25 = sshll.u32 (!%p1378_p4), %s223_s17, 4  ;;  %s2108_s25 = int_to_ptr.vmem [resolvable:$true] %s230_s25 }
  0x61   : > { %s2112_s26 = scalar_lea.sflag (!%p1378_p4), [#allocation6], %s219_s23  ;;  %s1787_s8 = scalar_lea.hbm (!%p1378_p4), %s2106_s16, 256 }
  0x62   : > { %p1788_p2 = scmp.ne.s32.totalorder (!%p1378_p4), %s2106_s16, %s1787_s8  ;;  %p2486_p3 = scmp.ne.s32.totalorder (!%p1378_p4), %s2479_s28, 0 }
  0x63   : > { %s1791_s24 = scalar_lea.hbm (!%p1378_p4), %s2465_s1, 512  ;;  %p1792_p11 = scmp.lt.u32.totalorder (!%p1378_p4), %s2106_s16, %s2465_s1 }
  0x64   : > { %p1789_p6 = pnand (!%p1378_p4), %p1788_p2, %p2486_p3  ;;  %p1793_p12 = scmp.lt.u32.totalorder (!%p1378_p4), %s1791_s24, %s1787_s8 }
  0x65   : > { %p1795_p0 = scmp.lt.u32.totalorder %s1787_s8, %s2106_s16 }
  0x66   : > { %p1790_p5 = pneg %p1789_p6  ;;  %p1794_p13 = por %p1793_p12, %p1792_p11 }
  0x68   : > { %p1796_p7 = por %p1795_p0, %p1794_p13 }
  0x6a   : > { %p1797_p8 = pnand %p1796_p7, %p1790_p5 }
  0x6c   : > { %1800 = shalt.err (!%p1797_p8)
}
  0x6d   : > { %s1801_s10 = scalar_lea.vmem %s2108_s25, 256  ;;  %s1904_s13 = smov [#allocation5]  }
  0x6e   : > { %p1802_p9 = scmp.ne.s32.totalorder %s2108_s25, %s1801_s10  ;;  %s1805_s17 = sshll.u32 %s1904_s13, 4  ;;  %s1806_s17 = int_to_ptr.vmem [resolvable:$false] %s1805_s17 }
  0x6f   : > { %s1807_s12 = scalar_lea.vmem %s1806_s17, 512  ;;  %p1808_p2 = scmp.lt.s32.totalorder %s2108_s25, %s1806_s17 }
  0x70   : > { %p1803_p10 = pnand %p1802_p9, %p2486_p3  ;;  %p1809_p6 = scmp.lt.s32.totalorder %s1807_s12, %s1801_s10 }
  0x72   : > { %p1804_p1 = pneg %p1803_p10  ;;  %p1810_p11 = por %p1809_p6, %p1808_p2 }
  0x74   : > { %p1811_p12 = pnand %p1810_p11, %p1804_p1 }
  0x76   : > { %1814 = shalt.err (!%p1811_p12)
}
  0x77   : > { %s1905_s8 = smov 128   ;;  %s1906_s9 = smov 8  }
  0x78   : > { %1559 = dma.hbm_to_vmem [thread:$0]  (%p2486_p3), %s2106_s16, 256, %s2108_s25, %s2112_s26, %s1905_s8, %s1905_s8, %s1906_s9  }
  0x79   : > { %s1382_s24 = sshll.u32 %s221_s11, 7  ;;  %s250_s10 = scalar_lea.hbm %s2467_s3, %s1437_s14 }
  0x7a   : > { %s1560_s13 = scalar_select %p2486_p3, [#allocation0], [#allocation14] }
  0x7b   : > { %s244_s17 = scalar_lea.vmem [#allocation8], %s1382_s24  ;;  %s1907_s26 = smov 512  }
  0x7c   : > { %s263_s16 = sshll.u32 %s244_s17, 4  ;;  %s255_s25 = sld [smem:[%s1560_s13]]   ;;  %s264_s16 = int_to_ptr.vmem [resolvable:$true] %s263_s16 }
  0x7d   : > { %1561 = sst [smem:[#allocation13]] (%p2486_p3), %s1907_s26  ;;  %s1908_s12 = smov 256  }
  0x7e   : > { %1562 = sst [smem:[#allocation13 + $0x1]] (%p2486_p3), %s1908_s12  ;;  %s1909_s11 = smov 2  }
  0x7f   : > { %1563 = sst [smem:[#allocation13 + $0x2]] (%p2486_p3), %s1909_s11  ;;  %s1910_s8 = smov 128  }
  0x80   : > { %1564 = sst [smem:[#allocation13 + $0x3]] (%p2486_p3), %s1910_s8  ;;  %s1911_s9 = smov 8  }
  0x81   : > { %1565 = sst [smem:[#allocation13 + $0x4]] (%p2486_p3), %s1910_s8  ;;  %s241_s27 = scalar_lea.sflag [#allocation9], %s219_s23 }
  0x82   : > { %s1385_s14 = sshll.u32 %s255_s25, 26  ;;  %1566 = sst [smem:[#allocation13 + $0x5]] (%p2486_p3), %s1911_s9 }
  0x83   : > { %s1386_s24 = sadd.s32 134217728, %s1385_s14  ;;  %s1912_s15 = smov [#allocation12]  }
  0x84   : > { %1567 = dma.general (%p2486_p3), %s250_s10, 2048, %s264_s16, %s241_s27, %s1912_s15, [#allocation13], %s1386_s24, 0  }
  0x85 PF: > { %p2487_p5 = scmp.ne.s32.totalorder %s2483_s7, 0 }
  0x86   : > { %p2488_p13 = scmp.eq.s32.totalorder (!%p2487_p5), %s1975_s22, 0 }
  0x87   : > { %288 = sbr.rel (%p2487_p5) target bundleno = 775 (0x307), region = 40 }
  0x8e   : > { %1860 = dma.done.wait (%p2488_p13), [#allocation3], 2048   ;;  %p2489_p0 = pmov %p2488_p13 }
  0x8f   : > { %s294_s13 = sand.u32 1, %s1975_s22   ;;  %s2169_s17 = sand.u32 1, %s1889_s19  }
  0x90   : > { %1862 = vsyncadd (%p2489_p0), [#allocation3], 4294965248  ;;  %s1389_s23 = sshll.u32 %s2169_s17, 4  ;;  %s295_s28 = scalar_lea.sflag [#allocation6], %s294_s13 }
  0x91   : > { %s298_s10 = scalar_lea.vmem [#allocation5], %s1389_s23  ;;  %p2490_p3 = scmp.ne.s32.totalorder %s2480_s29, 0 }
  0x93   : > { %1864 = dma.done.wait (%p2490_p3), %s295_s28, 256  }
  0x94   : > { %1866 = vsyncadd (%p2490_p3), %s295_s28, 4294967040  ;;  %p2491_p7 = pmov %p2489_p0 }
  0x95   : > { %p2492_p8 = pmov %p2489_p0 }
  0x96   : > { %1868 = dma.done.wait (%p2491_p7), [#allocation6], 128  }
  0x97   : > { %1870 = vsyncadd (%p2492_p8), [#allocation6], 4294967168  ;;  %s1391_s7 = sshll.u32 %s2169_s17, 7  ;;  %s308_s16 = scalar_lea.sflag [#allocation9], %s294_s13 }
  0x98   : > { %s2181_s25 = scalar_lea.vmem [#allocation8], %s1391_s7 }
  0x99   : > { %1872 = dma.done.wait (%p2490_p3), %s308_s16, 2048  }
  0x9a   : > { %1874 = vsyncadd (%p2490_p3), %s308_s16, 4294965248  ;;  %p2493_p9 = pmov %p2489_p0 }
  0x9b   : > { %p2494_p10 = pmov %p2489_p0 }
  0x9c   : > { %1876 = dma.done.wait (%p2493_p9), [#allocation9], 16  }
  0x9d   : > { %1878 = vsyncadd (%p2494_p10), [#allocation9], 4294967280  ;;  %v1913_v0 = vmov 1   ;;  %v1914_v1 = vmov 0   ;;  %v350_v2 = vld [vmem:[%s298_s10] sm:$0xff]  ;;  %v351_v3 = vld [vmem:[%s298_s10 + $0x8] sm:$0xff]  ;;  %v363_v10 = vlaneseq }
  0x9e   : > { %1655 = vset.pattern.permute.xlu1 %v1913_v0  ;;  %1654 = vset.pattern.permute.xlu0 %v1914_v1  ;;  %v1915_v4 = vmov 2   ;;  %v1916_v5 = vmov 3   ;;  %v1917_v6 = vmov 4   ;;  %v1918_v7 = vmov 5   ;;  %v2195_v14 = vld [vmem:[#allocation7] sm:$0xff]  ;;  %v373_v26 = vld [vmem:[%s2181_s25] sm:$0xff] }
  0x9f   : > { %387 = vperm.xlu1 %1655, %v350_v2   ;;  %355 = vperm.xlu0 %1654, %v350_v2   ;;  %v1919_v8 = vmov 6   ;;  %v1920_v9 = vmov 7   ;;  %v2191_v11 = vshrl.u32 %v363_v10, 7  ;;  %vm377_vm0 = vcmask 261120   ;;  %v1394_v32 = vld [vmem:[%s2181_s25 + $0x10] sm:$0xff]  ;;  %v374_v37 = vld [vmem:[%s2181_s25 + $0x8] sm:$0xff] }
  0xa0   : > { %v1395_v46 = vld [vmem:[%s2181_s25 + $0x18] sm:$0xff]  ;;  %v1396_v56 = vld [vmem:[%s2181_s25 + $0x20] sm:$0xff]  ;;  %v1397_v61 = vld [vmem:[%s2181_s25 + $0x28] sm:$0xff]  ;;  %vm1922_vm1 = vmmov 0   ;;  %s1393_s29 = sshll.u32 %s2169_s17, 3  ;;  %s1434_s26 = sshll.u32 %s1975_s22, 7 }
  0xa1   : > { %v396_v12 = vsub.s32 1, %v2191_v11  ;;  %v365_v13 = vsub.s32 0, %v2191_v11  ;;  %v427_v21 = vsub.s32 2, %v2191_v11  ;;  %v458_v36 = vsub.s32 3, %v2191_v11  ;;  %v1399_v10 = vld [vmem:[%s2181_s25 + $0x38] sm:$0xff]  ;;  %s346_s12 = scalar_lea.vmem [#allocation11], %s1393_s29  ;;  %s2420_s9 = scalar_lea.hbm %s2469_s5, %s1434_s26 }
  0xa2   : > { %v489_v51 = vsub.s32 4, %v2191_v11  ;;  %v520_v52 = vsub.s32 5, %v2191_v11  ;;  %s1250_s11 = sshll.u32 %s346_s12, 4  ;;  %s1237_s24 = scalar_lea.sflag [#allocation4], %s2169_s17  ;;  %s2422_s11 = int_to_ptr.vmem [resolvable:$true] %s1250_s11 }
  0xa3   : > { %391 = vperm.xlu1 %1655, %v351_v3   ;;  %360 = vperm.xlu0 %1654, %v351_v3   ;;  %v397_v15 = vrot.slane %v2195_v14, %v396_v12  ;;  %v366_v16 = vrot.slane %v2195_v14, %v365_v13  ;;  %v428_v31 = vrot.slane %v2195_v14, %v427_v21  ;;  %s1815_s27 = scalar_lea.vmem %s2422_s11, 128  ;;  %p2495_p2 = scmp.ne.s32.totalorder %s2481_s30, 0 }
  0xa4   : > { %v459_v47 = vrot.slane %v2195_v14, %v458_v36  ;;  %v490_v0 = vrot.slane %v2195_v14, %v489_v51  ;;  %v582_v51 = vsub.s32 7, %v2191_v11  ;;  %p1816_p1 = scmp.ne.s32.totalorder %s2422_s11, %s1815_s27  ;;  %s1923_s22 = smov [#allocation11]  }
  0xa5   : > { %s1819_s15 = sshll.u32 %s1923_s22, 4  ;;  %s1820_s15 = int_to_ptr.vmem [resolvable:$false] %s1819_s15 }
  0xa6   : > { %p1817_p6 = pnand %p1816_p1, %p2495_p2  ;;  %s1821_s13 = scalar_lea.vmem %s1820_s15, 256 }
  0xa7   : > { %1657 = vset.pattern.permute.xlu1 %v1915_v4  ;;  %1656 = vset.pattern.permute.xlu0 %v1915_v4  ;;  %p1822_p12 = scmp.lt.s32.totalorder %s2422_s11, %s1820_s15  ;;  %p1823_p5 = scmp.lt.s32.totalorder %s1821_s13, %s1815_s27 }
  0xa8   : > { %422 = vperm.xlu1 %1657, %v351_v3   ;;  %418 = vperm.xlu0 %1656, %v350_v2   ;;  %p1818_p11 = pneg %p1817_p6 }
  0xa9   : > { %p1824_p13 = por %p1823_p5, %p1822_p12 }
  0xab   : > { %p1825_p0 = pnand %p1824_p13, %p1818_p11 }
  0xac   : > { %1658 = vset.pattern.permute.xlu1 %v1916_v5  ;;  %1659 = vset.pattern.permute.xlu0 %v1916_v5 }
  0xad   : > { %449 = vperm.xlu1 %1658, %v350_v2   ;;  %453 = vperm.xlu0 %1659, %v351_v3  }
  0xb1   : > { %1660 = vset.pattern.permute.xlu1 %v1917_v6  ;;  %1661 = vset.pattern.permute.xlu0 %v1918_v7 }
  0xb2   : > { %480 = vperm.xlu1 %1660, %v350_v2   ;;  %511 = vperm.xlu0 %1661, %v350_v2  }
  0xb6   : > { %484 = vperm.xlu1 %1660, %v351_v3   ;;  %1664 = vset.pattern.permute.xlu0 %v1919_v8 }
  0xb7   : > { %546 = vperm.xlu0 %1664, %v351_v3  }
  0xba   : > { %1662 = vset.pattern.permute.xlu1 %v1918_v7 }
  0xbb   : > { %515 = vperm.xlu1 %1662, %v351_v3   ;;  %1666 = vset.pattern.permute.xlu0 %v1920_v9 }
  0xbf   : > { %1663 = vset.pattern.permute.xlu1 %v1919_v8 }
  0xc0   : > { %542 = vperm.xlu1 %1663, %v350_v2  }
  0xc4   : > { %1665 = vset.pattern.permute.xlu1 %v1920_v9  ;;  %v1398_v9 = vld [vmem:[%s2181_s25 + $0x30] sm:$0xff] }
  0xc5   : > { %573 = vperm.xlu1 %1665, %v350_v2   ;;  %v521_v2 = vrot.slane %v2195_v14, %v520_v52 }
  0xc9   : > { %577 = vperm.xlu1 %1665, %v351_v3   ;;  %v551_v3 = vsub.s32 6, %v2191_v11 }
 0x11e   : > { %v388_v17 = vpop.permute.xlu1 %387  ;;  %v356_v18 = vpop.permute.xlu0 %355 }
 0x11f   : > { %v398_v19 = vadd.f32 %v397_v15, %v388_v17  ;;  %v367_v20 = vadd.f32 %v366_v16, %v356_v18 }
 0x121   : > { %v400_v22 = vmul.f32 0.2, %v398_v19  ;;  %v369_v23 = vmul.f32 0.2, %v367_v20 }
 0x122   : > { %v392_v24 = vpop.permute.xlu1 %391  ;;  %v361_v25 = vpop.permute.xlu0 %360 }
 0x123   : > { %v402_v27 = vmax.f32 %v398_v19, %v400_v22  ;;  %v371_v28 = vmax.f32 %v367_v20, %v369_v23  ;;  %v399_v29 = vadd.f32 %v397_v15, %v392_v24  ;;  %v368_v30 = vadd.f32 %v366_v16, %v361_v25 }
 0x124   : > { %v552_v22 = vrot.slane %v2195_v14, %v551_v3 }
 0x125   : > { %v401_v33 = vmul.f32 0.2, %v399_v29  ;;  %v370_v34 = vmul.f32 0.2, %v368_v30  ;;  %v2203_v35 = vadd.f32 %v373_v26, %v371_v28  ;;  %v2209_v43 = vadd.f32 %v1394_v32, %v402_v27  ;;  %v1400_v28 = vld [vmem:[%s2181_s25 + $0x40] sm:$0xff] }
 0x127   : > { %v403_v38 = vmax.f32 %v399_v29, %v401_v33  ;;  %v372_v39 = vmax.f32 %v368_v30, %v370_v34  ;;  %v423_v40 = vpop.permute.xlu1 %422  ;;  %v419_v41 = vpop.permute.xlu0 %418  ;;  %v378_v42 = vsel %vm377_vm0, %v2203_v35, -inf  ;;  %v409_v53 = vsel %vm377_vm0, %v2209_v43, -inf  ;;  %v1402_v29 = vld [vmem:[%s2181_s25 + $0x50] sm:$0xff] }
 0x128   : > { %v430_v44 = vadd.f32 %v428_v31, %v423_v40  ;;  %v429_v45 = vadd.f32 %v428_v31, %v419_v41  ;;  %379 = vmax.xlane.f32.xlu0 %v378_v42  ;;  %v1401_v40 = vld [vmem:[%s2181_s25 + $0x48] sm:$0xff] }
 0x129   : > { %v2213_v48 = vadd.f32 %v374_v37, %v372_v39  ;;  %v2221_v55 = vadd.f32 %v1395_v46, %v403_v38 }
 0x12a   : > { %v432_v49 = vmul.f32 0.2, %v430_v44  ;;  %v431_v50 = vmul.f32 0.2, %v429_v45 }
 0x12b   : > { %v381_v54 = vsel %vm377_vm0, %v2213_v48, -inf  ;;  %v412_v6 = vsel %vm377_vm0, %v2221_v55, -inf }
 0x12c   : > { %v434_v57 = vmax.f32 %v430_v44, %v432_v49  ;;  %v433_v58 = vmax.f32 %v429_v45, %v431_v50  ;;  %v450_v59 = vpop.permute.xlu1 %449  ;;  %410 = vmax.xlane.f32.xlu0 %v409_v53  ;;  %382 = vmax.xlane.f32.xlu1 %v381_v54  ;;  %v454_v60 = vpop.permute.xlu0 %453  ;;  %v1403_v53 = vld [vmem:[%s2181_s25 + $0x58] sm:$0xff]  ;;  %v1405_v54 = vld [vmem:[%s2181_s25 + $0x68] sm:$0xff] }
 0x12d   : > { %v460_v62 = vadd.f32 %v459_v47, %v450_v59  ;;  %v461_v63 = vadd.f32 %v459_v47, %v454_v60  ;;  %v583_v59 = vrot.slane %v2195_v14, %v582_v51 }
 0x12e   : > { %v2226_v1 = vadd.f32 %v1396_v56, %v433_v58  ;;  %v2232_v7 = vadd.f32 %v1397_v61, %v434_v57 }
 0x12f   : > { %v462_v4 = vmul.f32 0.2, %v460_v62  ;;  %v463_v5 = vmul.f32 0.2, %v461_v63 }
 0x130   : > { %413 = vmax.xlane.f32.xlu0 %v412_v6  ;;  %v440_v8 = vsel %vm377_vm0, %v2226_v1, -inf  ;;  %v443_v19 = vsel %vm377_vm0, %v2232_v7, -inf }
 0x131   : > { %v464_v12 = vmax.f32 %v460_v62, %v462_v4  ;;  %v465_v13 = vmax.f32 %v461_v63, %v463_v5  ;;  %v481_v15 = vpop.permute.xlu1 %480  ;;  %441 = vmax.xlane.f32.xlu1 %v440_v8  ;;  %v512_v16 = vpop.permute.xlu0 %511  ;;  %v1404_v63 = vld [vmem:[%s2181_s25 + $0x60] sm:$0xff] }
 0x132   : > { %v491_v17 = vadd.f32 %v490_v0, %v481_v15  ;;  %v522_v18 = vadd.f32 %v521_v2, %v512_v16  ;;  %v1407_v16 = vld [vmem:[%s2181_s25 + $0x78] sm:$0xff] }
 0x133   : > { %v2240_v20 = vadd.f32 %v1398_v9, %v464_v12  ;;  %v2242_v21 = vadd.f32 %v1399_v10, %v465_v13  ;;  %v1406_v9 = vld [vmem:[%s2181_s25 + $0x70] sm:$0xff] }
 0x134   : > { %v493_v23 = vmul.f32 0.2, %v491_v17  ;;  %444 = vmax.xlane.f32.xlu0 %v443_v19  ;;  %v524_v24 = vmul.f32 0.2, %v522_v18 }
 0x135   : > { %v485_v25 = vpop.permute.xlu1 %484  ;;  %v471_v26 = vsel %vm377_vm0, %v2240_v20, -inf  ;;  %v474_v27 = vsel %vm377_vm0, %v2242_v21, -inf }
 0x136   : > { %v495_v30 = vmax.f32 %v491_v17, %v493_v23  ;;  %v492_v31 = vadd.f32 %v490_v0, %v485_v25  ;;  %v526_v32 = vmax.f32 %v522_v18, %v524_v24  ;;  %472 = vmax.xlane.f32.xlu1 %v471_v26  ;;  %v547_v33 = vpop.permute.xlu0 %546  ;;  %v637_v23 = vld [vmem:[#allocation2 + $0x4] sm:$0xf]  ;;  %v1921_v25 = vmov 0.0  }
 0x137   : > { %v554_v34 = vadd.f32 %v552_v22, %v547_v33  ;;  %v638_v24 = vld [vmem:[#allocation2 + $0x24] sm:$0xf]  ;;  %1463 = vmatprep.subr.bf16.mxu1 %v1921_v25  ;;  %1495 = vmatprep.subr.bf16.mxu0 %v1921_v25 }
 0x138   : > { %v494_v36 = vmul.f32 0.2, %v492_v31  ;;  %475 = vmax.xlane.f32.xlu0 %v474_v27  ;;  %v2251_v37 = vadd.f32 %v1400_v28, %v495_v30  ;;  %v2253_v38 = vadd.f32 %v1402_v29, %v526_v32  ;;  %v1408_v26 = vcombine.low %v637_v23, %v638_v24  ;;  %v922_v27 = vld [vmem:[#allocation2 + $0x10] sm:$0xf]  ;;  %v639_v30 = vld [vmem:[#allocation2 + $0x44] sm:$0xf]  ;;  %1467 = vmatprep.mubr.msk.bf16.mxu1 %vm1922_vm1, %v1921_v25 }
 0x139   : > { %v556_v39 = vmul.f32 0.2, %v554_v34  ;;  %v923_v28 = vld [vmem:[#allocation2 + $0x30] sm:$0xf]  ;;  %1499 = vmatprep.mubr.msk.bf16.mxu0 %vm1922_vm1, %v1921_v25 }
 0x13a   : > { %v496_v41 = vmax.f32 %v492_v31, %v494_v36  ;;  %v516_v42 = vpop.permute.xlu1 %515  ;;  %v502_v44 = vsel %vm377_vm0, %v2251_v37, -inf  ;;  %v533_v47 = vsel %vm377_vm0, %v2253_v38, -inf  ;;  %v1420_v29 = vcombine.low %v922_v27, %v923_v28  ;;  %1464 = vmatpush3.bf16.msra.mxu1 %v1408_v26  ;;  %v640_v31 = vld [vmem:[#allocation2 + $0x64] sm:$0xf]  ;;  %v924_v32 = vld [vmem:[#allocation2 + $0x50] sm:$0xf] }
 0x13b   : > { %v523_v45 = vadd.f32 %v521_v2, %v516_v42  ;;  %503 = vmax.xlane.f32.xlu1 %v502_v44  ;;  %v558_v50 = vmax.f32 %v554_v34, %v556_v39  ;;  %1465 = vmatprep.subr.bf16.mxu1 %v1921_v25  ;;  %v1409_v33 = vcombine.low %v639_v30, %v640_v31  ;;  %v925_v34 = vld [vmem:[#allocation2 + $0x70] sm:$0xf] }
 0x13c   : > { %v2258_v46 = vadd.f32 %v1401_v40, %v496_v41  ;;  %1496 = vmatpush3.bf16.msra.mxu0 %v1420_v29  ;;  %v1421_v36 = vcombine.low %v924_v32, %v925_v34 }
 0x13d   : > { %v525_v49 = vmul.f32 0.2, %v523_v45  ;;  %v2270_v61 = vadd.f32 %v1405_v54, %v558_v50  ;;  %1497 = vmatprep.subr.bf16.mxu0 %v1921_v25 }
 0x13e   : > { %v505_v52 = vsel %vm377_vm0, %v2258_v46, -inf  ;;  %1466 = vmatpush3.bf16.msra.mxu1 %v1409_v33 }
 0x13f   : > { %v527_v56 = vmax.f32 %v523_v45, %v525_v49  ;;  %v543_v57 = vpop.permute.xlu1 %542  ;;  %506 = vmax.xlane.f32.xlu0 %v505_v52  ;;  %534 = vmax.xlane.f32.xlu1 %v533_v47  ;;  %v567_v4 = vsel %vm377_vm0, %v2270_v61, -inf }
 0x140   : > { %v553_v58 = vadd.f32 %v552_v22, %v543_v57  ;;  %1498 = vmatpush3.bf16.msra.mxu0 %v1421_v36  ;;  %1471 = vmatprep.subr.bf16.mxu1 %v1921_v25 }
 0x141   : > { %v2268_v60 = vadd.f32 %v1403_v53, %v527_v56  ;;  %1503 = vmatprep.subr.bf16.mxu0 %v1921_v25 }
 0x142   : > { %v555_v62 = vmul.f32 0.2, %v553_v58 }
 0x143   : > { %v536_v11 = vsel %vm377_vm0, %v2268_v60, -inf }
 0x144   : > { %v557_v0 = vmax.f32 %v553_v58, %v555_v62  ;;  %v574_v2 = vpop.permute.xlu1 %573  ;;  %537 = vmax.xlane.f32.xlu0 %v536_v11 }
 0x145   : > { %v584_v3 = vadd.f32 %v583_v59, %v574_v2 }
 0x146   : > { %v2277_v5 = vadd.f32 %v1404_v63, %v557_v0 }
 0x147   : > { %v586_v14 = vmul.f32 0.2, %v584_v3 }
 0x148   : > { %v578_v6 = vpop.permute.xlu1 %577  ;;  %568 = vmax.xlane.f32.xlu0 %v567_v4  ;;  %v564_v8 = vsel %vm377_vm0, %v2277_v5, -inf }
 0x149   : > { %v588_v10 = vmax.f32 %v584_v3, %v586_v14  ;;  %v585_v12 = vadd.f32 %v583_v59, %v578_v6  ;;  %565 = vmax.xlane.f32.xlu1 %v564_v8 }
 0x14b   : > { %v587_v13 = vmul.f32 0.2, %v585_v12  ;;  %v2282_v15 = vadd.f32 %v1406_v9, %v588_v10 }
 0x14d   : > { %v589_v17 = vmax.f32 %v585_v12, %v587_v13  ;;  %v595_v18 = vsel %vm377_vm0, %v2282_v15, -inf }
 0x14e   : > { %596 = vmax.xlane.f32.xlu1 %v595_v18 }
 0x14f   : > { %v2287_v19 = vadd.f32 %v1407_v16, %v589_v17 }
 0x151   : > { %v598_v22 = vsel %vm377_vm0, %v2287_v19, -inf }
 0x152   : > { %599 = vmax.xlane.f32.xlu0 %v598_v22 }
 0x1b5   : > { %v380_v39 = vpop.xlane.xlu0 %379 }
 0x1b6   : > { %v384_v50 = vmax.f32 %v380_v39, 0.0 }
 0x1b9   : > { %v411_v40 = vpop.xlane.xlu0 %410  ;;  %v383_v41 = vpop.xlane.xlu1 %382 }
 0x1ba   : > { %v385_v53 = vmax.f32 %v383_v41, 0.0  ;;  %v415_v54 = vmax.f32 %v384_v50, %v411_v40  ;;  %v618_v41 = vld [vmem:[#allocation2] sm:$0xf] }
 0x1bd   : > { %v414_v42 = vpop.xlane.xlu0 %413 }
 0x1be   : > { %v442_v44 = vpop.xlane.xlu1 %441  ;;  %v416_v58 = vmax.f32 %v385_v53, %v414_v42 }
 0x1bf   : > { %v446_v56 = vmax.f32 %v415_v54, %v442_v44 }
 0x1c1   : > { %v445_v45 = vpop.xlane.xlu0 %444 }
 0x1c2   : > { %v447_v11 = vmax.f32 %v416_v58, %v445_v45  ;;  %v1000_v45 = vld [vmem:[#allocation2 + $0x34] sm:$0xf]  ;;  %v620_v58 = vld [vmem:[#allocation2 + $0x40] sm:$0xf] }
 0x1c3   : > { %v473_v47 = vpop.xlane.xlu1 %472 }
 0x1c4   : > { %v477_v59 = vmax.f32 %v446_v56, %v473_v47 }
 0x1c5   : > { %v476_v49 = vpop.xlane.xlu0 %475 }
 0x1c6   : > { %v478_v2 = vmax.f32 %v447_v11, %v476_v49  ;;  %v1002_v11 = vld [vmem:[#allocation2 + $0x74] sm:$0xf] }
 0x1c8   : > { %v504_v51 = vpop.xlane.xlu1 %503 }
 0x1c9   : > { %v508_v63 = vmax.f32 %v477_v59, %v504_v51  ;;  %v621_v59 = vld [vmem:[#allocation2 + $0x60] sm:$0xf] }
 0x1cc   : > { %v507_v52 = vpop.xlane.xlu0 %506  ;;  %v535_v57 = vpop.xlane.xlu1 %534 }
 0x1cd   : > { %v539_v3 = vmax.f32 %v508_v63, %v535_v57  ;;  %v509_v4 = vmax.f32 %v478_v2, %v507_v52 }
 0x1d1   : > { %v538_v62 = vpop.xlane.xlu0 %537 }
 0x1d2   : > { %v540_v8 = vmax.f32 %v509_v4, %v538_v62  ;;  %v1001_v62 = vld [vmem:[#allocation2 + $0x54] sm:$0xf] }
 0x1d5   : > { %v569_v14 = vpop.xlane.xlu0 %568 }
 0x1d6   : > { %v566_v0 = vpop.xlane.xlu1 %565  ;;  %v571_v12 = vmax.f32 %v540_v8, %v569_v14  ;;  %v1424_v8 = vcombine.low %v1001_v62, %v1002_v11 }
 0x1d7   : > { %v570_v6 = vmax.f32 %v539_v3, %v566_v0  ;;  %v1412_v3 = vcombine.low %v620_v58, %v621_v59 }
 0x1db   : > { %v597_v9 = vpop.xlane.xlu1 %596 }
 0x1dc   : > { %v2301_v10 = vmax.f32 %v570_v6, %v597_v9 }
 0x1de   : > { %v603_v13 = vsub.f32 %v2203_v35, %v2301_v10  ;;  %v622_v16 = vsub.f32 %v2209_v43, %v2301_v10  ;;  %v907_v17 = vsub.f32 %v2251_v37, %v2301_v10  ;;  %v753_v18 = vsub.f32 %v2226_v1, %v2301_v10 }
 0x1df   : > { %v600_v22 = vpop.xlane.xlu0 %599  ;;  %v830_v1 = vsub.f32 %v2240_v20, %v2301_v10  ;;  %v984_v34 = vsub.f32 %v2253_v38, %v2301_v10  ;;  %v1061_v38 = vsub.f32 %v2277_v5, %v2301_v10  ;;  %v1138_v0 = vsub.f32 %v2282_v15, %v2301_v10 }
 0x1e0   : > { %v2311_v23 = vmax.f32 %v571_v12, %v600_v22  ;;  %v605_v24 = vmul.f32 1.442695, %v603_v13  ;;  %v624_v26 = vmul.f32 1.442695, %v622_v16  ;;  %v909_v27 = vmul.f32 1.442695, %v907_v17 }
 0x1e1   : > { %v755_v28 = vmul.f32 1.442695, %v753_v18  ;;  %v986_v49 = vmul.f32 1.442695, %v984_v34  ;;  %v1063_v63 = vmul.f32 1.442695, %v1061_v38 }
 0x1e2   : > { %1667 = vpow2.f32 %v605_v24  ;;  %v604_v35 = vsub.f32 %v2213_v48, %v2311_v23  ;;  %v623_v43 = vsub.f32 %v2221_v55, %v2311_v23  ;;  %v908_v37 = vsub.f32 %v2258_v46, %v2311_v23  ;;  %v768_v16 = vld [vmem:[#allocation2 + $0x8] sm:$0xf]  ;;  %v1076_v22 = vld [vmem:[#allocation2 + $0x18] sm:$0xf] }
 0x1e3   : > { %1669 = vpow2.f32 %v624_v26  ;;  %v754_v32 = vsub.f32 %v2232_v7, %v2311_v23  ;;  %v832_v48 = vmul.f32 1.442695, %v830_v1  ;;  %v831_v46 = vsub.f32 %v2242_v21, %v2311_v23  ;;  %v619_v21 = vld [vmem:[#allocation2 + $0x20] sm:$0xf]  ;;  %v769_v17 = vld [vmem:[#allocation2 + $0x28] sm:$0xf] }
 0x1e4   : > { %v607_v29 = vmul.f32 1.442695, %v604_v35  ;;  %v626_v30 = vmul.f32 1.442695, %v623_v43  ;;  %1671 = vpow2.f32 %v909_v27  ;;  %v911_v31 = vmul.f32 1.442695, %v908_v37 }
 0x1e5   : > { %1673 = vpow2.f32 %v755_v28  ;;  %v757_v55 = vmul.f32 1.442695, %v754_v32  ;;  %v985_v33 = vsub.f32 %v2268_v60, %v2311_v23  ;;  %v834_v39 = vmul.f32 1.442695, %v831_v46  ;;  %v999_v60 = vld [vmem:[#allocation2 + $0x14] sm:$0xf] }
 0x1e6   : > { %1675 = vpow2.f32 %v607_v29  ;;  %v1411_v53 = vcombine.low %v618_v41, %v619_v21  ;;  %v1423_v57 = vcombine.low %v999_v60, %v1000_v45  ;;  %v1062_v4 = vsub.f32 %v2270_v61, %v2311_v23  ;;  %v1077_v24 = vld [vmem:[#allocation2 + $0x38] sm:$0xf]  ;;  %v770_v1 = vld [vmem:[#allocation2 + $0x48] sm:$0xf]  ;;  %v1153_v21 = vld [vmem:[#allocation2 + $0x1c] sm:$0xf] }
 0x1e7   : > { %1677 = vpow2.f32 %v626_v30  ;;  %v988_v42 = vmul.f32 1.442695, %v985_v33  ;;  %v1140_v15 = vmul.f32 1.442695, %v1138_v0  ;;  %v1139_v12 = vsub.f32 %v2287_v19, %v2311_v23  ;;  %v771_v29 = vld [vmem:[#allocation2 + $0x68] sm:$0xf] }
 0x1e8   : > { %1679 = vpow2.f32 %v911_v31  ;;  %v1065_v10 = vmul.f32 1.442695, %v1062_v4  ;;  %v1414_v23 = vcombine.low %v768_v16, %v769_v17  ;;  %v1426_v37 = vcombine.low %v1076_v22, %v1077_v24  ;;  %v1078_v31 = vld [vmem:[#allocation2 + $0x58] sm:$0xf] }
 0x1e9   : > { %1681 = vpow2.f32 %v832_v48  ;;  %v1142_v27 = vmul.f32 1.442695, %v1139_v12  ;;  %v1079_v32 = vld [vmem:[#allocation2 + $0x78] sm:$0xf] }
 0x1ea   : > { %1683 = vpow2.f32 %v757_v55  ;;  %v1415_v55 = vcombine.low %v770_v1, %v771_v29 }
 0x1eb   : > { %1685 = vpow2.f32 %v834_v39  ;;  %v845_v39 = vld [vmem:[#allocation2 + $0xc] sm:$0xf] }
 0x1ec   : > { %v2327_v20 = vpop.eup %1667  ;;  %1687 = vpow2.f32 %v988_v42  ;;  %v1154_v42 = vld [vmem:[#allocation2 + $0x3c] sm:$0xf] }
 0x1ed   : > { %v1670_v36 = vpop.eup %1669  ;;  %v609_v7 = vsel %vm377_vm0, %v2327_v20, 0.0  ;;  %1689 = vpow2.f32 %v986_v49  ;;  %v1429_v38 = vcombine.low %v1153_v21, %v1154_v42 }
 0x1ee   : > { %v2333_v40 = vpop.eup %1671  ;;  %610 = vadd.xlane.f32.xlu1 %v609_v7  ;;  %v628_v51 = vsel %vm377_vm0, %v1670_v36, 0.0  ;;  %1691 = vpow2.f32 %v1063_v63 }
 0x1ef   : > { %v2335_v44 = vpop.eup %1673  ;;  %1693 = vpow2.f32 %v1140_v15  ;;  %v913_v19 = vsel %vm377_vm0, %v2333_v40, 0.0 }
 0x1f0   : > { %v2337_v47 = vpop.eup %1675  ;;  %v759_v2 = vsel %vm377_vm0, %v2335_v44, 0.0  ;;  %1695 = vpow2.f32 %v1065_v10 }
 0x1f1   : > { %v1678_v50 = vpop.eup %1677  ;;  %v612_v52 = vsel %vm377_vm0, %v2337_v47, 0.0  ;;  %v617_v43 = vpack.c.bf16 %v2337_v47, %v2327_v20  ;;  %1697 = vpow2.f32 %v1142_v27  ;;  %v1427_v20 = vcombine.low %v1078_v31, %v1079_v32 }
 0x1f2   : > { %v2344_v54 = vpop.eup %1679  ;;  %629 = vadd.xlane.f32.xlu1 %v628_v51  ;;  %613 = vadd.xlane.f32.xlu0 %v612_v52  ;;  %v636_v56 = vpack.c.bf16 %v1678_v50, %v1670_v36  ;;  %v631_v6 = vsel %vm377_vm0, %v1678_v50, 0.0  ;;  %v847_v50 = vld [vmem:[#allocation2 + $0x4c] sm:$0xf] }
 0x1f3   : > { %v921_v5 = vpack.c.bf16 %v2344_v54, %v2333_v40  ;;  %v2356_v14 = vpop.eup %1681  ;;  %v916_v33 = vsel %vm377_vm0, %v2344_v54, 0.0  ;;  %v846_v40 = vld [vmem:[#allocation2 + $0x2c] sm:$0xf]  ;;  %v1155_v54 = vld [vmem:[#allocation2 + $0x5c] sm:$0xf] }
 0x1f4   : > { %1468 = vmatmul.mubr.msk.bf16.vlgmr.msra.gmra.mrb[0].mxu1 %vm377_vm0, %v636_v56  ;;  %v2359_v9 = vpop.eup %1683  ;;  %v836_v61 = vsel %vm377_vm0, %v2356_v14, 0.0  ;;  %v1417_v45 = vcombine.low %v845_v39, %v846_v40  ;;  %v848_v51 = vld [vmem:[#allocation2 + $0x6c] sm:$0xf]  ;;  %v1156_v56 = vld [vmem:[#allocation2 + $0x7c] sm:$0xf] }
 0x1f5   : > { %1472 = vmatpush3.bf16.msra.mxu1 %v1411_v53  ;;  %1500 = vmatmul.mubr.msk.bf16.vlgmr.msra.gmra.mrb[0].mxu0 %vm377_vm0, %v921_v5  ;;  %v762_v13 = vsel %vm377_vm0, %v2359_v9, 0.0  ;;  %v2373_v18 = vpop.eup %1685  ;;  %v767_v49 = vpack.c.bf16 %v2359_v9, %v2335_v44  ;;  %v1430_v44 = vcombine.low %v1155_v54, %v1156_v56 }
 0x1f6   : > { %1504 = vmatpush3.bf16.msra.mxu0 %v1423_v57  ;;  %760 = vadd.xlane.f32.xlu1 %v759_v2  ;;  %v1688_v26 = vpop.eup %1687  ;;  %v839_v35 = vsel %vm377_vm0, %v2373_v18, 0.0  ;;  %v1418_v57 = vcombine.low %v847_v50, %v848_v51  ;;  %v844_v59 = vpack.c.bf16 %v2373_v18, %v2356_v14 }
 0x1f7   : > { %632 = vadd.xlane.f32.xlu0 %v631_v6  ;;  %1473 = vmatprep.subr.bf16.mxu1 %v1921_v25  ;;  %v1690_v28 = vpop.eup %1689  ;;  %v993_v7 = vsel %vm377_vm0, %v1688_v26, 0.0 }
 0x1f8   : > { %1505 = vmatprep.subr.bf16.mxu0 %v1921_v25  ;;  %1475 = vmatprep.mubr.msk.bf16.mxu1 %vm1922_vm1, %v1921_v25  ;;  %v998_v30 = vpack.c.bf16 %v1688_v26, %v1690_v28  ;;  %v990_v48 = vsel %vm377_vm0, %v1690_v28, 0.0  ;;  %v1692_v46 = vpop.eup %1691 }
 0x1f9   : > { %1474 = vmatpush3.bf16.msra.mxu1 %v1412_v3  ;;  %1507 = vmatprep.mubr.msk.bf16.mxu0 %vm1922_vm1, %v1921_v25  ;;  %v1067_v34 = vsel %vm377_vm0, %v1692_v46, 0.0  ;;  %v1694_v36 = vpop.eup %1693 }
 0x1fa   : > { %1506 = vmatpush3.bf16.msra.mxu0 %v1424_v8  ;;  %837 = vadd.xlane.f32.xlu1 %v836_v61  ;;  %v1696_v41 = vpop.eup %1695  ;;  %v1144_v60 = vsel %vm377_vm0, %v1694_v36, 0.0 }
 0x1fb   : > { %763 = vadd.xlane.f32.xlu0 %v762_v13  ;;  %1479 = vmatprep.subr.bf16.mxu1 %v1921_v25  ;;  %v1070_v47 = vsel %vm377_vm0, %v1696_v41, 0.0  ;;  %v1698_v52 = vpop.eup %1697  ;;  %v1075_v53 = vpack.c.bf16 %v1696_v41, %v1692_v46 }
 0x1fc   : > { %1511 = vmatprep.subr.bf16.mxu0 %v1921_v25  ;;  %v1147_v58 = vsel %vm377_vm0, %v1698_v52, 0.0  ;;  %v1152_v5 = vpack.c.bf16 %v1698_v52, %v1694_v36 }
 0x1fe   : > { %914 = vadd.xlane.f32.xlu1 %v913_v19 }
 0x1ff   : > { %840 = vadd.xlane.f32.xlu0 %v839_v35 }
 0x200   : > { %1476 = vmatmul.mubr.msk.bf16.vlgmr.msra.gmra.mrb[0].mxu1 %vm377_vm0, %v617_v43 }
 0x201   : > { %1480 = vmatpush3.bf16.msra.mxu1 %v1414_v23  ;;  %1508 = vmatmul.mubr.msk.bf16.vlgmr.msra.gmra.mrb[0].mxu0 %vm377_vm0, %v998_v30 }
 0x202   : > { %1512 = vmatpush3.bf16.msra.mxu0 %v1426_v37  ;;  %991 = vadd.xlane.f32.xlu1 %v990_v48 }
 0x203   : > { %917 = vadd.xlane.f32.xlu0 %v916_v33  ;;  %1481 = vmatprep.subr.bf16.mxu1 %v1921_v25 }
 0x204   : > { %1513 = vmatprep.subr.bf16.mxu0 %v1921_v25  ;;  %1483 = vmatprep.mubr.msk.bf16.mxu1 %vm1922_vm1, %v1921_v25 }
 0x205   : > { %1482 = vmatpush3.bf16.msra.mxu1 %v1415_v55  ;;  %1515 = vmatprep.mubr.msk.bf16.mxu0 %vm1922_vm1, %v1921_v25 }
 0x206   : > { %1514 = vmatpush3.bf16.msra.mxu0 %v1427_v20  ;;  %1068 = vadd.xlane.f32.xlu1 %v1067_v34  ;;  %v1432_v20 = vld [vmem:[#allocation10] ss:$0 sm:$0xff] }
 0x207   : > { %994 = vadd.xlane.f32.xlu0 %v993_v7  ;;  %1487 = vmatprep.subr.bf16.mxu1 %v1921_v25 }
 0x208   : > { %1519 = vmatprep.subr.bf16.mxu0 %v1921_v25 }
 0x20a   : > { %1145 = vadd.xlane.f32.xlu1 %v1144_v60 }
 0x20b   : > { %1071 = vadd.xlane.f32.xlu0 %v1070_v47 }
 0x20c   : > { %1484 = vmatmul.mubr.msk.bf16.vlgmr.msra.gmra.mrb[0].mxu1 %vm377_vm0, %v767_v49 }
 0x20d   : > { %1488 = vmatpush3.bf16.msra.mxu1 %v1417_v45  ;;  %1516 = vmatmul.mubr.msk.bf16.vlgmr.msra.gmra.mrb[0].mxu0 %vm377_vm0, %v1075_v53 }
 0x20e   : > { %1520 = vmatpush3.bf16.msra.mxu0 %v1429_v38  ;;  %1489 = vmatprep.subr.bf16.mxu1 %v1921_v25 }
 0x20f   : > { %1148 = vadd.xlane.f32.xlu0 %v1147_v58  ;;  %1521 = vmatprep.subr.bf16.mxu0 %v1921_v25 }
 0x210   : > { %1491 = vmatprep.mubr.msk.bf16.mxu1 %vm1922_vm1, %v1921_v25  ;;  %1523 = vmatprep.mubr.msk.bf16.mxu0 %vm1922_vm1, %v1921_v25 }
 0x211   : > { %1490 = vmatpush3.bf16.msra.mxu1 %v1418_v57 }
 0x212   : > { %1522 = vmatpush3.bf16.msra.mxu0 %v1430_v44 }
 0x218   : > { %1492 = vmatmul.mubr.msk.bf16.vlgmr.msra.gmra.mrb[0].mxu1 %vm377_vm0, %v844_v59 }
 0x219   : > { %1524 = vmatmul.mubr.msk.bf16.vlgmr.msra.gmra.mrb[0].mxu0 %vm377_vm0, %v1152_v5 }
 0x27b   : > { %v611_v62 = vpop.xlane.xlu1 %610 }
 0x27f   : > { %v614_v11 = vpop.xlane.xlu0 %613  ;;  %v630_v63 = vpop.xlane.xlu1 %629 }
 0x280   : > { %v634_v61 = vadd.f32 %v630_v63, %v611_v62 }
 0x283   : > { %v761_v2 = vpop.xlane.xlu1 %760 }
 0x284   : > { %v633_v0 = vpop.xlane.xlu0 %632  ;;  %v765_v10 = vadd.f32 %v761_v2, %v634_v61 }
 0x285   : > { %v635_v14 = vadd.f32 %v633_v0, %v614_v11 }
 0x287   : > { %v838_v4 = vpop.xlane.xlu1 %837 }
 0x288   : > { %v764_v3 = vpop.xlane.xlu0 %763  ;;  %v842_v13 = vadd.f32 %v838_v4, %v765_v10 }
 0x289   : > { %v766_v16 = vadd.f32 %v764_v3, %v635_v14 }
 0x28b   : > { %v915_v8 = vpop.xlane.xlu1 %914 }
 0x28c   : > { %v841_v6 = vpop.xlane.xlu0 %840  ;;  %v919_v18 = vadd.f32 %v915_v8, %v842_v13 }
 0x28d   : > { %v843_v22 = vadd.f32 %v841_v6, %v766_v16 }
 0x28f   : > { %v992_v9 = vpop.xlane.xlu1 %991 }
 0x290   : > { %v918_v25 = vpop.xlane.xlu0 %917  ;;  %v996_v24 = vadd.f32 %v992_v9, %v919_v18 }
 0x291   : > { %v920_v26 = vadd.f32 %v918_v25, %v843_v22 }
 0x293   : > { %v1069_v12 = vpop.xlane.xlu1 %1068 }
 0x294   : > { %v995_v15 = vpop.xlane.xlu0 %994  ;;  %v1073_v23 = vadd.f32 %v1069_v12, %v996_v24 }
 0x295   : > { %v997_v27 = vadd.f32 %v995_v15, %v920_v26 }
 0x297   : > { %v1146_v19 = vpop.xlane.xlu1 %1145 }
 0x298   : > { %v1072_v17 = vpop.xlane.xlu0 %1071  ;;  %v1150_v35 = vadd.f32 %v1146_v19, %v1073_v23 }
 0x299   : > { %v1074_v43 = vadd.f32 %v1072_v17, %v997_v27 }
 0x29a   : > { %vm1215_vm2 = vcmp.gt.f32.partialorder %v1150_v35, 0.0 }
 0x29b   : > { %v1217_v1 = vsel %vm1215_vm2, %v1150_v35, 1.0 }
 0x29c   : > { %v1149_v28 = vpop.xlane.xlu0 %1148  ;;  %1699 = vrcp.f32 %v1217_v1 }
 0x29d   : > { %v1151_v37 = vadd.f32 %v1149_v28, %v1074_v43 }
 0x29f   : > { %vm1216_vm3 = vcmp.gt.f32.partialorder %v1151_v37, 0.0 }
 0x2a0   : > { %v1218_v29 = vsel %vm1216_vm3, %v1151_v37, 1.0 }
 0x2a1   : > { %1701 = vrcp.f32 %v1218_v29 }
 0x2a6   : > { %v1700_v33 = vpop.eup %1699 }
 0x2ab   : > { %v1702_v41 = vpop.eup %1701 }
 0x2eb   : > { %v898_v30 = vpop.f32.mrb[0].mxu1 }
 0x2ec   : > { %v1206_v31 = vpop.f32.mrb[0].mxu0  ;;  %v1493_v32 = vpop.f32.mrb[1].mxu1 }
 0x2ed   : > { %v1527_v48 = vadd.f32 %v1206_v31, %v898_v30  ;;  %v1525_v55 = vpop.f32.mrb[1].mxu0  ;;  %v901_v46 = vpop.f32.mrb[2].mxu1 }
 0x2ee   : > { %v1209_v34 = vpop.f32.mrb[2].mxu0  ;;  %v1494_v36 = vpop.f32.mrb[3].mxu1 }
 0x2ef   : > { %v1221_v7 = vmul.f32 %v1700_v33, %v1527_v48  ;;  %v1528_v39 = vadd.f32 %v1209_v34, %v901_v46  ;;  %v1526_v40 = vpop.f32.mrb[3].mxu0 }
 0x2f1   : > { %v1230_v21 = vadd.f32 %v1432_v20, %v1221_v7  ;;  %v1222_v42 = vmul.f32 %v1702_v41, %v1528_v39 }
 0x2f3   : > { %v1231_v60 = vadd.f32 %v1432_v20, %v1222_v42  ;;  %v1232_v45 = vmax.f32 %v1230_v21, 0.0 }
 0x2f5   : > { %v1233_v47 = vmax.f32 %v1231_v60, 0.0 }
 0x2f7   : > { %v1234_v49 = vpack.c.bf16 %v1233_v47, %v1232_v45 }
 0x2f9   : > { %1235 = vst [vmem:[%s346_s12] sm:$0xff] %v1234_v49 }
 0x2fa   : > { %1828 = shalt.err (!%p1825_p0)
}
 0x2fb   : > { %s1829_s17 = scalar_lea.hbm %s2420_s9, 128  ;;  %s1833_s10 = scalar_lea.hbm %s2469_s5, 256 }
 0x2fc   : > { %p1830_p3 = scmp.ne.s32.totalorder %s2420_s9, %s1829_s17  ;;  %p1834_p9 = scmp.lt.u32.totalorder %s2420_s9, %s2469_s5 }
 0x2fd   : > { %p1835_p10 = scmp.lt.u32.totalorder %s1833_s10, %s1829_s17  ;;  %p1837_p6 = scmp.lt.u32.totalorder %s1829_s17, %s2420_s9 }
 0x2fe   : > { %p1831_p7 = pnand %p1830_p3, %p2495_p2 }
 0x2ff   : > { %p1836_p1 = por %p1835_p10, %p1834_p9 }
 0x300   : > { %p1832_p8 = pneg %p1831_p7 }
 0x301   : > { %p1838_p11 = por %p1837_p6, %p1836_p1 }
 0x303   : > { %p1839_p12 = pnand %p1838_p11, %p1832_p8 }
 0x305   : > { %1842 = shalt.err (!%p1839_p12)
}
 0x306   : > { %1576 = dma.vmem_to_hbm [thread:$0]  (%p2495_p2), %s2422_s11, 128, %s2420_s9, %s1237_s24  }
 0x307 PF: > { %s1262_s25 = sand.u32 1, %s1885_s18   ;;  %p2496_p5 = scmp.ne.s32.totalorder %s2482_s6, 0 }
 0x308   : > { %s1263_s29 = scalar_lea.sflag [#allocation4], %s1262_s25 }
 0x309   : > { %p1589_p13 = pnand %p1378_p4, %p2496_p5 }
 0x30b   : > { %1880 = dma.done.wait (!%p1589_p13), %s1263_s29, 128  }
 0x30c   : > { %1882 = vsyncadd (!%p1589_p13), %s1263_s29, 4294967168  ;;  %s2497_s21 = sld [smem:[#allocation21_spill]]  ;;  %s2498_s26 = sld [smem:[#allocation22_spill]] }
 0x30d   : > { %s2499_s18 = smov %s1889_s19  ;;  %s2500_s19 = smov %s1893_s20 }
 0x312   : > { %p22_p0 = scmp.ge.s32.totalorder %s2497_s21, 4   ;;  %s2501_s20 = smov %s2498_s26 }
 0x314   :  { %24 = sbr.rel (!%p22_p0) target bundleno = 8 (0x8), region = 123 }
 0x31b   :  { %1268 = vsyncpa [#allocation3], 1 }
 0x31c   :  { %1270 = vsyncpa [#allocation3 + $0x1], 1 }
 0x31d   :  { %1271 = vsyncpa [#allocation6], 1 }
 0x31e   :  { %1273 = vsyncpa [#allocation6 + $0x1], 1 }
 0x31f   :  { %1274 = vsyncpa [#allocation9], 1 }
 0x320   :  { %1276 = vsyncpa [#allocation9 + $0x1], 1 }
 0x321   :  { %1277 = vsyncpa [#allocation4], 1 }
 0x322   :  { %1279 = vsyncpa [#allocation4 + $0x1], 1 }

// kernel: rgat_forward.3
= control target key start
LH: loop header
LB: loop body
LE: loop exit
PB: predicated region body
PF: predicated region fallthrough
CT: control target
= control target key end

     0   :  { %10 = vsyncpa [#allocation3], 0  ;;  %s2477_s0 = inlined_call_operand.hbm [shape: bf16[32,1024], index: 0, kind: input, shape index: {}]   ;;  %s2478_s1 = inlined_call_operand.hbm [shape: f32[32,8], index: 1, kind: input, shape index: {}]   ;;  %s2479_s2 = inlined_call_operand.hbm [shape: f32[8,32], index: 2, kind: input, shape index: {}]   ;;  %s2480_s3 = inlined_call_operand.hbm [shape: f32[8,32,32], index: 3, kind: input, shape index: {}]   ;;  %s2481_s4 = inlined_call_operand.hbm [shape: f32[1,128], index: 4, kind: input, shape index: {}]   ;;  %s2482_s5 = inlined_call_operand.hbm [shape: f32[32,128], index: 5, kind: output, shape index: {}]  }
   0x1   :  { %11 = vsyncpa [#allocation6], 0 }
   0x2   :  { %13 = vsyncpa [#allocation6 + $0x1], 0 }
   0x3   :  { %14 = vsyncpa [#allocation9], 0 }
   0x4   :  { %16 = vsyncpa [#allocation9 + $0x1], 0 }
   0x5   :  { %17 = vsyncpa [#allocation4], 0 }
   0x6   :  { %19 = vsyncpa [#allocation4 + $0x1], 0  ;;  %s1962_s18 = smov 0   ;;  %s1964_s19 = smov 0  }
   0x7   :  { %s1966_s20 = smov 0   ;;  %s1968_s21 = smov 0  }
   0x8 LB: > { %s1983_s22 = sadd.s32 4294967295, %s1903_s21   ;;  %s1375_s23 = sadd.s32 4294967294, %s1903_s21   ;;  %s1903_s21 = sphi %s1968_s21, %s2510_s21   ;;  %s1899_s20 = sphi %s1966_s20, %s2514_s20   ;;  %s1895_s19 = sphi %s1964_s19, %s2513_s19   ;;  %s1891_s18 = sphi %s1962_s18, %s2512_s18  }
   0x9   : > { %s1987_s24 = sadd.s32 1, %s1903_s21   ;;  %s53_s25 = sadd.s32 1, %s1899_s20 }
   0xa   : > { %2490 = sst [smem:[#allocation21_spill]] %s1987_s24  ;;  %s50_s26 = ssub.s32 %s1903_s21, %s1987_s24 }
   0xb   : > { %p60_p0 = scmp.ne.s32.totalorder %s1899_s20, %s1895_s19  ;;  %p51_p1 = scmp.eq.s32.totalorder %s50_s26, 0 }
   0xc   : > { %p61_p2 = scmp.eq.s32.totalorder %s1903_s21, 0  ;;  %p66_p3 = scmp.ne.s32.totalorder %s1895_s19, %s1891_s18 }
   0xd   : > { %p2483_p4 = scmp.eq.s32.totalorder %s1983_s22, 0  ;;  %p158_p7 = scmp.eq.s32.totalorder %s1983_s22, 1 }
   0xe   : > { %s1999_s27 = scalar_select %p51_p1, %s1899_s20, %s53_s25  }
   0xf   : > { %p2001_p5 = por %p61_p2, %p60_p0  ;;  %p2007_p6 = por %p2483_p4, %p66_p3 }
  0x10   : > { %2491 = sst [smem:[#allocation22_spill]] %s1999_s27  ;;  %p164_p8 = scmp.eq.s32.totalorder %s1375_s23, 1 }
  0x11   : > { %s2492_s28 = scalar_select %p2001_p5, 1, 0 }
  0x12   : > { %s2493_s29 = scalar_select %p2007_p6, 1, 0 }
  0x13   : > { %p1376_p9 = scmp.ge.s32.totalorder %s1903_s21, 1  ;;  %p171_p10 = scmp.lt.s32.totalorder %s1903_s21, 3 }
  0x14   : > { %p2014_p11 = por %p158_p7, %p60_p0  ;;  %p2018_p12 = por %p164_p8, %p66_p3 }
  0x15   : > { %p2022_p13 = pnand %p1376_p9, %p171_p10  ;;  %s1905_s8 = smov [#allocation2]  }
  0x16   : > { %s2494_s30 = scalar_select %p2014_p11, 1, 0 }
  0x17   : > { %s2495_s6 = scalar_select %p2018_p12, 1, 0 }
  0x18   : > { %s2496_s7 = scalar_select %p2022_p13, 1, 0 }
  0x19   : > { %p1582_p1 = pneg %p2022_p13  ;;  %s183_s9 = sshll.u32 %s1905_s8, 4  ;;  %s184_s9 = int_to_ptr.vmem [resolvable:$true] %s183_s9 }
  0x1a   : > { %s1906_s11 = smov [#allocation7]   ;;  %s1709_s15 = scalar_lea.hbm %s2477_s0, 2048 }
  0x1b   : > { %p2030_p2 = pnand %p1582_p1, %p2483_p4  ;;  %s197_s12 = sshll.u32 %s1906_s11, 4  ;;  %s2034_s12 = int_to_ptr.vmem [resolvable:$true] %s197_s12 }
  0x1c   : > { %p1710_p0 = scmp.ne.s32.totalorder %s2477_s0, %s1709_s15  ;;  %p1716_p9 = scmp.lt.u32.totalorder %s1709_s15, %s2477_s0 }
  0x1d   : > { %p2044_p3 = pneg %p2030_p2 }
  0x1f   : > { %p1712_p7 = pnand %p2044_p3, %p1710_p0 }
  0x21   : > { %p1713_p8 = pneg %p1712_p7 }
  0x23   : > { %p1718_p10 = pnand %p1716_p9, %p1713_p8 }
  0x25   : > { %1721 = shalt.err (!%p1718_p10)
}
  0x26   : > { %s1722_s8 = scalar_lea.vmem %s184_s9, 2048  ;;  %p1730_p11 = scmp.lt.s32.totalorder %s184_s9, %s184_s9 }
  0x27   : > { %p1723_p1 = scmp.ne.s32.totalorder %s184_s9, %s1722_s8  ;;  %p1731_p6 = scmp.lt.s32.totalorder %s1722_s8, %s1722_s8 }
  0x29   : > { %p1725_p4 = pnand %p1723_p1, %p2044_p3  ;;  %p1732_p13 = por %p1731_p6, %p1730_p11 }
  0x2b   : > { %p1726_p12 = pneg %p1725_p4 }
  0x2d   : > { %p1733_p5 = pnand %p1732_p13, %p1726_p12 }
  0x2f   : > { %1736 = shalt.err (!%p1733_p5)
}
  0x30   : > { %s1907_s11 = smov 512   ;;  %s1908_s13 = smov 32  }
  0x31   : > { %1585 = dma.hbm_to_vmem [thread:$0]  (!%p2030_p2), %s2477_s0, 2048, %s184_s9, [#allocation3], %s1907_s11, %s1907_s11, %s1908_s13  }
  0x32   : > { %s1737_s25 = scalar_lea.hbm %s2479_s2, 128 }
  0x33   : > { %p1738_p4 = scmp.ne.s32.totalorder %s2479_s2, %s1737_s25  ;;  %p1744_p11 = scmp.lt.u32.totalorder %s1737_s25, %s2479_s2 }
  0x35   : > { %p1740_p6 = pnand %p1738_p4, %p2044_p3 }
  0x37   : > { %p1741_p5 = pneg %p1740_p6 }
  0x39   : > { %p1746_p12 = pnand %p1744_p11, %p1741_p5 }
  0x3b   : > { %1749 = shalt.err (!%p1746_p12)
}
  0x3c   : > { %s1750_s9 = scalar_lea.vmem %s2034_s12, 128  ;;  %p1758_p8 = scmp.lt.s32.totalorder %s2034_s12, %s2034_s12 }
  0x3d   : > { %p1751_p13 = scmp.ne.s32.totalorder %s2034_s12, %s1750_s9  ;;  %p1759_p9 = scmp.lt.s32.totalorder %s1750_s9, %s1750_s9 }
  0x3f   : > { %p1753_p0 = pnand %p1751_p13, %p2044_p3  ;;  %p1760_p10 = por %p1759_p9, %p1758_p8 }
  0x41   : > { %p1754_p7 = pneg %p1753_p0 }
  0x43   : > { %p1761_p1 = pnand %p1760_p10, %p1754_p7 }
  0x45   : > { %1764 = shalt.err (!%p1761_p1)
}
  0x46   : > { %1588 = dma.hbm_to_vmem [thread:$0]  (!%p2030_p2), %s2479_s2, 128, %s2034_s12, [#allocation6]  }
  0x47   : > { %s1909_s11 = smov [#allocation10]   ;;  %s1765_s16 = scalar_lea.hbm %s2481_s4, 16 }
  0x48   : > { %s208_s13 = sshll.u32 %s1909_s11, 4  ;;  %p1766_p4 = scmp.ne.s32.totalorder %s2481_s4, %s1765_s16  ;;  %s209_s13 = int_to_ptr.vmem [resolvable:$true] %s208_s13 }
  0x49   : > { %p1772_p11 = scmp.lt.u32.totalorder %s1765_s16, %s2481_s4 }
  0x4a   : > { %p1768_p6 = pnand %p1766_p4, %p2044_p3 }
  0x4c   : > { %p1769_p5 = pneg %p1768_p6 }
  0x4e   : > { %p1774_p12 = pnand %p1772_p11, %p1769_p5 }
  0x50   : > { %1777 = shalt.err (!%p1774_p12)
}
  0x51   : > { %s1778_s12 = scalar_lea.vmem %s209_s13, 16  ;;  %s1785_s9 = scalar_lea.vmem %s209_s13, 32 }
  0x52   : > { %p1779_p13 = scmp.ne.s32.totalorder %s209_s13, %s1778_s12  ;;  %p1786_p8 = scmp.lt.s32.totalorder %s209_s13, %s209_s13 }
  0x53   : > { %p1787_p9 = scmp.lt.s32.totalorder %s1785_s9, %s1778_s12 }
  0x54   : > { %p1781_p0 = pnand %p1779_p13, %p2044_p3 }
  0x55   : > { %p1788_p10 = por %p1787_p9, %p1786_p8 }
  0x56   : > { %p1782_p7 = pneg %p1781_p0 }
  0x58   : > { %p1789_p1 = pnand %p1788_p10, %p1782_p7 }
  0x5a   : > { %1792 = shalt.err (!%p1789_p1)
}
  0x5b   : > { %1591 = dma.hbm_to_vmem [thread:$0]  (!%p2030_p2), %s2481_s4, 16, %s209_s13, [#allocation9]  }
  0x5c   : > { %p1380_p4 = scmp.ge.s32.totalorder %s1903_s21, 2 }
  0x5d   : > { %s219_s23 = sand.u32 (!%p1380_p4), 1, %s1903_s21   ;;  %s221_s11 = sand.u32 (!%p1380_p4), 1, %s1899_s20  }
  0x5e   : > { %215 = sbr.rel (%p1380_p4) target bundleno = 133 (0x85), region = 28  ;;  %s1381_s10 = sshll.u32 (!%p1380_p4), %s221_s11, 4 }
  0x5f   : > { %s1440_s14 = sshll.u32 (!%p1380_p4), %s1903_s21, 8  ;;  %s223_s17 = scalar_lea.vmem (!%p1380_p4), [#allocation5], %s1381_s10 }
  0x60   : > { %s2114_s16 = scalar_lea.hbm (!%p1380_p4), %s2478_s1, %s1440_s14  ;;  %s230_s25 = sshll.u32 (!%p1380_p4), %s223_s17, 4  ;;  %s2116_s25 = int_to_ptr.vmem [resolvable:$true] %s230_s25 }
  0x61   : > { %s2120_s26 = scalar_lea.sflag (!%p1380_p4), [#allocation6], %s219_s23  ;;  %s1793_s8 = scalar_lea.hbm (!%p1380_p4), %s2114_s16, 256 }
  0x62   : > { %p1794_p2 = scmp.ne.s32.totalorder (!%p1380_p4), %s2114_s16, %s1793_s8  ;;  %p2499_p3 = scmp.ne.s32.totalorder (!%p1380_p4), %s2492_s28, 0 }
  0x63   : > { %s1797_s24 = scalar_lea.hbm (!%p1380_p4), %s2478_s1, 512  ;;  %p1798_p11 = scmp.lt.u32.totalorder (!%p1380_p4), %s2114_s16, %s2478_s1 }
  0x64   : > { %p1795_p6 = pnand (!%p1380_p4), %p1794_p2, %p2499_p3  ;;  %p1799_p12 = scmp.lt.u32.totalorder (!%p1380_p4), %s1797_s24, %s1793_s8 }
  0x65   : > { %p1801_p0 = scmp.lt.u32.totalorder %s1793_s8, %s2114_s16 }
  0x66   : > { %p1796_p5 = pneg %p1795_p6  ;;  %p1800_p13 = por %p1799_p12, %p1798_p11 }
  0x68   : > { %p1802_p7 = por %p1801_p0, %p1800_p13 }
  0x6a   : > { %p1803_p8 = pnand %p1802_p7, %p1796_p5 }
  0x6c   : > { %1806 = shalt.err (!%p1803_p8)
}
  0x6d   : > { %s1807_s10 = scalar_lea.vmem %s2116_s25, 256  ;;  %s1910_s13 = smov [#allocation5]  }
  0x6e   : > { %p1808_p9 = scmp.ne.s32.totalorder %s2116_s25, %s1807_s10  ;;  %s1811_s17 = sshll.u32 %s1910_s13, 4  ;;  %s1812_s17 = int_to_ptr.vmem [resolvable:$false] %s1811_s17 }
  0x6f   : > { %s1813_s12 = scalar_lea.vmem %s1812_s17, 512  ;;  %p1814_p2 = scmp.lt.s32.totalorder %s2116_s25, %s1812_s17 }
  0x70   : > { %p1809_p10 = pnand %p1808_p9, %p2499_p3  ;;  %p1815_p6 = scmp.lt.s32.totalorder %s1813_s12, %s1807_s10 }
  0x72   : > { %p1810_p1 = pneg %p1809_p10  ;;  %p1816_p11 = por %p1815_p6, %p1814_p2 }
  0x74   : > { %p1817_p12 = pnand %p1816_p11, %p1810_p1 }
  0x76   : > { %1820 = shalt.err (!%p1817_p12)
}
  0x77   : > { %s1911_s8 = smov 128   ;;  %s1912_s9 = smov 8  }
  0x78   : > { %1563 = dma.hbm_to_vmem [thread:$0]  (%p2499_p3), %s2114_s16, 256, %s2116_s25, %s2120_s26, %s1911_s8, %s1911_s8, %s1912_s9  }
  0x79   : > { %s1384_s24 = sshll.u32 %s221_s11, 7  ;;  %s250_s10 = scalar_lea.hbm %s2480_s3, %s1440_s14 }
  0x7a   : > { %s1564_s13 = scalar_select %p2499_p3, [#allocation0], [#allocation14] }
  0x7b   : > { %s244_s17 = scalar_lea.vmem [#allocation8], %s1384_s24  ;;  %s1913_s26 = smov 512  }
  0x7c   : > { %s263_s16 = sshll.u32 %s244_s17, 4  ;;  %s255_s25 = sld [smem:[%s1564_s13]]   ;;  %s264_s16 = int_to_ptr.vmem [resolvable:$true] %s263_s16 }
  0x7d   : > { %1565 = sst [smem:[#allocation13]] (%p2499_p3), %s1913_s26  ;;  %s1914_s12 = smov 256  }
  0x7e   : > { %1566 = sst [smem:[#allocation13 + $0x1]] (%p2499_p3), %s1914_s12  ;;  %s1915_s11 = smov 2  }
  0x7f   : > { %1567 = sst [smem:[#allocation13 + $0x2]] (%p2499_p3), %s1915_s11  ;;  %s1916_s8 = smov 128  }
  0x80   : > { %1568 = sst [smem:[#allocation13 + $0x3]] (%p2499_p3), %s1916_s8  ;;  %s1917_s9 = smov 8  }
  0x81   : > { %1569 = sst [smem:[#allocation13 + $0x4]] (%p2499_p3), %s1916_s8  ;;  %s241_s27 = scalar_lea.sflag [#allocation9], %s219_s23 }
  0x82   : > { %s1387_s14 = sshll.u32 %s255_s25, 26  ;;  %1570 = sst [smem:[#allocation13 + $0x5]] (%p2499_p3), %s1917_s9 }
  0x83   : > { %s1388_s24 = sadd.s32 134217728, %s1387_s14  ;;  %s1918_s15 = smov [#allocation12]  }
  0x84   : > { %1571 = dma.general (%p2499_p3), %s250_s10, 2048, %s264_s16, %s241_s27, %s1918_s15, [#allocation13], %s1388_s24, 0  }
  0x85 PF: > { %p2500_p5 = scmp.ne.s32.totalorder %s2496_s7, 0 }
  0x86   : > { %p2501_p13 = scmp.eq.s32.totalorder (!%p2500_p5), %s1983_s22, 0 }
  0x87   : > { %288 = sbr.rel (%p2500_p5) target bundleno = 772 (0x304), region = 40 }
  0x8e   : > { %1866 = dma.done.wait (%p2501_p13), [#allocation3], 2048   ;;  %p2502_p0 = pmov %p2501_p13 }
  0x8f   : > { %s294_s13 = sand.u32 1, %s1983_s22   ;;  %s2177_s17 = sand.u32 1, %s1895_s19  }
  0x90   : > { %1868 = vsyncadd (%p2502_p0), [#allocation3], 4294965248  ;;  %s1391_s28 = sshll.u32 %s2177_s17, 4  ;;  %s295_s23 = scalar_lea.sflag [#allocation6], %s294_s13 }
  0x91   : > { %s298_s10 = scalar_lea.vmem [#allocation5], %s1391_s28  ;;  %p2503_p3 = scmp.ne.s32.totalorder %s2493_s29, 0 }
  0x93   : > { %1870 = dma.done.wait (%p2503_p3), %s295_s23, 256  }
  0x94   : > { %1872 = vsyncadd (%p2503_p3), %s295_s23, 4294967040  ;;  %p2504_p7 = pmov %p2502_p0 }
  0x95   : > { %p2505_p8 = pmov %p2502_p0 }
  0x96   : > { %1874 = dma.done.wait (%p2504_p7), [#allocation6], 128  }
  0x97   : > { %1876 = vsyncadd (%p2505_p8), [#allocation6], 4294967168  ;;  %s1393_s7 = sshll.u32 %s2177_s17, 7  ;;  %s308_s16 = scalar_lea.sflag [#allocation9], %s294_s13 }
  0x98   : > { %s2191_s25 = scalar_lea.vmem [#allocation8], %s1393_s7 }
  0x99   : > { %1878 = dma.done.wait (%p2503_p3), %s308_s16, 2048  }
  0x9a   : > { %1880 = vsyncadd (%p2503_p3), %s308_s16, 4294965248  ;;  %p2506_p9 = pmov %p2502_p0 }
  0x9b   : > { %p2507_p10 = pmov %p2502_p0 }
  0x9c   : > { %1882 = dma.done.wait (%p2506_p9), [#allocation9], 16  }
  0x9d   : > { %1884 = vsyncadd (%p2507_p10), [#allocation9], 4294967280  ;;  %v1919_v0 = vmov 1   ;;  %v1920_v1 = vmov 0   ;;  %v351_v2 = vld [vmem:[%s298_s10] sm:$0xff]  ;;  %v352_v3 = vld [vmem:[%s298_s10 + $0x8] sm:$0xff]  ;;  %v364_v10 = vlaneseq }
  0x9e   : > { %1661 = vset.pattern.permute.xlu1 %v1919_v0  ;;  %1660 = vset.pattern.permute.xlu0 %v1920_v1  ;;  %v1921_v4 = vmov 2   ;;  %v1922_v5 = vmov 3   ;;  %v1923_v6 = vmov 4   ;;  %v1924_v7 = vmov 5   ;;  %v2205_v14 = vld [vmem:[#allocation7] sm:$0xff]  ;;  %v374_v26 = vld [vmem:[%s2191_s25] sm:$0xff] }
  0x9f   : > { %388 = vperm.xlu1 %1661, %v351_v2   ;;  %356 = vperm.xlu0 %1660, %v351_v2   ;;  %v1925_v8 = vmov 6   ;;  %v1926_v9 = vmov 7   ;;  %v2201_v11 = vshrl.u32 %v364_v10, 7  ;;  %vm378_vm0 = vcmask 261120   ;;  %v1396_v32 = vld [vmem:[%s2191_s25 + $0x10] sm:$0xff]  ;;  %v375_v37 = vld [vmem:[%s2191_s25 + $0x8] sm:$0xff] }
  0xa0   : > { %v1397_v46 = vld [vmem:[%s2191_s25 + $0x18] sm:$0xff]  ;;  %v1398_v56 = vld [vmem:[%s2191_s25 + $0x20] sm:$0xff]  ;;  %v1399_v61 = vld [vmem:[%s2191_s25 + $0x28] sm:$0xff]  ;;  %vm1928_vm1 = vmmov 0   ;;  %s346_s29 = scalar_lea.vmem [#allocation11], %s1391_s28  ;;  %s1442_s12 = sshll.u32 %s1983_s22, 8 }
  0xa1   : > { %v397_v12 = vsub.s32 1, %v2201_v11  ;;  %v366_v13 = vsub.s32 0, %v2201_v11  ;;  %v428_v21 = vsub.s32 2, %v2201_v11  ;;  %v459_v36 = vsub.s32 3, %v2201_v11  ;;  %v1401_v10 = vld [vmem:[%s2191_s25 + $0x38] sm:$0xff]  ;;  %s1249_s26 = sshll.u32 %s346_s29, 4  ;;  %s2433_s14 = scalar_lea.hbm %s2482_s5, %s1442_s12  ;;  %s2428_s26 = int_to_ptr.vmem [resolvable:$true] %s1249_s26 }
  0xa2   : > { %v490_v51 = vsub.s32 4, %v2201_v11  ;;  %v521_v52 = vsub.s32 5, %v2201_v11  ;;  %s1236_s9 = scalar_lea.sflag [#allocation4], %s2177_s17  ;;  %s1821_s24 = scalar_lea.vmem %s2428_s26, 256 }
  0xa3   : > { %392 = vperm.xlu1 %1661, %v352_v3   ;;  %361 = vperm.xlu0 %1660, %v352_v3   ;;  %v398_v15 = vrot.slane %v2205_v14, %v397_v12  ;;  %v367_v16 = vrot.slane %v2205_v14, %v366_v13  ;;  %v429_v31 = vrot.slane %v2205_v14, %v428_v21  ;;  %p1822_p1 = scmp.ne.s32.totalorder %s2428_s26, %s1821_s24  ;;  %p2508_p2 = scmp.ne.s32.totalorder %s2494_s30, 0 }
  0xa4   : > { %v460_v47 = vrot.slane %v2205_v14, %v459_v36  ;;  %v491_v0 = vrot.slane %v2205_v14, %v490_v51  ;;  %v583_v51 = vsub.s32 7, %v2201_v11  ;;  %s1929_s22 = smov [#allocation11]  }
  0xa5   : > { %p1823_p6 = pnand %p1822_p1, %p2508_p2  ;;  %s1825_s27 = sshll.u32 %s1929_s22, 4  ;;  %s1826_s27 = int_to_ptr.vmem [resolvable:$false] %s1825_s27 }
  0xa6   : > { %s1827_s15 = scalar_lea.vmem %s1826_s27, 512  ;;  %p1828_p12 = scmp.lt.s32.totalorder %s2428_s26, %s1826_s27 }
  0xa7   : > { %1663 = vset.pattern.permute.xlu1 %v1921_v4  ;;  %1662 = vset.pattern.permute.xlu0 %v1921_v4  ;;  %p1824_p11 = pneg %p1823_p6  ;;  %p1829_p5 = scmp.lt.s32.totalorder %s1827_s15, %s1821_s24 }
  0xa8   : > { %423 = vperm.xlu1 %1663, %v352_v3   ;;  %419 = vperm.xlu0 %1662, %v351_v2  }
  0xa9   : > { %p1830_p13 = por %p1829_p5, %p1828_p12 }
  0xab   : > { %p1831_p0 = pnand %p1830_p13, %p1824_p11 }
  0xac   : > { %1664 = vset.pattern.permute.xlu1 %v1922_v5  ;;  %1665 = vset.pattern.permute.xlu0 %v1922_v5 }
  0xad   : > { %450 = vperm.xlu1 %1664, %v351_v2   ;;  %454 = vperm.xlu0 %1665, %v352_v3  }
  0xb1   : > { %1666 = vset.pattern.permute.xlu1 %v1923_v6  ;;  %1667 = vset.pattern.permute.xlu0 %v1924_v7 }
  0xb2   : > { %481 = vperm.xlu1 %1666, %v351_v2   ;;  %512 = vperm.xlu0 %1667, %v351_v2  }
  0xb6   : > { %485 = vperm.xlu1 %1666, %v352_v3   ;;  %1670 = vset.pattern.permute.xlu0 %v1925_v8 }
  0xb7   : > { %547 = vperm.xlu0 %1670, %v352_v3  }
  0xba   : > { %1668 = vset.pattern.permute.xlu1 %v1924_v7 }
  0xbb   : > { %516 = vperm.xlu1 %1668, %v352_v3   ;;  %1672 = vset.pattern.permute.xlu0 %v1926_v9 }
  0xbf   : > { %1669 = vset.pattern.permute.xlu1 %v1925_v8 }
  0xc0   : > { %543 = vperm.xlu1 %1669, %v351_v2  }
  0xc4   : > { %1671 = vset.pattern.permute.xlu1 %v1926_v9  ;;  %v1400_v9 = vld [vmem:[%s2191_s25 + $0x30] sm:$0xff] }
  0xc5   : > { %574 = vperm.xlu1 %1671, %v351_v2   ;;  %v522_v2 = vrot.slane %v2205_v14, %v521_v52 }
  0xc9   : > { %578 = vperm.xlu1 %1671, %v352_v3   ;;  %v552_v3 = vsub.s32 6, %v2201_v11 }
 0x11e   : > { %v389_v17 = vpop.permute.xlu1 %388  ;;  %v357_v18 = vpop.permute.xlu0 %356 }
 0x11f   : > { %v399_v19 = vadd.f32 %v398_v15, %v389_v17  ;;  %v368_v20 = vadd.f32 %v367_v16, %v357_v18 }
 0x121   : > { %v401_v22 = vmul.f32 0.2, %v399_v19  ;;  %v370_v23 = vmul.f32 0.2, %v368_v20 }
 0x122   : > { %v393_v24 = vpop.permute.xlu1 %392  ;;  %v362_v25 = vpop.permute.xlu0 %361 }
 0x123   : > { %v403_v27 = vmax.f32 %v399_v19, %v401_v22  ;;  %v372_v28 = vmax.f32 %v368_v20, %v370_v23  ;;  %v400_v29 = vadd.f32 %v398_v15, %v393_v24  ;;  %v369_v30 = vadd.f32 %v367_v16, %v362_v25 }
 0x124   : > { %v553_v22 = vrot.slane %v2205_v14, %v552_v3 }
 0x125   : > { %v402_v33 = vmul.f32 0.2, %v400_v29  ;;  %v371_v34 = vmul.f32 0.2, %v369_v30  ;;  %v2213_v35 = vadd.f32 %v374_v26, %v372_v28  ;;  %v2219_v43 = vadd.f32 %v1396_v32, %v403_v27  ;;  %v1402_v28 = vld [vmem:[%s2191_s25 + $0x40] sm:$0xff] }
 0x127   : > { %v404_v38 = vmax.f32 %v400_v29, %v402_v33  ;;  %v373_v39 = vmax.f32 %v369_v30, %v371_v34  ;;  %v424_v40 = vpop.permute.xlu1 %423  ;;  %v420_v41 = vpop.permute.xlu0 %419  ;;  %v379_v42 = vsel %vm378_vm0, %v2213_v35, -inf  ;;  %v410_v53 = vsel %vm378_vm0, %v2219_v43, -inf  ;;  %v1404_v29 = vld [vmem:[%s2191_s25 + $0x50] sm:$0xff] }
 0x128   : > { %v431_v44 = vadd.f32 %v429_v31, %v424_v40  ;;  %v430_v45 = vadd.f32 %v429_v31, %v420_v41  ;;  %380 = vmax.xlane.f32.xlu0 %v379_v42  ;;  %v1403_v40 = vld [vmem:[%s2191_s25 + $0x48] sm:$0xff] }
 0x129   : > { %v2223_v48 = vadd.f32 %v375_v37, %v373_v39  ;;  %v2231_v55 = vadd.f32 %v1397_v46, %v404_v38 }
 0x12a   : > { %v433_v49 = vmul.f32 0.2, %v431_v44  ;;  %v432_v50 = vmul.f32 0.2, %v430_v45 }
 0x12b   : > { %v382_v54 = vsel %vm378_vm0, %v2223_v48, -inf  ;;  %v413_v6 = vsel %vm378_vm0, %v2231_v55, -inf }
 0x12c   : > { %v435_v57 = vmax.f32 %v431_v44, %v433_v49  ;;  %v434_v58 = vmax.f32 %v430_v45, %v432_v50  ;;  %v451_v59 = vpop.permute.xlu1 %450  ;;  %411 = vmax.xlane.f32.xlu0 %v410_v53  ;;  %383 = vmax.xlane.f32.xlu1 %v382_v54  ;;  %v455_v60 = vpop.permute.xlu0 %454  ;;  %v1405_v53 = vld [vmem:[%s2191_s25 + $0x58] sm:$0xff]  ;;  %v1407_v54 = vld [vmem:[%s2191_s25 + $0x68] sm:$0xff] }
 0x12d   : > { %v461_v62 = vadd.f32 %v460_v47, %v451_v59  ;;  %v462_v63 = vadd.f32 %v460_v47, %v455_v60  ;;  %v584_v59 = vrot.slane %v2205_v14, %v583_v51 }
 0x12e   : > { %v2236_v1 = vadd.f32 %v1398_v56, %v434_v58  ;;  %v2242_v7 = vadd.f32 %v1399_v61, %v435_v57 }
 0x12f   : > { %v463_v4 = vmul.f32 0.2, %v461_v62  ;;  %v464_v5 = vmul.f32 0.2, %v462_v63 }
 0x130   : > { %414 = vmax.xlane.f32.xlu0 %v413_v6  ;;  %v441_v8 = vsel %vm378_vm0, %v2236_v1, -inf  ;;  %v444_v19 = vsel %vm378_vm0, %v2242_v7, -inf }
 0x131   : > { %v465_v12 = vmax.f32 %v461_v62, %v463_v4  ;;  %v466_v13 = vmax.f32 %v462_v63, %v464_v5  ;;  %v482_v15 = vpop.permute.xlu1 %481  ;;  %442 = vmax.xlane.f32.xlu1 %v441_v8  ;;  %v513_v16 = vpop.permute.xlu0 %512  ;;  %v1406_v63 = vld [vmem:[%s2191_s25 + $0x60] sm:$0xff] }
 0x132   : > { %v492_v17 = vadd.f32 %v491_v0, %v482_v15  ;;  %v523_v18 = vadd.f32 %v522_v2, %v513_v16  ;;  %v1409_v16 = vld [vmem:[%s2191_s25 + $0x78] sm:$0xff] }
 0x133   : > { %v2250_v20 = vadd.f32 %v1400_v9, %v465_v12  ;;  %v2252_v21 = vadd.f32 %v1401_v10, %v466_v13  ;;  %v1408_v9 = vld [vmem:[%s2191_s25 + $0x70] sm:$0xff] }
 0x134   : > { %v494_v23 = vmul.f32 0.2, %v492_v17  ;;  %445 = vmax.xlane.f32.xlu0 %v444_v19  ;;  %v525_v24 = vmul.f32 0.2, %v523_v18 }
 0x135   : > { %v486_v25 = vpop.permute.xlu1 %485  ;;  %v472_v26 = vsel %vm378_vm0, %v2250_v20, -inf  ;;  %v475_v27 = vsel %vm378_vm0, %v2252_v21, -inf }
 0x136   : > { %v496_v30 = vmax.f32 %v492_v17, %v494_v23  ;;  %v493_v31 = vadd.f32 %v491_v0, %v486_v25  ;;  %v527_v32 = vmax.f32 %v523_v18, %v525_v24  ;;  %473 = vmax.xlane.f32.xlu1 %v472_v26  ;;  %v548_v33 = vpop.permute.xlu0 %547  ;;  %v638_v23 = vld [vmem:[#allocation2 + $0x4] sm:$0xf]  ;;  %v1927_v25 = vmov 0.0  }
 0x137   : > { %v555_v34 = vadd.f32 %v553_v22, %v548_v33  ;;  %v639_v24 = vld [vmem:[#allocation2 + $0x24] sm:$0xf]  ;;  %1467 = vmatprep.subr.bf16.mxu1 %v1927_v25  ;;  %1499 = vmatprep.subr.bf16.mxu0 %v1927_v25 }
 0x138   : > { %v495_v36 = vmul.f32 0.2, %v493_v31  ;;  %476 = vmax.xlane.f32.xlu0 %v475_v27  ;;  %v2261_v37 = vadd.f32 %v1402_v28, %v496_v30  ;;  %v2263_v38 = vadd.f32 %v1404_v29, %v527_v32  ;;  %v1410_v26 = vcombine.low %v638_v23, %v639_v24  ;;  %v923_v27 = vld [vmem:[#allocation2 + $0x10] sm:$0xf]  ;;  %v640_v30 = vld [vmem:[#allocation2 + $0x44] sm:$0xf]  ;;  %1471 = vmatprep.mubr.msk.bf16.mxu1 %vm1928_vm1, %v1927_v25 }
 0x139   : > { %v557_v39 = vmul.f32 0.2, %v555_v34  ;;  %v924_v28 = vld [vmem:[#allocation2 + $0x30] sm:$0xf]  ;;  %1503 = vmatprep.mubr.msk.bf16.mxu0 %vm1928_vm1, %v1927_v25 }
 0x13a   : > { %v497_v41 = vmax.f32 %v493_v31, %v495_v36  ;;  %v517_v42 = vpop.permute.xlu1 %516  ;;  %v503_v44 = vsel %vm378_vm0, %v2261_v37, -inf  ;;  %v534_v47 = vsel %vm378_vm0, %v2263_v38, -inf  ;;  %v1422_v29 = vcombine.low %v923_v27, %v924_v28  ;;  %1468 = vmatpush3.bf16.msra.mxu1 %v1410_v26  ;;  %v641_v31 = vld [vmem:[#allocation2 + $0x64] sm:$0xf]  ;;  %v925_v32 = vld [vmem:[#allocation2 + $0x50] sm:$0xf] }
 0x13b   : > { %v524_v45 = vadd.f32 %v522_v2, %v517_v42  ;;  %504 = vmax.xlane.f32.xlu1 %v503_v44  ;;  %v559_v50 = vmax.f32 %v555_v34, %v557_v39  ;;  %1469 = vmatprep.subr.bf16.mxu1 %v1927_v25  ;;  %v1411_v33 = vcombine.low %v640_v30, %v641_v31  ;;  %v926_v34 = vld [vmem:[#allocation2 + $0x70] sm:$0xf] }
 0x13c   : > { %v2268_v46 = vadd.f32 %v1403_v40, %v497_v41  ;;  %1500 = vmatpush3.bf16.msra.mxu0 %v1422_v29  ;;  %v1423_v36 = vcombine.low %v925_v32, %v926_v34 }
 0x13d   : > { %v526_v49 = vmul.f32 0.2, %v524_v45  ;;  %v2280_v61 = vadd.f32 %v1407_v54, %v559_v50  ;;  %1501 = vmatprep.subr.bf16.mxu0 %v1927_v25 }
 0x13e   : > { %v506_v52 = vsel %vm378_vm0, %v2268_v46, -inf  ;;  %1470 = vmatpush3.bf16.msra.mxu1 %v1411_v33 }
 0x13f   : > { %v528_v56 = vmax.f32 %v524_v45, %v526_v49  ;;  %v544_v57 = vpop.permute.xlu1 %543  ;;  %507 = vmax.xlane.f32.xlu0 %v506_v52  ;;  %535 = vmax.xlane.f32.xlu1 %v534_v47  ;;  %v568_v4 = vsel %vm378_vm0, %v2280_v61, -inf }
 0x140   : > { %v554_v58 = vadd.f32 %v553_v22, %v544_v57  ;;  %1502 = vmatpush3.bf16.msra.mxu0 %v1423_v36  ;;  %1475 = vmatprep.subr.bf16.mxu1 %v1927_v25 }
 0x141   : > { %v2278_v60 = vadd.f32 %v1405_v53, %v528_v56  ;;  %1507 = vmatprep.subr.bf16.mxu0 %v1927_v25 }
 0x142   : > { %v556_v62 = vmul.f32 0.2, %v554_v58 }
 0x143   : > { %v537_v11 = vsel %vm378_vm0, %v2278_v60, -inf }
 0x144   : > { %v558_v0 = vmax.f32 %v554_v58, %v556_v62  ;;  %v575_v2 = vpop.permute.xlu1 %574  ;;  %538 = vmax.xlane.f32.xlu0 %v537_v11 }
 0x145   : > { %v585_v3 = vadd.f32 %v584_v59, %v575_v2 }
 0x146   : > { %v2287_v5 = vadd.f32 %v1406_v63, %v558_v0 }
 0x147   : > { %v587_v14 = vmul.f32 0.2, %v585_v3 }
 0x148   : > { %v579_v6 = vpop.permute.xlu1 %578  ;;  %569 = vmax.xlane.f32.xlu0 %v568_v4  ;;  %v565_v8 = vsel %vm378_vm0, %v2287_v5, -inf }
 0x149   : > { %v589_v10 = vmax.f32 %v585_v3, %v587_v14  ;;  %v586_v12 = vadd.f32 %v584_v59, %v579_v6  ;;  %566 = vmax.xlane.f32.xlu1 %v565_v8 }
 0x14b   : > { %v588_v13 = vmul.f32 0.2, %v586_v12  ;;  %v2292_v15 = vadd.f32 %v1408_v9, %v589_v10 }
 0x14d   : > { %v590_v17 = vmax.f32 %v586_v12, %v588_v13  ;;  %v596_v18 = vsel %vm378_vm0, %v2292_v15, -inf }
 0x14e   : > { %597 = vmax.xlane.f32.xlu1 %v596_v18 }
 0x14f   : > { %v2297_v19 = vadd.f32 %v1409_v16, %v590_v17 }
 0x151   : > { %v599_v22 = vsel %vm378_vm0, %v2297_v19, -inf }
 0x152   : > { %600 = vmax.xlane.f32.xlu0 %v599_v22 }
 0x1b5   : > { %v381_v39 = vpop.xlane.xlu0 %380 }
 0x1b6   : > { %v385_v50 = vmax.f32 %v381_v39, 0.0 }
 0x1b9   : > { %v412_v40 = vpop.xlane.xlu0 %411  ;;  %v384_v41 = vpop.xlane.xlu1 %383 }
 0x1ba   : > { %v386_v53 = vmax.f32 %v384_v41, 0.0  ;;  %v416_v54 = vmax.f32 %v385_v50, %v412_v40  ;;  %v619_v41 = vld [vmem:[#allocation2] sm:$0xf] }
 0x1bd   : > { %v415_v42 = vpop.xlane.xlu0 %414 }
 0x1be   : > { %v443_v44 = vpop.xlane.xlu1 %442  ;;  %v417_v58 = vmax.f32 %v386_v53, %v415_v42 }
 0x1bf   : > { %v447_v56 = vmax.f32 %v416_v54, %v443_v44 }
 0x1c1   : > { %v446_v45 = vpop.xlane.xlu0 %445 }
 0x1c2   : > { %v448_v11 = vmax.f32 %v417_v58, %v446_v45  ;;  %v1001_v45 = vld [vmem:[#allocation2 + $0x34] sm:$0xf]  ;;  %v621_v58 = vld [vmem:[#allocation2 + $0x40] sm:$0xf] }
 0x1c3   : > { %v474_v47 = vpop.xlane.xlu1 %473 }
 0x1c4   : > { %v478_v59 = vmax.f32 %v447_v56, %v474_v47 }
 0x1c5   : > { %v477_v49 = vpop.xlane.xlu0 %476 }
 0x1c6   : > { %v479_v2 = vmax.f32 %v448_v11, %v477_v49  ;;  %v1003_v11 = vld [vmem:[#allocation2 + $0x74] sm:$0xf] }
 0x1c8   : > { %v505_v51 = vpop.xlane.xlu1 %504 }
 0x1c9   : > { %v509_v63 = vmax.f32 %v478_v59, %v505_v51  ;;  %v622_v59 = vld [vmem:[#allocation2 + $0x60] sm:$0xf] }
 0x1cc   : > { %v508_v52 = vpop.xlane.xlu0 %507  ;;  %v536_v57 = vpop.xlane.xlu1 %535 }
 0x1cd   : > { %v540_v3 = vmax.f32 %v509_v63, %v536_v57  ;;  %v510_v4 = vmax.f32 %v479_v2, %v508_v52 }
 0x1d1   : > { %v539_v62 = vpop.xlane.xlu0 %538 }
 0x1d2   : > { %v541_v8 = vmax.f32 %v510_v4, %v539_v62  ;;  %v1002_v62 = vld [vmem:[#allocation2 + $0x54] sm:$0xf] }
 0x1d5   : > { %v570_v14 = vpop.xlane.xlu0 %569 }
 0x1d6   : > { %v567_v0 = vpop.xlane.xlu1 %566  ;;  %v572_v12 = vmax.f32 %v541_v8, %v570_v14  ;;  %v1426_v8 = vcombine.low %v1002_v62, %v1003_v11 }
 0x1d7   : > { %v571_v6 = vmax.f32 %v540_v3, %v567_v0  ;;  %v1414_v3 = vcombine.low %v621_v58, %v622_v59 }
 0x1db   : > { %v598_v9 = vpop.xlane.xlu1 %597 }
 0x1dc   : > { %v2311_v10 = vmax.f32 %v571_v6, %v598_v9 }
 0x1de   : > { %v604_v13 = vsub.f32 %v2213_v35, %v2311_v10  ;;  %v623_v16 = vsub.f32 %v2219_v43, %v2311_v10  ;;  %v908_v17 = vsub.f32 %v2261_v37, %v2311_v10  ;;  %v754_v18 = vsub.f32 %v2236_v1, %v2311_v10 }
 0x1df   : > { %v601_v22 = vpop.xlane.xlu0 %600  ;;  %v831_v1 = vsub.f32 %v2250_v20, %v2311_v10  ;;  %v985_v34 = vsub.f32 %v2263_v38, %v2311_v10  ;;  %v1062_v38 = vsub.f32 %v2287_v5, %v2311_v10  ;;  %v1139_v0 = vsub.f32 %v2292_v15, %v2311_v10 }
 0x1e0   : > { %v2321_v23 = vmax.f32 %v572_v12, %v601_v22  ;;  %v606_v24 = vmul.f32 1.442695, %v604_v13  ;;  %v625_v26 = vmul.f32 1.442695, %v623_v16  ;;  %v910_v27 = vmul.f32 1.442695, %v908_v17 }
 0x1e1   : > { %v756_v28 = vmul.f32 1.442695, %v754_v18  ;;  %v987_v49 = vmul.f32 1.442695, %v985_v34  ;;  %v1064_v63 = vmul.f32 1.442695, %v1062_v38 }
 0x1e2   : > { %1673 = vpow2.f32 %v606_v24  ;;  %v605_v35 = vsub.f32 %v2223_v48, %v2321_v23  ;;  %v624_v43 = vsub.f32 %v2231_v55, %v2321_v23  ;;  %v909_v37 = vsub.f32 %v2268_v46, %v2321_v23  ;;  %v769_v16 = vld [vmem:[#allocation2 + $0x8] sm:$0xf]  ;;  %v1077_v22 = vld [vmem:[#allocation2 + $0x18] sm:$0xf] }
 0x1e3   : > { %1675 = vpow2.f32 %v625_v26  ;;  %v755_v32 = vsub.f32 %v2242_v7, %v2321_v23  ;;  %v833_v48 = vmul.f32 1.442695, %v831_v1  ;;  %v832_v46 = vsub.f32 %v2252_v21, %v2321_v23  ;;  %v620_v21 = vld [vmem:[#allocation2 + $0x20] sm:$0xf]  ;;  %v770_v17 = vld [vmem:[#allocation2 + $0x28] sm:$0xf] }
 0x1e4   : > { %v608_v29 = vmul.f32 1.442695, %v605_v35  ;;  %v627_v30 = vmul.f32 1.442695, %v624_v43  ;;  %1677 = vpow2.f32 %v910_v27  ;;  %v912_v31 = vmul.f32 1.442695, %v909_v37 }
 0x1e5   : > { %1679 = vpow2.f32 %v756_v28  ;;  %v758_v55 = vmul.f32 1.442695, %v755_v32  ;;  %v986_v33 = vsub.f32 %v2278_v60, %v2321_v23  ;;  %v835_v39 = vmul.f32 1.442695, %v832_v46  ;;  %v1000_v60 = vld [vmem:[#allocation2 + $0x14] sm:$0xf] }
 0x1e6   : > { %1681 = vpow2.f32 %v608_v29  ;;  %v1413_v53 = vcombine.low %v619_v41, %v620_v21  ;;  %v1425_v57 = vcombine.low %v1000_v60, %v1001_v45  ;;  %v1063_v4 = vsub.f32 %v2280_v61, %v2321_v23  ;;  %v1078_v24 = vld [vmem:[#allocation2 + $0x38] sm:$0xf]  ;;  %v771_v1 = vld [vmem:[#allocation2 + $0x48] sm:$0xf]  ;;  %v1154_v21 = vld [vmem:[#allocation2 + $0x1c] sm:$0xf] }
 0x1e7   : > { %1683 = vpow2.f32 %v627_v30  ;;  %v989_v42 = vmul.f32 1.442695, %v986_v33  ;;  %v1141_v15 = vmul.f32 1.442695, %v1139_v0  ;;  %v1140_v12 = vsub.f32 %v2297_v19, %v2321_v23  ;;  %v772_v29 = vld [vmem:[#allocation2 + $0x68] sm:$0xf] }
 0x1e8   : > { %1685 = vpow2.f32 %v912_v31  ;;  %v1066_v10 = vmul.f32 1.442695, %v1063_v4  ;;  %v1416_v23 = vcombine.low %v769_v16, %v770_v17  ;;  %v1428_v37 = vcombine.low %v1077_v22, %v1078_v24  ;;  %v1079_v31 = vld [vmem:[#allocation2 + $0x58] sm:$0xf] }
 0x1e9   : > { %1687 = vpow2.f32 %v833_v48  ;;  %v1143_v27 = vmul.f32 1.442695, %v1140_v12  ;;  %v1080_v32 = vld [vmem:[#allocation2 + $0x78] sm:$0xf] }
 0x1ea   : > { %1689 = vpow2.f32 %v758_v55  ;;  %v1417_v55 = vcombine.low %v771_v1, %v772_v29 }
 0x1eb   : > { %1691 = vpow2.f32 %v835_v39  ;;  %v846_v39 = vld [vmem:[#allocation2 + $0xc] sm:$0xf] }
 0x1ec   : > { %v2337_v20 = vpop.eup %1673  ;;  %1693 = vpow2.f32 %v989_v42  ;;  %v1155_v42 = vld [vmem:[#allocation2 + $0x3c] sm:$0xf] }
 0x1ed   : > { %v1676_v36 = vpop.eup %1675  ;;  %v610_v7 = vsel %vm378_vm0, %v2337_v20, 0.0  ;;  %1695 = vpow2.f32 %v987_v49  ;;  %v1431_v38 = vcombine.low %v1154_v21, %v1155_v42 }
 0x1ee   : > { %v2343_v40 = vpop.eup %1677  ;;  %611 = vadd.xlane.f32.xlu1 %v610_v7  ;;  %v629_v51 = vsel %vm378_vm0, %v1676_v36, 0.0  ;;  %1697 = vpow2.f32 %v1064_v63 }
 0x1ef   : > { %v2345_v44 = vpop.eup %1679  ;;  %1699 = vpow2.f32 %v1141_v15  ;;  %v914_v19 = vsel %vm378_vm0, %v2343_v40, 0.0 }
 0x1f0   : > { %v2347_v47 = vpop.eup %1681  ;;  %v760_v2 = vsel %vm378_vm0, %v2345_v44, 0.0  ;;  %1701 = vpow2.f32 %v1066_v10 }
 0x1f1   : > { %v1684_v50 = vpop.eup %1683  ;;  %v613_v52 = vsel %vm378_vm0, %v2347_v47, 0.0  ;;  %v618_v43 = vpack.c.bf16 %v2347_v47, %v2337_v20  ;;  %1703 = vpow2.f32 %v1143_v27  ;;  %v1429_v20 = vcombine.low %v1079_v31, %v1080_v32 }
 0x1f2   : > { %v2354_v54 = vpop.eup %1685  ;;  %630 = vadd.xlane.f32.xlu1 %v629_v51  ;;  %614 = vadd.xlane.f32.xlu0 %v613_v52  ;;  %v637_v56 = vpack.c.bf16 %v1684_v50, %v1676_v36  ;;  %v632_v6 = vsel %vm378_vm0, %v1684_v50, 0.0  ;;  %v848_v50 = vld [vmem:[#allocation2 + $0x4c] sm:$0xf] }
 0x1f3   : > { %v922_v5 = vpack.c.bf16 %v2354_v54, %v2343_v40  ;;  %v2366_v14 = vpop.eup %1687  ;;  %v917_v33 = vsel %vm378_vm0, %v2354_v54, 0.0  ;;  %v847_v40 = vld [vmem:[#allocation2 + $0x2c] sm:$0xf]  ;;  %v1156_v54 = vld [vmem:[#allocation2 + $0x5c] sm:$0xf] }
 0x1f4   : > { %1472 = vmatmul.mubr.msk.bf16.vlgmr.msra.gmra.mrb[0].mxu1 %vm378_vm0, %v637_v56  ;;  %v2369_v9 = vpop.eup %1689  ;;  %v837_v61 = vsel %vm378_vm0, %v2366_v14, 0.0  ;;  %v1419_v45 = vcombine.low %v846_v39, %v847_v40  ;;  %v849_v51 = vld [vmem:[#allocation2 + $0x6c] sm:$0xf]  ;;  %v1157_v56 = vld [vmem:[#allocation2 + $0x7c] sm:$0xf] }
 0x1f5   : > { %1476 = vmatpush3.bf16.msra.mxu1 %v1413_v53  ;;  %1504 = vmatmul.mubr.msk.bf16.vlgmr.msra.gmra.mrb[0].mxu0 %vm378_vm0, %v922_v5  ;;  %v763_v13 = vsel %vm378_vm0, %v2369_v9, 0.0  ;;  %v2383_v18 = vpop.eup %1691  ;;  %v768_v49 = vpack.c.bf16 %v2369_v9, %v2345_v44  ;;  %v1432_v44 = vcombine.low %v1156_v54, %v1157_v56 }
 0x1f6   : > { %1508 = vmatpush3.bf16.msra.mxu0 %v1425_v57  ;;  %761 = vadd.xlane.f32.xlu1 %v760_v2  ;;  %v1694_v26 = vpop.eup %1693  ;;  %v840_v35 = vsel %vm378_vm0, %v2383_v18, 0.0  ;;  %v1420_v57 = vcombine.low %v848_v50, %v849_v51  ;;  %v845_v59 = vpack.c.bf16 %v2383_v18, %v2366_v14 }
 0x1f7   : > { %633 = vadd.xlane.f32.xlu0 %v632_v6  ;;  %1477 = vmatprep.subr.bf16.mxu1 %v1927_v25  ;;  %v1696_v28 = vpop.eup %1695  ;;  %v994_v7 = vsel %vm378_vm0, %v1694_v26, 0.0 }
 0x1f8   : > { %1509 = vmatprep.subr.bf16.mxu0 %v1927_v25  ;;  %1479 = vmatprep.mubr.msk.bf16.mxu1 %vm1928_vm1, %v1927_v25  ;;  %v999_v30 = vpack.c.bf16 %v1694_v26, %v1696_v28  ;;  %v991_v48 = vsel %vm378_vm0, %v1696_v28, 0.0  ;;  %v1698_v46 = vpop.eup %1697 }
 0x1f9   : > { %1478 = vmatpush3.bf16.msra.mxu1 %v1414_v3  ;;  %1511 = vmatprep.mubr.msk.bf16.mxu0 %vm1928_vm1, %v1927_v25  ;;  %v1068_v34 = vsel %vm378_vm0, %v1698_v46, 0.0  ;;  %v1700_v36 = vpop.eup %1699 }
 0x1fa   : > { %1510 = vmatpush3.bf16.msra.mxu0 %v1426_v8  ;;  %838 = vadd.xlane.f32.xlu1 %v837_v61  ;;  %v1702_v41 = vpop.eup %1701  ;;  %v1145_v60 = vsel %vm378_vm0, %v1700_v36, 0.0 }
 0x1fb   : > { %764 = vadd.xlane.f32.xlu0 %v763_v13  ;;  %1483 = vmatprep.subr.bf16.mxu1 %v1927_v25  ;;  %v1071_v47 = vsel %vm378_vm0, %v1702_v41, 0.0  ;;  %v1704_v52 = vpop.eup %1703  ;;  %v1076_v53 = vpack.c.bf16 %v1702_v41, %v1698_v46 }
 0x1fc   : > { %1515 = vmatprep.subr.bf16.mxu0 %v1927_v25  ;;  %v1148_v58 = vsel %vm378_vm0, %v1704_v52, 0.0  ;;  %v1153_v5 = vpack.c.bf16 %v1704_v52, %v1700_v36 }
 0x1fe   : > { %915 = vadd.xlane.f32.xlu1 %v914_v19 }
 0x1ff   : > { %841 = vadd.xlane.f32.xlu0 %v840_v35 }
 0x200   : > { %1480 = vmatmul.mubr.msk.bf16.vlgmr.msra.gmra.mrb[0].mxu1 %vm378_vm0, %v618_v43 }
 0x201   : > { %1484 = vmatpush3.bf16.msra.mxu1 %v1416_v23  ;;  %1512 = vmatmul.mubr.msk.bf16.vlgmr.msra.gmra.mrb[0].mxu0 %vm378_vm0, %v999_v30 }
 0x202   : > { %1516 = vmatpush3.bf16.msra.mxu0 %v1428_v37  ;;  %992 = vadd.xlane.f32.xlu1 %v991_v48 }
 0x203   : > { %918 = vadd.xlane.f32.xlu0 %v917_v33  ;;  %1485 = vmatprep.subr.bf16.mxu1 %v1927_v25 }
 0x204   : > { %1517 = vmatprep.subr.bf16.mxu0 %v1927_v25  ;;  %1487 = vmatprep.mubr.msk.bf16.mxu1 %vm1928_vm1, %v1927_v25 }
 0x205   : > { %1486 = vmatpush3.bf16.msra.mxu1 %v1417_v55  ;;  %1519 = vmatprep.mubr.msk.bf16.mxu0 %vm1928_vm1, %v1927_v25 }
 0x206   : > { %1518 = vmatpush3.bf16.msra.mxu0 %v1429_v20  ;;  %1069 = vadd.xlane.f32.xlu1 %v1068_v34  ;;  %v1434_v20 = vld [vmem:[#allocation10] ss:$0 sm:$0xff] }
 0x207   : > { %995 = vadd.xlane.f32.xlu0 %v994_v7  ;;  %1491 = vmatprep.subr.bf16.mxu1 %v1927_v25 }
 0x208   : > { %1523 = vmatprep.subr.bf16.mxu0 %v1927_v25 }
 0x20a   : > { %1146 = vadd.xlane.f32.xlu1 %v1145_v60 }
 0x20b   : > { %1072 = vadd.xlane.f32.xlu0 %v1071_v47 }
 0x20c   : > { %1488 = vmatmul.mubr.msk.bf16.vlgmr.msra.gmra.mrb[0].mxu1 %vm378_vm0, %v768_v49 }
 0x20d   : > { %1492 = vmatpush3.bf16.msra.mxu1 %v1419_v45  ;;  %1520 = vmatmul.mubr.msk.bf16.vlgmr.msra.gmra.mrb[0].mxu0 %vm378_vm0, %v1076_v53 }
 0x20e   : > { %1524 = vmatpush3.bf16.msra.mxu0 %v1431_v38  ;;  %1493 = vmatprep.subr.bf16.mxu1 %v1927_v25 }
 0x20f   : > { %1149 = vadd.xlane.f32.xlu0 %v1148_v58  ;;  %1525 = vmatprep.subr.bf16.mxu0 %v1927_v25 }
 0x210   : > { %1495 = vmatprep.mubr.msk.bf16.mxu1 %vm1928_vm1, %v1927_v25  ;;  %1527 = vmatprep.mubr.msk.bf16.mxu0 %vm1928_vm1, %v1927_v25 }
 0x211   : > { %1494 = vmatpush3.bf16.msra.mxu1 %v1420_v57 }
 0x212   : > { %1526 = vmatpush3.bf16.msra.mxu0 %v1432_v44 }
 0x218   : > { %1496 = vmatmul.mubr.msk.bf16.vlgmr.msra.gmra.mrb[0].mxu1 %vm378_vm0, %v845_v59 }
 0x219   : > { %1528 = vmatmul.mubr.msk.bf16.vlgmr.msra.gmra.mrb[0].mxu0 %vm378_vm0, %v1153_v5 }
 0x27b   : > { %v612_v62 = vpop.xlane.xlu1 %611 }
 0x27f   : > { %v615_v11 = vpop.xlane.xlu0 %614  ;;  %v631_v63 = vpop.xlane.xlu1 %630 }
 0x280   : > { %v635_v61 = vadd.f32 %v631_v63, %v612_v62 }
 0x283   : > { %v762_v2 = vpop.xlane.xlu1 %761 }
 0x284   : > { %v634_v0 = vpop.xlane.xlu0 %633  ;;  %v766_v10 = vadd.f32 %v762_v2, %v635_v61 }
 0x285   : > { %v636_v14 = vadd.f32 %v634_v0, %v615_v11 }
 0x287   : > { %v839_v4 = vpop.xlane.xlu1 %838 }
 0x288   : > { %v765_v3 = vpop.xlane.xlu0 %764  ;;  %v843_v13 = vadd.f32 %v839_v4, %v766_v10 }
 0x289   : > { %v767_v16 = vadd.f32 %v765_v3, %v636_v14 }
 0x28b   : > { %v916_v8 = vpop.xlane.xlu1 %915 }
 0x28c   : > { %v842_v6 = vpop.xlane.xlu0 %841  ;;  %v920_v18 = vadd.f32 %v916_v8, %v843_v13 }
 0x28d   : > { %v844_v22 = vadd.f32 %v842_v6, %v767_v16 }
 0x28f   : > { %v993_v9 = vpop.xlane.xlu1 %992 }
 0x290   : > { %v919_v25 = vpop.xlane.xlu0 %918  ;;  %v997_v24 = vadd.f32 %v993_v9, %v920_v18 }
 0x291   : > { %v921_v26 = vadd.f32 %v919_v25, %v844_v22 }
 0x293   : > { %v1070_v12 = vpop.xlane.xlu1 %1069 }
 0x294   : > { %v996_v15 = vpop.xlane.xlu0 %995  ;;  %v1074_v23 = vadd.f32 %v1070_v12, %v997_v24 }
 0x295   : > { %v998_v27 = vadd.f32 %v996_v15, %v921_v26 }
 0x297   : > { %v1147_v19 = vpop.xlane.xlu1 %1146 }
 0x298   : > { %v1073_v17 = vpop.xlane.xlu0 %1072  ;;  %v1151_v35 = vadd.f32 %v1147_v19, %v1074_v23 }
 0x299   : > { %v1075_v43 = vadd.f32 %v1073_v17, %v998_v27 }
 0x29a   : > { %vm1216_vm2 = vcmp.gt.f32.partialorder %v1151_v35, 0.0 }
 0x29b   : > { %v1218_v1 = vsel %vm1216_vm2, %v1151_v35, 1.0 }
 0x29c   : > { %v1150_v28 = vpop.xlane.xlu0 %1149  ;;  %1705 = vrcp.f32 %v1218_v1 }
 0x29d   : > { %v1152_v37 = vadd.f32 %v1150_v28, %v1075_v43 }
 0x29f   : > { %vm1217_vm3 = vcmp.gt.f32.partialorder %v1152_v37, 0.0 }
 0x2a0   : > { %v1219_v29 = vsel %vm1217_vm3, %v1152_v37, 1.0 }
 0x2a1   : > { %1707 = vrcp.f32 %v1219_v29 }
 0x2a6   : > { %v1706_v33 = vpop.eup %1705 }
 0x2ab   : > { %v1708_v41 = vpop.eup %1707 }
 0x2eb   : > { %v899_v30 = vpop.f32.mrb[0].mxu1 }
 0x2ec   : > { %v1207_v31 = vpop.f32.mrb[0].mxu0  ;;  %v1497_v32 = vpop.f32.mrb[1].mxu1 }
 0x2ed   : > { %v1531_v48 = vadd.f32 %v1207_v31, %v899_v30  ;;  %v1529_v55 = vpop.f32.mrb[1].mxu0  ;;  %v902_v46 = vpop.f32.mrb[2].mxu1 }
 0x2ee   : > { %v1210_v34 = vpop.f32.mrb[2].mxu0  ;;  %v1498_v36 = vpop.f32.mrb[3].mxu1 }
 0x2ef   : > { %v1222_v7 = vmul.f32 %v1706_v33, %v1531_v48  ;;  %v1532_v39 = vadd.f32 %v1210_v34, %v902_v46  ;;  %v1530_v40 = vpop.f32.mrb[3].mxu0 }
 0x2f1   : > { %v1231_v21 = vadd.f32 %v1434_v20, %v1222_v7  ;;  %v1223_v42 = vmul.f32 %v1708_v41, %v1532_v39 }
 0x2f3   : > { %1233 = vst [vmem:[%s346_s29] sm:$0xff] %v1231_v21  ;;  %v1232_v60 = vadd.f32 %v1434_v20, %v1223_v42 }
 0x2f5   : > { %1234 = vst [vmem:[%s346_s29 + $0x8] sm:$0xff] %v1232_v60 }
 0x2f6   : > { %1834 = shalt.err (!%p1831_p0)
}
 0x2f7   : > { %s1835_s13 = scalar_lea.hbm %s2433_s14, 256  ;;  %s1839_s10 = scalar_lea.hbm %s2482_s5, 512 }
 0x2f8   : > { %p1836_p3 = scmp.ne.s32.totalorder %s2433_s14, %s1835_s13  ;;  %p1840_p9 = scmp.lt.u32.totalorder %s2433_s14, %s2482_s5 }
 0x2f9   : > { %p1841_p10 = scmp.lt.u32.totalorder %s1839_s10, %s1835_s13  ;;  %p1843_p6 = scmp.lt.u32.totalorder %s1835_s13, %s2433_s14 }
 0x2fa   : > { %p1837_p7 = pnand %p1836_p3, %p2508_p2 }
 0x2fb   : > { %p1842_p1 = por %p1841_p10, %p1840_p9 }
 0x2fc   : > { %p1838_p8 = pneg %p1837_p7 }
 0x2fd   : > { %p1844_p11 = por %p1843_p6, %p1842_p1 }
 0x2ff   : > { %p1845_p12 = pnand %p1844_p11, %p1838_p8 }
 0x301   : > { %1848 = shalt.err (!%p1845_p12)
}
 0x302   : > { %s1930_s25 = smov 128   ;;  %s1931_s29 = smov 8  }
 0x303   : > { %1580 = dma.vmem_to_hbm [thread:$0]  (%p2508_p2), %s2428_s26, 256, %s2433_s14, %s1236_s9, %s1930_s25, %s1930_s25, %s1931_s29  }
 0x304 PF: > { %s1264_s12 = sand.u32 1, %s1891_s18   ;;  %p2509_p5 = scmp.ne.s32.totalorder %s2495_s6, 0 }
 0x305   : > { %s1265_s11 = scalar_lea.sflag [#allocation4], %s1264_s12 }
 0x306   : > { %p1593_p13 = pnand %p1380_p4, %p2509_p5 }
 0x308   : > { %1886 = dma.done.wait (!%p1593_p13), %s1265_s11, 256  }
 0x309   : > { %1888 = vsyncadd (!%p1593_p13), %s1265_s11, 4294967040  ;;  %s2510_s21 = sld [smem:[#allocation21_spill]]  ;;  %s2511_s8 = sld [smem:[#allocation22_spill]] }
 0x30a   : > { %s2512_s18 = smov %s1895_s19  ;;  %s2513_s19 = smov %s1899_s20 }
 0x30f   : > { %p22_p0 = scmp.ge.s32.totalorder %s2510_s21, 4   ;;  %s2514_s20 = smov %s2511_s8 }
 0x311   :  { %24 = sbr.rel (!%p22_p0) target bundleno = 8 (0x8), region = 123 }
 0x318   :  { %1270 = vsyncpa [#allocation3], 1 }
 0x319   :  { %1272 = vsyncpa [#allocation3 + $0x1], 1 }
 0x31a   :  { %1273 = vsyncpa [#allocation6], 1 }
 0x31b   :  { %1275 = vsyncpa [#allocation6 + $0x1], 1 }
 0x31c   :  { %1276 = vsyncpa [#allocation9], 1 }
 0x31d   :  { %1278 = vsyncpa [#allocation9 + $0x1], 1 }
 0x31e   :  { %1279 = vsyncpa [#allocation4], 1 }
 0x31f   :  { %1281 = vsyncpa [#allocation4 + $0x1], 1 }

</bundles_post_ra>
